<compile_context>
chip_gen: v7x
topology: tpu7x:2x2x1
jax: 0.10.0
libtpu: 0.0.40
codegen_flags: <defaults>
</compile_context>

<pallas_src>
import functools

import jax
import jax.numpy as jnp
import numpy as np
from jax.experimental import pallas as pl
from jax.experimental.pallas import tpu as pltpu


# ----------------------------- Pallas kernel --------------------------------

def mlp_kernel(x_ref, w1_ref, b1_ref, w2_ref, b2_ref, o_ref, *,
               ew_dtype, approximate_gelu):
    # x_ref:  (tm, C)       native dtype (f32); cast to bf16 in-kernel (saves an
    #                       extra XLA astype pass over HBM)
    # w1_ref: (C, HID)      bf16, pre-transposed to (in, out), resident in VMEM
    # w2_ref: (HID, C_out)  bf16, resident in VMEM
    # b1/b2:  (1, HID)/(1, C_out) f32 (added to the f32 accumulator)
    x = x_ref[...].astype(w1_ref.dtype)
    h = jnp.dot(x, w1_ref[...], preferred_element_type=jnp.float32) + b1_ref[...]
    # Elementwise GELU: bf16 on v6e/v7x (bf16 VPU/EUP), f32 on v5e.
    h = jax.nn.gelu(h.astype(ew_dtype), approximate=approximate_gelu)
    h = h.astype(w2_ref.dtype)                       # bf16 back into the MXU
    o = jnp.dot(h, w2_ref[...], preferred_element_type=jnp.float32) + b2_ref[...]
    o_ref[...] = o.astype(o_ref.dtype)


# ----------------------------- helpers ---------------------------------------

def _device_kind():
    try:
        return jax.devices()[0].device_kind.lower()
    except Exception:
        return ""


def _elementwise_dtype():
    """bf16 elementwise on chips with bf16 VPU/EUP (v6e/v7x); f32 otherwise."""
    kind = _device_kind()
    if ("v6" in kind) or ("v7" in kind) or ("7x" in kind):
        return jnp.bfloat16
    return jnp.float32


def _auto_block_rows(m):
    """Single grid step on single-TC chips; >= 2 parallel steps on v7x."""
    kind = _device_kind()
    two_cores = ("v7" in kind) or ("7x" in kind)
    if two_cores:
        target = min(max(8, (m + 1) // 2), 512)
    else:
        target = min(m, 1024)
    return max(8, ((target + 7) // 8) * 8)   # sublane multiple


def prepare_mlp_params(w1, b1, w2, b2, *, compute_dtype=jnp.bfloat16):
    """One-time weight preparation (transpose + cast).  Cache and reuse the
    result across calls instead of re-transposing f32 weights every forward."""
    hid, c_in = w1.shape
    c_out = w2.shape[0]
    w1t = jnp.asarray(w1).T.astype(compute_dtype)          # (C, HID)
    w2t = jnp.asarray(w2).T.astype(compute_dtype)          # (HID, C_out)
    b1r = jnp.asarray(b1).reshape(1, hid).astype(jnp.float32)
    b2r = jnp.asarray(b2).reshape(1, c_out).astype(jnp.float32)
    return (w1t, b1r, w2t, b2r)


# ----------------------------- wrapper ----------------------------------------

def mlp_forward(x, params, *, block_rows=None, approximate_gelu=True,
                out_dtype=None):
    """Pallas TPU forward for Mlp: fc2(gelu(fc1(x))).  Dropout(p=0) is identity.

    x:      (..., in_features)  -- arbitrary leading dims, like nn.Linear
    params: output of prepare_mlp_params(w1, b1, w2, b2)
    """
    w1t, b1r, w2t, b2r = params
    c_in, hid = w1t.shape
    hid2, c_out = w2t.shape
    assert hid == hid2

    orig_shape = x.shape
    assert orig_shape[-1] == c_in
    out_dtype = out_dtype or x.dtype

    m = int(np.prod(orig_shape[:-1]))
    x2 = x.reshape(m, c_in)

    # --- row tiling (avoid pad/slice copies when a tile divides M) -----------
    tm = int(block_rows) if block_rows is not None else _auto_block_rows(m)
    tm = max(8, ((tm + 7) // 8) * 8)
    m_pad = pl.cdiv(m, 8) * 8
    tm = min(tm, m_pad)
    if m_pad % tm != 0:
        m_pad = pl.cdiv(m, tm) * tm
    if m_pad != m:
        x2 = jnp.pad(x2, ((0, m_pad - m), (0, 0)))
    grid = (m_pad // tm,)

    # --- VMEM budget ----------------------------------------------------------
    wbytes = lambda a: a.size * np.dtype(a.dtype).itemsize
    resident = wbytes(w1t) + wbytes(w2t) + wbytes(b1r) + wbytes(b2r)
    if resident > (24 << 20):
        # TODO(synk): hidden-dim-tiled grid with f32 VMEM accumulator needed here.
        raise ValueError(
            f"Resident fc1/fc2 weights ({resident} bytes) exceed the safe "
            "per-TC VMEM budget; tile the hidden dimension.")
    per_step = (2 * tm * c_in * np.dtype(x2.dtype).itemsize        # x, dbl-buffered
                + 2 * tm * c_out * np.dtype(out_dtype).itemsize    # out, dbl-buffered
                + 4 * tm * hid * 4)                                # f32 intermediates
    vmem_limit = int(min(128 << 20, max(32 << 20, 2 * (resident + per_step))))

    ew_dtype = _elementwise_dtype()
    kernel = functools.partial(mlp_kernel, ew_dtype=ew_dtype,
                               approximate_gelu=approximate_gelu)

    out = pl.pallas_call(
        kernel,
        out_shape=jax.ShapeDtypeStruct((m_pad, c_out), out_dtype),
        grid=grid,
        in_specs=[
            pl.BlockSpec((tm, c_in), lambda i: (i, 0)),    # x rows
            pl.BlockSpec((c_in, hid), lambda i: (0, 0)),   # W1 (resident)
            pl.BlockSpec((1, hid), lambda i: (0, 0)),      # b1
            pl.BlockSpec((hid, c_out), lambda i: (0, 0)),  # W2 (resident)
            pl.BlockSpec((1, c_out), lambda i: (0, 0)),    # b2
        ],
        out_specs=pl.BlockSpec((tm, c_out), lambda i: (i, 0)),
        compiler_params=pltpu.CompilerParams(
            dimension_semantics=("parallel",),
            vmem_limit_bytes=vmem_limit),
    )(x2, w1t, b1r, w2t, b2r)

    if m_pad != m:
        out = out[:m]
    return out.reshape(*orig_shape[:-1], c_out)


# ----------------------------- main -------------------------------------------

if __name__ == "__main__":
    # Shapes consistent with a transformer-block MLP over (batch, tokens, channels);
    # feature dims are multiples of 128 so all loads/stores stay lane-dense.
    B, N, C, HID = 2, 256, 128, 256

    key = jax.random.PRNGKey(0)
    k1, k2, k3, k4, k5 = jax.random.split(key, 5)
    init = lambda k, shape, s=0.05: (s * jax.random.normal(k, shape)).astype(jnp.float32)

    x = jax.random.normal(k1, (B, N, C), jnp.float32)
    w1 = init(k2, (HID, C))     # fc1.weight  (out, in) -- PyTorch layout
    b1 = init(k3, (HID,))       # fc1.bias
    w2 = init(k4, (C, HID))     # fc2.weight
    b2 = init(k5, (C,))         # fc2.bias

    params = prepare_mlp_params(w1, b1, w2, b2)   # one-time prep; reuse across calls
    out = mlp_forward(x, params)                  # tanh-GELU by default (EUP path)
    out = jax.block_until_ready(out)
    assert out.shape == (B, N, C)
    assert out.dtype == x.dtype                   # f32 out, like the PyTorch module

    # Pure-JAX reference on the same bf16-rounded MXU data path.
    f32 = lambda a: a.astype(jnp.bfloat16).astype(jnp.float32)
    xb, w1b, w2b = f32(x), f32(w1), f32(w2)
    h = jax.nn.gelu(xb @ w1b.T + b1, approximate=True)   # matches default flag
    h = f32(h)                                            # kernel casts hidden to bf16
    ref = h @ w2b.T + b2

    np.testing.assert_allclose(np.asarray(out, dtype=np.float32),
                               np.asarray(ref), rtol=2e-2, atol=2e-2)

    print("KERNEL_OK")
</pallas_src>

<mosaic_0001>
module attributes {stable_mosaic.version = 11 : i64} {
  func.func @mlp_kernel(%arg0: i32, %arg1: memref<512x128xf32, #tpu.memory_space<vmem>>, %arg2: memref<128x256xbf16, #tpu.memory_space<vmem>>, %arg3: memref<1x256xf32, #tpu.memory_space<vmem>>, %arg4: memref<256x128xbf16, #tpu.memory_space<vmem>>, %arg5: memref<1x128xf32, #tpu.memory_space<vmem>>, %arg6: memref<512x128xf32, #tpu.memory_space<vmem>>) attributes {dimension_semantics = [#tpu.dimension_semantics<parallel>], iteration_bounds = array<i64: 1>, scalar_prefetch = 0 : i64, scratch_operands = 0 : i64, tpu.core_type = #tpu.core_type<tc>, window_params = [{transform_indices = @transform_0, window_bounds = array<i64: 512, 128>}, {pipeline_mode = #tpu.pipeline_mode<synchronous>, transform_indices = @transform_1, window_bounds = array<i64: 128, 256>}, {pipeline_mode = #tpu.pipeline_mode<synchronous>, transform_indices = @transform_2, window_bounds = array<i64: 1, 256>}, {pipeline_mode = #tpu.pipeline_mode<synchronous>, transform_indices = @transform_3, window_bounds = array<i64: 256, 128>}, {pipeline_mode = #tpu.pipeline_mode<synchronous>, transform_indices = @transform_4, window_bounds = array<i64: 1, 128>}, {transform_indices = @transform_5, window_bounds = array<i64: 512, 128>}]} {
    %c0 = arith.constant 0 : index
    %c0_0 = arith.constant 0 : index
    %0 = vector.load %arg1[%c0, %c0_0] : memref<512x128xf32, #tpu.memory_space<vmem>>, vector<512x128xf32>
    %1 = arith.truncf %0 : vector<512x128xf32> to vector<512x128xbf16>
    %c0_1 = arith.constant 0 : index
    %c0_2 = arith.constant 0 : index
    %2 = vector.load %arg2[%c0_1, %c0_2] : memref<128x256xbf16, #tpu.memory_space<vmem>>, vector<128x256xbf16>
    %cst = arith.constant dense<0.000000e+00> : vector<512x256xf32>
    %3 = tpu.matmul %1, %2, %cst {dimension_numbers = #tpu.dot_dimension_numbers<[1], [0], [0], [1], [0, 0, 1, 1], [], []>} : vector<512x128xbf16>, vector<128x256xbf16>, vector<512x256xf32> -> vector<512x256xf32>
    %c0_3 = arith.constant 0 : index
    %c0_4 = arith.constant 0 : index
    %4 = vector.load %arg3[%c0_3, %c0_4] : memref<1x256xf32, #tpu.memory_space<vmem>>, vector<1x256xf32>
    %5 = vector.broadcast %4 : vector<1x256xf32> to vector<512x256xf32>
    %6 = arith.addf %3, %5 : vector<512x256xf32>
    %7 = arith.mulf %6, %6 : vector<512x256xf32>
    %8 = arith.mulf %6, %7 : vector<512x256xf32>
    %cst_5 = arith.constant 4.471500e-02 : f32
    %9 = vector.broadcast %cst_5 : f32 to vector<512x256xf32>
    %10 = arith.mulf %9, %8 : vector<512x256xf32>
    %11 = arith.addf %6, %10 : vector<512x256xf32>
    %cst_6 = arith.constant 0.797884583 : f32
    %12 = vector.broadcast %cst_6 : f32 to vector<512x256xf32>
    %13 = arith.mulf %12, %11 : vector<512x256xf32>
    %14 = math.tanh %13 : vector<512x256xf32>
    %cst_7 = arith.constant 1.000000e+00 : f32
    %15 = vector.broadcast %cst_7 : f32 to vector<512x256xf32>
    %16 = arith.addf %15, %14 : vector<512x256xf32>
    %cst_8 = arith.constant 5.000000e-01 : f32
    %17 = vector.broadcast %cst_8 : f32 to vector<512x256xf32>
    %18 = arith.mulf %17, %16 : vector<512x256xf32>
    %19 = arith.mulf %6, %18 : vector<512x256xf32>
    %20 = arith.truncf %19 : vector<512x256xf32> to vector<512x256xbf16>
    %c0_9 = arith.constant 0 : index
    %c0_10 = arith.constant 0 : index
    %21 = vector.load %arg4[%c0_9, %c0_10] : memref<256x128xbf16, #tpu.memory_space<vmem>>, vector<256x128xbf16>
    %cst_11 = arith.constant dense<0.000000e+00> : vector<512x128xf32>
    %22 = tpu.matmul %20, %21, %cst_11 {dimension_numbers = #tpu.dot_dimension_numbers<[1], [0], [0], [1], [0, 0, 1, 1], [], []>} : vector<512x256xbf16>, vector<256x128xbf16>, vector<512x128xf32> -> vector<512x128xf32>
    %c0_12 = arith.constant 0 : index
    %c0_13 = arith.constant 0 : index
    %23 = vector.load %arg5[%c0_12, %c0_13] : memref<1x128xf32, #tpu.memory_space<vmem>>, vector<1x128xf32>
    %24 = vector.broadcast %23 : vector<1x128xf32> to vector<512x128xf32>
    %25 = arith.addf %22, %24 : vector<512x128xf32>
    %c0_14 = arith.constant 0 : index
    %c0_15 = arith.constant 0 : index
    %26 = vector.load %arg6[%c0_14, %c0_15] : memref<512x128xf32, #tpu.memory_space<vmem>>, vector<512x128xf32>
    tpu.vector_store %arg6[%c0_14, %c0_15], %25 {strides = array<i32>} : memref<512x128xf32, #tpu.memory_space<vmem>>, vector<512x128xf32>,
    return
  }
  func.func @transform_0(%arg0: i32) -> (i32, i32) {
    %c0_i32 = arith.constant 0 : i32
    %c0_i32_0 = arith.constant 0 : i32
    return %arg0, %c0_i32 : i32, i32
  }
  func.func @transform_1(%arg0: i32) -> (i32, i32) {
    %c0_i32 = arith.constant 0 : i32
    %c0_i32_0 = arith.constant 0 : i32
    %c0_i32_1 = arith.constant 0 : i32
    return %c0_i32, %c0_i32_0 : i32, i32
  }
  func.func @transform_2(%arg0: i32) -> (i32, i32) {
    %c0_i32 = arith.constant 0 : i32
    %c0_i32_0 = arith.constant 0 : i32
    %c0_i32_1 = arith.constant 0 : i32
    return %c0_i32, %c0_i32_0 : i32, i32
  }
  func.func @transform_3(%arg0: i32) -> (i32, i32) {
    %c0_i32 = arith.constant 0 : i32
    %c0_i32_0 = arith.constant 0 : i32
    %c0_i32_1 = arith.constant 0 : i32
    return %c0_i32, %c0_i32_0 : i32, i32
  }
  func.func @transform_4(%arg0: i32) -> (i32, i32) {
    %c0_i32 = arith.constant 0 : i32
    %c0_i32_0 = arith.constant 0 : i32
    %c0_i32_1 = arith.constant 0 : i32
    return %c0_i32, %c0_i32_0 : i32, i32
  }
  func.func @transform_5(%arg0: i32) -> (i32, i32) {
    %c0_i32 = arith.constant 0 : i32
    %c0_i32_0 = arith.constant 0 : i32
    return %arg0, %c0_i32 : i32, i32
  }
}

</mosaic_0001>

<bundles_post_ra>
// kernel: tpu_custom_call.1
= control target key start
LH: loop header
LB: loop body
LE: loop exit
PB: predicated region body
PF: predicated region fallthrough
CT: control target
= control target key end

     0   :  { %10 = vsyncpa [#allocation3], 0  ;;  %s4769_s0 = inlined_call_operand.hbm [shape: f32[512,128], index: 0, kind: input, shape index: {}]   ;;  %s4770_s1 = inlined_call_operand.hbm [shape: bf16[128,256], index: 1, kind: input, shape index: {}]   ;;  %s4771_s2 = inlined_call_operand.vmem [shape: f32[1,256], index: 2, kind: input, shape index: {}]   ;;  %s4772_s3 = inlined_call_operand.hbm [shape: bf16[256,128], index: 3, kind: input, shape index: {}]   ;;  %s4773_s4 = inlined_call_operand.vmem [shape: f32[1,128], index: 4, kind: input, shape index: {}]   ;;  %s4774_s5 = inlined_call_operand.hbm [shape: f32[512,128], index: 5, kind: output, shape index: {}]  }
   0x1   :  { %11 = vsyncpa [#allocation6], 0 }
   0x2   :  { %12 = vsyncpa [#allocation4], 0  ;;  %s2806_s18 = smov [#allocation5]   ;;  %s2807_s20 = smov [#allocation2]  }
   0x3   :  { %s30_s19 = sshll.u32 %s2806_s18, 4  ;;  %s18_s21 = sshll.u32 %s2807_s20, 4  ;;  %s31_s19 = int_to_ptr.vmem [resolvable:$true] %s30_s19  ;;  %s2845_s21 = int_to_ptr.vmem [resolvable:$true] %s18_s21 }
   0x4   :  { %s2712_s24 = scalar_lea.hbm %s4770_s1, 2048 }
   0x5   :  { %p2713_p0 = scmp.ne.s32.totalorder %s4770_s1, %s2712_s24  ;;  %p2716_p1 = scmp.lt.u32.totalorder %s2712_s24, %s4770_s1 }
   0x7   :  { %p2718_p2 = pnand %p2716_p1, %p2713_p0 }
   0x9   :  { %2721 = shalt.err (!%p2718_p2)
}
   0xa   :  { %s2722_s29 = scalar_lea.vmem %s31_s19, 2048  ;;  %p2727_p4 = scmp.lt.s32.totalorder %s31_s19, %s31_s19 }
   0xb   :  { %p2723_p3 = scmp.ne.s32.totalorder %s31_s19, %s2722_s29  ;;  %p2728_p5 = scmp.lt.s32.totalorder %s2722_s29, %s2722_s29 }
   0xd   :  { %p2729_p6 = por %p2728_p5, %p2727_p4 }
   0xf   :  { %p2730_p7 = pnand %p2729_p6, %p2723_p3 }
  0x11   :  { %2733 = shalt.err (!%p2730_p7)
}
  0x12   :  { %s2808_s30 = smov 128   ;;  %s2809_s6 = smov 8  }
  0x13   :  { %36 = dma.hbm_to_vmem [thread:$0]  %s4770_s1, 2048, %s31_s19, [#allocation6], %s2808_s30, %s2808_s30, %s2809_s6  }
  0x14   :  { %s2734_s11 = scalar_lea.hbm %s4769_s0, 8192 }
  0x15   :  { %p2735_p8 = scmp.ne.s32.totalorder %s4769_s0, %s2734_s11  ;;  %p2738_p9 = scmp.lt.u32.totalorder %s2734_s11, %s4769_s0 }
  0x17   :  { %p2740_p10 = pnand %p2738_p9, %p2735_p8 }
  0x19   :  { %2743 = shalt.err (!%p2740_p10)
}
  0x1a   :  { %s2744_s16 = scalar_lea.vmem %s2845_s21, 8192  ;;  %p2749_p12 = scmp.lt.s32.totalorder %s2845_s21, %s2845_s21 }
  0x1b   :  { %p2745_p11 = scmp.ne.s32.totalorder %s2845_s21, %s2744_s16  ;;  %p2750_p13 = scmp.lt.s32.totalorder %s2744_s16, %s2744_s16 }
  0x1d   :  { %p2751_p0 = por %p2750_p13, %p2749_p12 }
  0x1f   :  { %p2752_p1 = pnand %p2751_p0, %p2745_p11 }
  0x21   :  { %2755 = shalt.err (!%p2752_p1)
}
  0x22   :  { %24 = dma.hbm_to_vmem [thread:$0]  %s4769_s0, 8192, %s2845_s21, [#allocation3], %s2808_s30, %s2808_s30, %s2809_s6  }
  0x23   :  { %s2810_s18 = smov [#allocation7]   ;;  %s2756_s23 = scalar_lea.hbm %s4772_s3, 2048 }
  0x24   :  { %s44_s19 = sshll.u32 %s2810_s18, 4  ;;  %p2757_p2 = scmp.ne.s32.totalorder %s4772_s3, %s2756_s23  ;;  %s45_s19 = int_to_ptr.vmem [resolvable:$true] %s44_s19 }
  0x25   :  { %p2760_p3 = scmp.lt.u32.totalorder %s2756_s23, %s4772_s3 }
  0x27   :  { %p2762_p4 = pnand %p2760_p3, %p2757_p2 }
  0x29   :  { %2765 = shalt.err (!%p2762_p4)
}
  0x2a   :  { %s2766_s28 = scalar_lea.vmem %s45_s19, 2048  ;;  %p2771_p6 = scmp.lt.s32.totalorder %s45_s19, %s45_s19 }
  0x2b   :  { %p2767_p5 = scmp.ne.s32.totalorder %s45_s19, %s2766_s28  ;;  %p2772_p7 = scmp.lt.s32.totalorder %s2766_s28, %s2766_s28 }
  0x2d   :  { %p2773_p8 = por %p2772_p7, %p2771_p6 }
  0x2f   :  { %p2774_p9 = pnand %p2773_p8, %p2767_p5 }
  0x31   :  { %2777 = shalt.err (!%p2774_p9)
}
  0x32   :  { %s2811_s0 = smov 64   ;;  %s2812_s21 = smov 4  }
  0x33   :  { %50 = dma.hbm_to_vmem [thread:$0]  %s4772_s3, 2048, %s45_s19, [#allocation6], %s2811_s0, %s2811_s0, %s2812_s21  }
  0x34   :  { %2800 = dma.done.wait [#allocation3], 8192  }
  0x35   :  { %2801 = vsyncadd [#allocation3], 4294959104 }
  0x36   :  { %2802 = dma.done.wait [#allocation6], 4096  }
  0x37   :  { %2803 = vsyncadd [#allocation6], 4294963200  ;;  %v2813_v0 = vmov 0   ;;  %v2416_v1 = vld [vmem:[#allocation5 + $0x4] ss:$8 sps:$4 sm:$0xff]   ;;  %v65_v20 = vld [vmem:[#allocation2 + $0x10] sm:$0xff] }
  0x38   :  { %299 = vmatprep.mubr.bf16.mxu0 %v2813_v0  ;;  %2375 = vmatprep.subr.bf16.mxu1 %v2813_v0  ;;  %v2418_v2 = vld [vmem:[#allocation5] ss:$8 sps:$4 sm:$0xff]   ;;  %v2419_v3 = vld [vmem:[#allocation5 + $0x14] ss:$8 sps:$4 sm:$0xff]   ;;  %v2421_v4 = vld [vmem:[#allocation5 + $0x10] ss:$8 sps:$4 sm:$0xff]  }
  0x39   :  { %267 = vmatprep.subr.bf16.mxu0 %v2416_v1  ;;  %v2422_v5 = vld [vmem:[#allocation5 + $0x24] ss:$8 sps:$4 sm:$0xff]   ;;  %v2424_v6 = vld [vmem:[#allocation5 + $0x20] ss:$8 sps:$4 sm:$0xff]   ;;  %v2425_v7 = vld [vmem:[#allocation5 + $0x34] ss:$8 sps:$4 sm:$0xff]  }
  0x3a   :  { %268 = vmatpush1.bf16.msra.mxu0 %v2418_v2  ;;  %v2427_v8 = vld [vmem:[#allocation5 + $0x30] ss:$8 sps:$4 sm:$0xff]   ;;  %v2428_v9 = vld [vmem:[#allocation5 + $0x44] ss:$8 sps:$4 sm:$0xff]   ;;  %v2430_v10 = vld [vmem:[#allocation5 + $0x40] ss:$8 sps:$4 sm:$0xff]  }
  0x3b   :  { %269 = vmatprep.subr.bf16.mxu0 %v2419_v3  ;;  %v2431_v11 = vld [vmem:[#allocation5 + $0x54] ss:$8 sps:$4 sm:$0xff]   ;;  %v2433_v12 = vld [vmem:[#allocation5 + $0x50] ss:$8 sps:$4 sm:$0xff]   ;;  %v2434_v13 = vld [vmem:[#allocation5 + $0x64] ss:$8 sps:$4 sm:$0xff]  }
  0x3c   :  { %v2436_v14 = vld [vmem:[#allocation5 + $0x60] ss:$8 sps:$4 sm:$0xff]   ;;  %v2437_v15 = vld [vmem:[#allocation5 + $0x74] ss:$8 sps:$4 sm:$0xff]   ;;  %v2439_v16 = vld [vmem:[#allocation5 + $0x70] ss:$8 sps:$4 sm:$0xff]  }
  0x3d   :  { %v63_v17 = vld [vmem:[#allocation2] sm:$0xff]  ;;  %v64_v18 = vld [vmem:[#allocation2 + $0x8] sm:$0xff]  ;;  %v66_v21 = vld [vmem:[#allocation2 + $0x18] sm:$0xff] }
  0x3e   :  { %270 = vmatpush1.bf16.msra.mxu0 %v2421_v4  ;;  %v127_v19 = vpack.c.bf16 %v64_v18, %v63_v17  ;;  %v128_v22 = vpack.c.bf16 %v66_v21, %v65_v20  ;;  %v67_v23 = vld [vmem:[#allocation2 + $0x20] sm:$0xff]  ;;  %v68_v24 = vld [vmem:[#allocation2 + $0x28] sm:$0xff]  ;;  %v69_v26 = vld [vmem:[#allocation2 + $0x30] sm:$0xff] }
  0x3f   :  { %271 = vmatprep.subr.bf16.mxu0 %v2422_v5  ;;  %v129_v25 = vpack.c.bf16 %v68_v24, %v67_v23  ;;  %v70_v27 = vld [vmem:[#allocation2 + $0x38] sm:$0xff]  ;;  %v71_v29 = vld [vmem:[#allocation2 + $0x40] sm:$0xff]  ;;  %v72_v30 = vld [vmem:[#allocation2 + $0x48] sm:$0xff] }
  0x40   :  { %v130_v28 = vpack.c.bf16 %v70_v27, %v69_v26  ;;  %v131_v31 = vpack.c.bf16 %v72_v30, %v71_v29  ;;  %v73_v32 = vld [vmem:[#allocation2 + $0x50] sm:$0xff]  ;;  %v74_v33 = vld [vmem:[#allocation2 + $0x58] sm:$0xff]  ;;  %v75_v35 = vld [vmem:[#allocation2 + $0x60] sm:$0xff] }
  0x41   :  { %v132_v34 = vpack.c.bf16 %v74_v33, %v73_v32  ;;  %v76_v36 = vld [vmem:[#allocation2 + $0x68] sm:$0xff]  ;;  %v77_v38 = vld [vmem:[#allocation2 + $0x70] sm:$0xff]  ;;  %v78_v39 = vld [vmem:[#allocation2 + $0x78] sm:$0xff] }
  0x42   :  { %272 = vmatpush1.bf16.msra.mxu0 %v2424_v6  ;;  %v133_v37 = vpack.c.bf16 %v76_v36, %v75_v35  ;;  %v134_v40 = vpack.c.bf16 %v78_v39, %v77_v38  ;;  %v79_v41 = vld [vmem:[#allocation2 + $0x80] sm:$0xff]  ;;  %v80_v42 = vld [vmem:[#allocation2 + $0x88] sm:$0xff]  ;;  %v81_v45 = vld [vmem:[#allocation2 + $0x90] sm:$0xff] }
  0x43   :  { %273 = vmatprep.subr.bf16.mxu0 %v2425_v7  ;;  %v135_v43 = vpack.c.bf16 %v80_v42, %v79_v41  ;;  %v2440_v44 = vld [vmem:[#allocation7] sm:$0xff]   ;;  %v82_v46 = vld [vmem:[#allocation2 + $0x98] sm:$0xff]  ;;  %v2441_v47 = vld [vmem:[#allocation7 + $0x8] sm:$0xff]  }
  0x44   :  { %2391 = vmatpush1.bf16.msra.mxu1 %v2440_v44  ;;  %v136_v48 = vpack.c.bf16 %v82_v46, %v81_v45  ;;  %v2442_v49 = vld [vmem:[#allocation7 + $0x10] sm:$0xff]   ;;  %v83_v50 = vld [vmem:[#allocation2 + $0xa0] sm:$0xff]  ;;  %v84_v51 = vld [vmem:[#allocation2 + $0xa8] sm:$0xff] }
  0x45   :  { %2376 = vmatprep.subr.bf16.mxu1 %v2813_v0  ;;  %v2443_v52 = vld [vmem:[#allocation7 + $0x18] sm:$0xff]   ;;  %v137_v53 = vpack.c.bf16 %v84_v51, %v83_v50  ;;  %v2444_v54 = vld [vmem:[#allocation7 + $0x20] sm:$0xff]   ;;  %v85_v55 = vld [vmem:[#allocation2 + $0xb0] sm:$0xff] }
  0x46   :  { %274 = vmatpush1.bf16.msra.mxu0 %v2427_v8  ;;  %v86_v56 = vld [vmem:[#allocation2 + $0xb8] sm:$0xff]  ;;  %v2445_v57 = vld [vmem:[#allocation7 + $0x28] sm:$0xff]   ;;  %v2446_v59 = vld [vmem:[#allocation7 + $0x30] sm:$0xff]  }
  0x47   :  { %275 = vmatprep.subr.bf16.mxu0 %v2428_v9  ;;  %v138_v58 = vpack.c.bf16 %v86_v56, %v85_v55  ;;  %v87_v60 = vld [vmem:[#allocation2 + $0xc0] sm:$0xff]  ;;  %v88_v61 = vld [vmem:[#allocation2 + $0xc8] sm:$0xff]  ;;  %v2447_v62 = vld [vmem:[#allocation7 + $0x38] sm:$0xff]  }
  0x48   :  { %2392 = vmatpush1.bf16.msra.mxu1 %v2441_v47  ;;  %v139_v63 = vpack.c.bf16 %v88_v61, %v87_v60  ;;  %v2448_v1 = vld [vmem:[#allocation7 + $0x40] sm:$0xff]   ;;  %v89_v2 = vld [vmem:[#allocation2 + $0xd0] sm:$0xff]  ;;  %v90_v3 = vld [vmem:[#allocation2 + $0xd8] sm:$0xff] }
  0x49   :  { %2377 = vmatprep.subr.bf16.mxu1 %v2813_v0  ;;  %v2449_v4 = vld [vmem:[#allocation7 + $0x48] sm:$0xff]   ;;  %v140_v5 = vpack.c.bf16 %v90_v3, %v89_v2  ;;  %v2450_v6 = vld [vmem:[#allocation7 + $0x50] sm:$0xff]   ;;  %v91_v7 = vld [vmem:[#allocation2 + $0xe0] sm:$0xff] }
  0x4a   :  { %276 = vmatpush1.bf16.msra.mxu0 %v2430_v10  ;;  %v92_v8 = vld [vmem:[#allocation2 + $0xe8] sm:$0xff]  ;;  %v2451_v9 = vld [vmem:[#allocation7 + $0x58] sm:$0xff]   ;;  %v95_v17 = vld [vmem:[#allocation2 + $0x100] sm:$0xff] }
  0x4b   :  { %277 = vmatprep.subr.bf16.mxu0 %v2431_v11  ;;  %v141_v10 = vpack.c.bf16 %v92_v8, %v91_v7  ;;  %v2452_v11 = vld [vmem:[#allocation7 + $0x60] sm:$0xff]   ;;  %v96_v18 = vld [vmem:[#allocation2 + $0x108] sm:$0xff]  ;;  %v97_v20 = vld [vmem:[#allocation2 + $0x110] sm:$0xff] }
  0x4c   :  { %2393 = vmatpush1.bf16.msra.mxu1 %v2442_v49  ;;  %v98_v21 = vld [vmem:[#allocation2 + $0x118] sm:$0xff]  ;;  %v99_v24 = vld [vmem:[#allocation2 + $0x120] sm:$0xff]  ;;  %v101_v27 = vld [vmem:[#allocation2 + $0x130] sm:$0xff] }
  0x4d   :  { %2378 = vmatprep.subr.bf16.mxu1 %v2813_v0  ;;  %v144_v23 = vpack.c.bf16 %v98_v21, %v97_v20  ;;  %v103_v30 = vld [vmem:[#allocation2 + $0x140] sm:$0xff]  ;;  %v105_v33 = vld [vmem:[#allocation2 + $0x150] sm:$0xff]  ;;  %v114_v46 = vld [vmem:[#allocation2 + $0x198] sm:$0xff] }
  0x4e   :  { %278 = vmatpush1.bf16.msra.mxu0 %v2433_v12  ;;  %v93_v12 = vld [vmem:[#allocation2 + $0xf0] sm:$0xff]  ;;  %v107_v36 = vld [vmem:[#allocation2 + $0x160] sm:$0xff]  ;;  %v116_v51 = vld [vmem:[#allocation2 + $0x1a8] sm:$0xff] }
  0x4f   :  { %279 = vmatprep.subr.bf16.mxu0 %v2434_v13  ;;  %v94_v13 = vld [vmem:[#allocation2 + $0xf8] sm:$0xff]  ;;  %v109_v39 = vld [vmem:[#allocation2 + $0x170] sm:$0xff]  ;;  %v111_v42 = vld [vmem:[#allocation2 + $0x180] sm:$0xff] }
  0x50   :  { %2394 = vmatpush1.bf16.msra.mxu1 %v2443_v52  ;;  %v113_v45 = vld [vmem:[#allocation2 + $0x190] sm:$0xff]  ;;  %v115_v50 = vld [vmem:[#allocation2 + $0x1a0] sm:$0xff] }
  0x51   :  { %2379 = vmatprep.subr.bf16.mxu1 %v2813_v0 }
  0x52   :  { %280 = vmatpush1.bf16.msra.mxu0 %v2436_v14  ;;  %v2453_v14 = vld [vmem:[#allocation7 + $0x68] sm:$0xff]  }
  0x53   :  { %281 = vmatprep.subr.bf16.mxu0 %v2437_v15  ;;  %v142_v15 = vpack.c.bf16 %v94_v13, %v93_v12  ;;  %v119_v12 = vld [vmem:[#allocation2 + $0x1c0] sm:$0xff]  ;;  %v120_v13 = vld [vmem:[#allocation2 + $0x1c8] sm:$0xff] }
  0x54   :  { %2395 = vmatpush1.bf16.msra.mxu1 %v2444_v54 }
  0x55   :  { %2380 = vmatprep.subr.bf16.mxu1 %v2813_v0 }
  0x56   :  { %282 = vmatpush1.bf16.msra.mxu0 %v2439_v16  ;;  %v2454_v16 = vld [vmem:[#allocation7 + $0x70] sm:$0xff]  }
  0x57   :  { %1971 = vmatprep.subr.bf16.mxu0 %v2813_v0 }
  0x58   :  { %2396 = vmatpush1.bf16.msra.mxu1 %v2445_v57 }
  0x59   :  { %300 = vmatmul.mubr.bf16.vlgmr.msra.gmra.mrb[0].mxu0 %v127_v19  ;;  %2381 = vmatprep.subr.bf16.mxu1 %v2813_v0  ;;  %v143_v19 = vpack.c.bf16 %v96_v18, %v95_v17 }
  0x5a   :  { %309 = vmatprep.mubr.bf16.mxu0 %v2813_v0  ;;  %1972 = vmatpush1.bf16.msra.mxu0 %v2440_v44 }
  0x5b   :  { %1973 = vmatprep.subr.bf16.mxu0 %v2813_v0 }
  0x5c   :  { %2397 = vmatpush1.bf16.msra.mxu1 %v2446_v59 }
  0x5d   :  { %2382 = vmatprep.subr.bf16.mxu1 %v2813_v0 }
  0x5e   :  { %1974 = vmatpush1.bf16.msra.mxu0 %v2441_v47  ;;  %v152_v47 = vpack.c.bf16 %v114_v46, %v113_v45 }
  0x5f   :  { %1975 = vmatprep.subr.bf16.mxu0 %v2813_v0 }
  0x60   :  { %2398 = vmatpush1.bf16.msra.mxu1 %v2447_v62 }
  0x61   :  { %310 = vmatmul.mubr.bf16.gmra.mrb[4].mxu0 %v128_v22  ;;  %2383 = vmatprep.subr.bf16.mxu1 %v2813_v0  ;;  %v2455_v22 = vld [vmem:[#allocation7 + $0x78] sm:$0xff]  }
  0x62   :  { %319 = vmatprep.mubr.bf16.mxu0 %v2813_v0  ;;  %1976 = vmatpush1.bf16.msra.mxu0 %v2442_v49 }
  0x63   :  { %1977 = vmatprep.subr.bf16.mxu0 %v2813_v0 }
  0x64   :  { %2399 = vmatpush1.bf16.msra.mxu1 %v2448_v1 }
  0x65   :  { %2384 = vmatprep.subr.bf16.mxu1 %v2813_v0 }
  0x66   :  { %1978 = vmatpush1.bf16.msra.mxu0 %v2443_v52  ;;  %v153_v52 = vpack.c.bf16 %v116_v51, %v115_v50 }
  0x67   :  { %1979 = vmatprep.subr.bf16.mxu0 %v2813_v0 }
  0x68   :  { %2400 = vmatpush1.bf16.msra.mxu1 %v2449_v4 }
  0x69   :  { %320 = vmatmul.mubr.bf16.gmra.mrb[8].mxu0 %v129_v25  ;;  %2385 = vmatprep.subr.bf16.mxu1 %v2813_v0  ;;  %v100_v25 = vld [vmem:[#allocation2 + $0x128] sm:$0xff] }
  0x6a   :  { %329 = vmatprep.mubr.bf16.mxu0 %v2813_v0  ;;  %1980 = vmatpush1.bf16.msra.mxu0 %v2444_v54  ;;  %v145_v26 = vpack.c.bf16 %v100_v25, %v99_v24  ;;  %v175_v54 = vld [vmem:[%s4771_s2] sm:$0x3] }
  0x6b   :  { %1981 = vmatprep.subr.bf16.mxu0 %v2813_v0 }
  0x6c   :  { %2401 = vmatpush1.bf16.msra.mxu1 %v2450_v6 }
  0x6d   :  { %2386 = vmatprep.subr.bf16.mxu1 %v2813_v0 }
  0x6e   :  { %1982 = vmatpush1.bf16.msra.mxu0 %v2445_v57 }
  0x6f   :  { %1983 = vmatprep.subr.bf16.mxu0 %v2813_v0 }
  0x70   :  { %2402 = vmatpush1.bf16.msra.mxu1 %v2451_v9 }
  0x71   :  { %330 = vmatmul.mubr.bf16.gmra.mrb[12].mxu0 %v130_v28  ;;  %2387 = vmatprep.subr.bf16.mxu1 %v2813_v0  ;;  %v102_v28 = vld [vmem:[#allocation2 + $0x138] sm:$0xff] }
  0x72   :  { %339 = vmatprep.mubr.bf16.mxu0 %v2813_v0  ;;  %1984 = vmatpush1.bf16.msra.mxu0 %v2446_v59  ;;  %v146_v29 = vpack.c.bf16 %v102_v28, %v101_v27  ;;  %v118_v59 = vld [vmem:[#allocation2 + $0x1b8] sm:$0xff] }
  0x73   :  { %1985 = vmatprep.subr.bf16.mxu0 %v2813_v0 }
  0x74   :  { %2403 = vmatpush1.bf16.msra.mxu1 %v2452_v11 }
  0x75   :  { %2388 = vmatprep.subr.bf16.mxu1 %v2813_v0 }
  0x76   :  { %1986 = vmatpush1.bf16.msra.mxu0 %v2447_v62 }
  0x77   :  { %1987 = vmatprep.subr.bf16.mxu0 %v2813_v0 }
  0x78   :  { %2404 = vmatpush1.bf16.msra.mxu1 %v2453_v14 }
  0x79   :  { %340 = vmatmul.mubr.bf16.gmra.mrb[16].mxu0 %v131_v31  ;;  %2389 = vmatprep.subr.bf16.mxu1 %v2813_v0  ;;  %v104_v31 = vld [vmem:[#allocation2 + $0x148] sm:$0xff] }
  0x7a   :  { %349 = vmatprep.mubr.bf16.mxu0 %v2813_v0  ;;  %1988 = vmatpush1.bf16.msra.mxu0 %v2448_v1  ;;  %v147_v32 = vpack.c.bf16 %v104_v31, %v103_v30 }
  0x7b   :  { %1989 = vmatprep.subr.bf16.mxu0 %v2813_v0 }
  0x7c   :  { %2405 = vmatpush1.bf16.msra.mxu1 %v2454_v16 }
  0x7d   :  { %2390 = vmatprep.subr.bf16.mxu1 %v2813_v0 }
  0x7e   :  { %1990 = vmatpush1.bf16.msra.mxu0 %v2449_v4 }
  0x7f   :  { %1991 = vmatprep.subr.bf16.mxu0 %v2813_v0 }
  0x80   :  { %2406 = vmatpush1.bf16.msra.mxu1 %v2455_v22 }
  0x81   :  { %350 = vmatmul.mubr.bf16.gmra.mrb[20].mxu0 %v132_v34  ;;  %v106_v34 = vld [vmem:[#allocation2 + $0x158] sm:$0xff] }
  0x82   :  { %359 = vmatprep.mubr.bf16.mxu0 %v2813_v0  ;;  %1992 = vmatpush1.bf16.msra.mxu0 %v2450_v6  ;;  %v148_v35 = vpack.c.bf16 %v106_v34, %v105_v33 }
  0x83   :  { %1993 = vmatprep.subr.bf16.mxu0 %v2813_v0 }
  0x86   :  { %1994 = vmatpush1.bf16.msra.mxu0 %v2451_v9 }
  0x87   :  { %1995 = vmatprep.subr.bf16.mxu0 %v2813_v0 }
  0x89   :  { %360 = vmatmul.mubr.bf16.gmra.mrb[24].mxu0 %v133_v37  ;;  %v108_v37 = vld [vmem:[#allocation2 + $0x168] sm:$0xff] }
  0x8a   :  { %369 = vmatprep.mubr.bf16.mxu0 %v2813_v0  ;;  %1996 = vmatpush1.bf16.msra.mxu0 %v2452_v11  ;;  %v149_v38 = vpack.c.bf16 %v108_v37, %v107_v36 }
  0x8b   :  { %1997 = vmatprep.subr.bf16.mxu0 %v2813_v0 }
  0x8e   :  { %1998 = vmatpush1.bf16.msra.mxu0 %v2453_v14 }
  0x8f   :  { %1999 = vmatprep.subr.bf16.mxu0 %v2813_v0 }
  0x91   :  { %370 = vmatmul.mubr.bf16.gmra.mrb[28].mxu0 %v134_v40  ;;  %v110_v40 = vld [vmem:[#allocation2 + $0x178] sm:$0xff] }
  0x92   :  { %379 = vmatprep.mubr.bf16.mxu0 %v2813_v0  ;;  %2000 = vmatpush1.bf16.msra.mxu0 %v2454_v16  ;;  %v150_v41 = vpack.c.bf16 %v110_v40, %v109_v39  ;;  %v121_v40 = vld [vmem:[#allocation2 + $0x1d0] sm:$0xff] }
  0x93   :  { %2001 = vmatprep.subr.bf16.mxu0 %v2813_v0 }
  0x96   :  { %2002 = vmatpush1.bf16.msra.mxu0 %v2455_v22 }
  0x99   :  { %380 = vmatmul.mubr.bf16.gmra.mrb[32].mxu0 %v135_v43  ;;  %v112_v43 = vld [vmem:[#allocation2 + $0x188] sm:$0xff] }
  0x9a   :  { %389 = vmatprep.mubr.bf16.mxu0 %v2813_v0  ;;  %v151_v44 = vpack.c.bf16 %v112_v43, %v111_v42 }
  0xa1   :  { %390 = vmatmul.mubr.bf16.gmra.mrb[36].mxu0 %v136_v48  ;;  %v177_v48 = vlaneseq }
  0xa2   :  { %399 = vmatprep.mubr.bf16.mxu0 %v2813_v0 }
  0xa3   :  { %v178_v49 = vshrl.u32 %v177_v48, 7  ;;  %v3016_v48 = vld [vmem:[#allocation2 + $0x1e8] sm:$0xff] }
  0xa5   :  { %v183_v55 = vsub.s32 1, %v178_v49 }
  0xa7   :  { %v2958_v57 = vrot.slane %v175_v54, %v183_v55 }
  0xa9   :  { %400 = vmatmul.mubr.bf16.gmra.mrb[40].mxu0 %v137_v53  ;;  %v179_v53 = vsub.s32 0, %v178_v49 }
  0xaa   :  { %409 = vmatprep.mubr.bf16.mxu0 %v2813_v0 }
  0xab   :  { %v2956_v56 = vrot.slane %v175_v54, %v179_v53 }
  0xb1   :  { %410 = vmatmul.mubr.bf16.gmra.mrb[44].mxu0 %v138_v58  ;;  %v117_v58 = vld [vmem:[#allocation2 + $0x1b0] sm:$0xff] }
  0xb2   :  { %419 = vmatprep.mubr.bf16.mxu0 %v2813_v0 }
  0xb9   :  { %420 = vmatmul.mubr.bf16.gmra.mrb[48].mxu0 %v139_v63  ;;  %v154_v63 = vpack.c.bf16 %v118_v59, %v117_v58 }
  0xba   :  { %429 = vmatprep.mubr.bf16.mxu0 %v2813_v0 }
  0xc1   :  { %430 = vmatmul.mubr.bf16.gmra.mrb[52].mxu0 %v140_v5 }
  0xc2   :  { %439 = vmatprep.mubr.bf16.mxu0 %v2813_v0 }
  0xc9   :  { %440 = vmatmul.mubr.bf16.gmra.mrb[56].mxu0 %v141_v10 }
  0xca   :  { %449 = vmatprep.mubr.bf16.mxu0 %v2813_v0 }
  0xd1   :  { %450 = vmatmul.mubr.bf16.gmra.mrb[60].mxu0 %v142_v15 }
  0xd2   :  { %459 = vmatprep.mubr.bf16.mxu0 %v2813_v0 }
  0xd9   :  { %460 = vmatmul.mubr.bf16.gmra.mrb[64].mxu0 %v143_v19 }
  0xda   :  { %469 = vmatprep.mubr.bf16.mxu0 %v2813_v0 }
  0xe1   :  { %470 = vmatmul.mubr.bf16.gmra.mrb[68].mxu0 %v144_v23  ;;  %v155_v23 = vpack.c.bf16 %v120_v13, %v119_v12 }
  0xe2   :  { %479 = vmatprep.mubr.bf16.mxu0 %v2813_v0 }
  0xe9   :  { %480 = vmatmul.mubr.bf16.gmra.mrb[72].mxu0 %v145_v26 }
  0xea   :  { %489 = vmatprep.mubr.bf16.mxu0 %v2813_v0 }
  0xf1   :  { %490 = vmatmul.mubr.bf16.gmra.mrb[76].mxu0 %v146_v29 }
  0xf2   :  { %499 = vmatprep.mubr.bf16.mxu0 %v2813_v0 }
  0xf9   :  { %500 = vmatmul.mubr.bf16.gmra.mrb[80].mxu0 %v147_v32 }
  0xfa   :  { %509 = vmatprep.mubr.bf16.mxu0 %v2813_v0 }
 0x101   :  { %510 = vmatmul.mubr.bf16.gmra.mrb[84].mxu0 %v148_v35 }
 0x102   :  { %519 = vmatprep.mubr.bf16.mxu0 %v2813_v0 }
 0x109   :  { %520 = vmatmul.mubr.bf16.gmra.mrb[88].mxu0 %v149_v38 }
 0x10a   :  { %529 = vmatprep.mubr.bf16.mxu0 %v2813_v0 }
 0x111   :  { %530 = vmatmul.mubr.bf16.gmra.mrb[92].mxu0 %v150_v41  ;;  %v122_v41 = vld [vmem:[#allocation2 + $0x1d8] sm:$0xff] }
 0x112   :  { %539 = vmatprep.mubr.bf16.mxu0 %v2813_v0 }
 0x119   :  { %540 = vmatmul.mubr.bf16.gmra.mrb[96].mxu0 %v151_v44 }
 0x11a   :  { %549 = vmatprep.mubr.bf16.mxu0 %v2813_v0 }
 0x121   :  { %550 = vmatmul.mubr.bf16.gmra.mrb[100].mxu0 %v152_v47  ;;  %v3014_v47 = vld [vmem:[#allocation2 + $0x1e0] sm:$0xff] }
 0x122   :  { %559 = vmatprep.mubr.bf16.mxu0 %v2813_v0 }
 0x129   :  { %560 = vmatmul.mubr.bf16.gmra.mrb[104].mxu0 %v153_v52  ;;  %v156_v52 = vpack.c.bf16 %v122_v41, %v121_v40 }
 0x12a   :  { %569 = vmatprep.mubr.bf16.mxu0 %v2813_v0 }
 0x12c   :  { %v301_v60 = vpop.f32.mrb[0].mxu0 }
 0x12d   :  { %v2962_v61 = vadd.f32 %v301_v60, %v2956_v56  ;;  %v303_v62 = vpop.f32.mrb[1].mxu0 }
 0x12e   :  { %v2965_v1 = vadd.f32 %v303_v62, %v2958_v57  ;;  %v305_v2 = vpop.f32.mrb[2].mxu0 }
 0x12f   :  { %v620_v3 = vmul.f32 %v2962_v61, %v2962_v61  ;;  %v2970_v4 = vadd.f32 %v305_v2, %v2956_v56  ;;  %v307_v5 = vpop.f32.mrb[3].mxu0  ;;  %v157_v2 = vpack.c.bf16 %v3016_v48, %v3014_v47 }
 0x130   :  { %v621_v6 = vmul.f32 %v2965_v1, %v2965_v1  ;;  %v2975_v7 = vadd.f32 %v307_v5, %v2958_v57 }
 0x131   :  { %v748_v8 = vmul.f32 %v620_v3, %v2962_v61  ;;  %v622_v9 = vmul.f32 %v2970_v4, %v2970_v4  ;;  %570 = vmatmul.mubr.bf16.gmra.mrb[108].mxu0 %v154_v63 }
 0x132   :  { %v749_v10 = vmul.f32 %v621_v6, %v2965_v1  ;;  %v623_v11 = vmul.f32 %v2975_v7, %v2975_v7  ;;  %579 = vmatprep.mubr.bf16.mxu0 %v2813_v0 }
 0x133   :  { %v876_v14 = vmul.f32 0.044715, %v748_v8  ;;  %v750_v15 = vmul.f32 %v622_v9, %v2970_v4 }
 0x134   :  { %v877_v16 = vmul.f32 0.044715, %v749_v10  ;;  %v751_v17 = vmul.f32 %v623_v11, %v2975_v7  ;;  %v311_v18 = vpop.f32.mrb[4].mxu0 }
 0x135   :  { %v1004_v19 = vadd.f32 %v876_v14, %v2962_v61  ;;  %v878_v20 = vmul.f32 0.044715, %v750_v15  ;;  %v2988_v21 = vadd.f32 %v311_v18, %v2956_v56  ;;  %v313_v22 = vpop.f32.mrb[5].mxu0  ;;  %v3041_v14 = vld [vmem:[#allocation2 + $0x1f0] sm:$0xff]  ;;  %v3043_v15 = vld [vmem:[#allocation2 + $0x1f8] sm:$0xff] }
 0x136   :  { %v1005_v24 = vadd.f32 %v877_v16, %v2965_v1  ;;  %v879_v25 = vmul.f32 0.044715, %v751_v17  ;;  %v2992_v26 = vadd.f32 %v313_v22, %v2958_v57  ;;  %v315_v27 = vpop.f32.mrb[6].mxu0 }
 0x137   :  { %v1132_v28 = vmul.f32 0.7978846, %v1004_v19  ;;  %v1006_v29 = vadd.f32 %v878_v20, %v2970_v4  ;;  %v624_v30 = vmul.f32 %v2988_v21, %v2988_v21  ;;  %v2998_v31 = vadd.f32 %v315_v27, %v2956_v56  ;;  %v317_v32 = vpop.f32.mrb[7].mxu0 }
 0x138   :  { %v1133_v33 = vmul.f32 0.7978846, %v1005_v24  ;;  %v1007_v34 = vadd.f32 %v879_v25, %v2975_v7  ;;  %v625_v35 = vmul.f32 %v2992_v26, %v2992_v26  ;;  %v3004_v36 = vadd.f32 %v317_v32, %v2958_v57 }
 0x139   :  { %2456 = vtanh.f32 %v1132_v28  ;;  %v1134_v37 = vmul.f32 0.7978846, %v1006_v29  ;;  %v752_v38 = vmul.f32 %v624_v30, %v2988_v21  ;;  %v626_v39 = vmul.f32 %v2998_v31, %v2998_v31  ;;  %580 = vmatmul.mubr.bf16.gmra.mrb[112].mxu0 %v155_v23 }
 0x13a   :  { %2458 = vtanh.f32 %v1133_v33  ;;  %v1135_v42 = vmul.f32 0.7978846, %v1007_v34  ;;  %v753_v43 = vmul.f32 %v625_v35, %v2992_v26  ;;  %v627_v44 = vmul.f32 %v3004_v36, %v3004_v36  ;;  %589 = vmatprep.mubr.bf16.mxu0 %v2813_v0 }
 0x13b   :  { %2460 = vtanh.f32 %v1134_v37  ;;  %v880_v45 = vmul.f32 0.044715, %v752_v38  ;;  %v754_v46 = vmul.f32 %v626_v39, %v2998_v31  ;;  %v158_v27 = vpack.c.bf16 %v3043_v15, %v3041_v14 }
 0x13c   :  { %v881_v49 = vmul.f32 0.044715, %v753_v43  ;;  %v755_v50 = vmul.f32 %v627_v44, %v3004_v36  ;;  %v321_v51 = vpop.f32.mrb[8].mxu0  ;;  %2462 = vtanh.f32 %v1135_v42 }
 0x13d   :  { %v1008_v53 = vadd.f32 %v880_v45, %v2988_v21  ;;  %v882_v54 = vmul.f32 0.044715, %v754_v46  ;;  %v3021_v55 = vadd.f32 %v321_v51, %v2956_v56  ;;  %v323_v58 = vpop.f32.mrb[9].mxu0 }
 0x13e   :  { %v1009_v59 = vadd.f32 %v881_v49, %v2992_v26  ;;  %v883_v60 = vmul.f32 0.044715, %v755_v50  ;;  %v3025_v62 = vadd.f32 %v323_v58, %v2958_v57  ;;  %v325_v63 = vpop.f32.mrb[10].mxu0 }
 0x13f   :  { %v1136_v3 = vmul.f32 0.7978846, %v1008_v53  ;;  %v1010_v5 = vadd.f32 %v882_v54, %v2998_v31  ;;  %v628_v6 = vmul.f32 %v3021_v55, %v3021_v55  ;;  %v3033_v8 = vadd.f32 %v325_v63, %v2956_v56  ;;  %v327_v9 = vpop.f32.mrb[11].mxu0 }
 0x140   :  { %v1137_v10 = vmul.f32 0.7978846, %v1009_v59  ;;  %v1011_v11 = vadd.f32 %v883_v60, %v3004_v36  ;;  %v629_v12 = vmul.f32 %v3025_v62, %v3025_v62  ;;  %v3039_v13 = vadd.f32 %v327_v9, %v2958_v57 }
 0x141   :  { %2464 = vtanh.f32 %v1136_v3  ;;  %v1138_v16 = vmul.f32 0.7978846, %v1010_v5  ;;  %v756_v17 = vmul.f32 %v628_v6, %v3021_v55  ;;  %v630_v18 = vmul.f32 %v3033_v8, %v3033_v8  ;;  %590 = vmatmul.mubr.bf16.gmra.mrb[116].mxu0 %v156_v52 }
 0x142   :  { %2466 = vtanh.f32 %v1137_v10  ;;  %v1139_v19 = vmul.f32 0.7978846, %v1011_v11  ;;  %v757_v20 = vmul.f32 %v629_v12, %v3025_v62  ;;  %v631_v22 = vmul.f32 %v3039_v13, %v3039_v13  ;;  %599 = vmatprep.mubr.bf16.mxu0 %v2813_v0 }
 0x143   :  { %v2457_v23 = vpop.eup %2456  ;;  %2468 = vtanh.f32 %v1138_v16  ;;  %v884_v24 = vmul.f32 0.044715, %v756_v17  ;;  %v758_v25 = vmul.f32 %v630_v18, %v3033_v8 }
 0x144   :  { %v2459_v28 = vpop.eup %2458  ;;  %v1388_v29 = vadd.f32 1.0, %v2457_v23  ;;  %2470 = vtanh.f32 %v1139_v19  ;;  %v3055_v30 = vmul.f32 0.044715, %v757_v20  ;;  %v759_v32 = vmul.f32 %v631_v22, %v3039_v13  ;;  %v331_v33 = vpop.f32.mrb[12].mxu0 }
 0x145   :  { %v2461_v34 = vpop.eup %2460  ;;  %v1012_v35 = vadd.f32 %v884_v24, %v3021_v55  ;;  %v886_v37 = vmul.f32 0.044715, %v758_v25  ;;  %v3060_v38 = vadd.f32 %v331_v33, %v2956_v56  ;;  %v333_v39 = vpop.f32.mrb[13].mxu0  ;;  %v1389_v40 = vadd.f32 1.0, %v2459_v28 }
 0x146   :  { %v1516_v41 = vmul.f32 0.5, %v1388_v29  ;;  %v1390_v42 = vadd.f32 1.0, %v2461_v34  ;;  %v3062_v43 = vmul.f32 0.044715, %v759_v32  ;;  %v3065_v44 = vadd.f32 %v333_v39, %v2958_v57  ;;  %v335_v45 = vpop.f32.mrb[14].mxu0  ;;  %v2463_v46 = vpop.eup %2462 }
 0x147   :  { %v1140_v47 = vmul.f32 0.7978846, %v1012_v35  ;;  %v1014_v48 = vadd.f32 %v886_v37, %v3033_v8  ;;  %v632_v49 = vmul.f32 %v3060_v38, %v3060_v38  ;;  %v3071_v50 = vadd.f32 %v335_v45, %v2956_v56  ;;  %v337_v51 = vpop.f32.mrb[15].mxu0 }
 0x148   :  { %v3074_v52 = vmul.f32 %v1516_v41, %v2962_v61  ;;  %v1518_v53 = vmul.f32 0.5, %v1390_v42  ;;  %v633_v54 = vmul.f32 %v3065_v44, %v3065_v44  ;;  %v3079_v58 = vadd.f32 %v337_v51, %v2958_v57 }
 0x149   :  { %2472 = vtanh.f32 %v1140_v47  ;;  %v1142_v59 = vmul.f32 0.7978846, %v1014_v48  ;;  %v760_v60 = vmul.f32 %v632_v49, %v3060_v38  ;;  %v634_v63 = vmul.f32 %v3071_v50, %v3071_v50  ;;  %600 = vmatmul.mubr.bf16.gmra.mrb[120].mxu0 %v157_v2 }
 0x14a   :  { %v3085_v3 = vmul.f32 %v1518_v53, %v2970_v4  ;;  %v761_v61 = vmul.f32 %v633_v54, %v3065_v44  ;;  %v635_v5 = vmul.f32 %v3079_v58, %v3079_v58  ;;  %609 = vmatprep.mubr.bf16.mxu0 %v2813_v0  ;;  %v1391_v6 = vadd.f32 1.0, %v2463_v46 }
 0x14b   :  { %v3091_v9 = vpop.eup %2464  ;;  %2474 = vtanh.f32 %v1142_v59  ;;  %v888_v10 = vmul.f32 0.044715, %v760_v60  ;;  %v762_v11 = vmul.f32 %v634_v63, %v3071_v50  ;;  %v1517_v12 = vmul.f32 0.5, %v1389_v40 }
 0x14c   :  { %v2467_v16 = vpop.eup %2466  ;;  %v1772_v4 = vpack.c.bf16 %v3085_v3, %v3074_v52  ;;  %v889_v2 = vmul.f32 0.044715, %v761_v61  ;;  %v763_v17 = vmul.f32 %v635_v5, %v3079_v58  ;;  %v341_v18 = vpop.f32.mrb[16].mxu0  ;;  %v1519_v19 = vmul.f32 0.5, %v1391_v6 }
 0x14d   :  { %v3097_v20 = vpop.eup %2468  ;;  %v1016_v0 = vadd.f32 %v888_v10, %v3060_v38  ;;  %v890_v22 = vmul.f32 0.044715, %v762_v11  ;;  %v3101_v23 = vadd.f32 %v341_v18, %v2956_v56  ;;  %v343_v24 = vpop.f32.mrb[17].mxu0  ;;  %v1645_v25 = vmul.f32 %v1517_v12, %v2965_v1 }
 0x14e   :  { %v2471_v28 = vpop.eup %2470  ;;  %v1017_v29 = vadd.f32 %v889_v2, %v3065_v44  ;;  %v891_v32 = vmul.f32 0.044715, %v763_v17  ;;  %v3106_v33 = vadd.f32 %v343_v24, %v2958_v57  ;;  %v345_v34 = vpop.f32.mrb[18].mxu0  ;;  %v1647_v35 = vmul.f32 %v1519_v19, %v2975_v7 }
 0x14f   :  { %v1144_v37 = vmul.f32 0.7978846, %v1016_v0  ;;  %v1018_v39 = vadd.f32 %v890_v22, %v3071_v50  ;;  %v636_v40 = vmul.f32 %v3101_v23, %v3101_v23  ;;  %v3113_v41 = vadd.f32 %v345_v34, %v2956_v56  ;;  %v347_v1 = vpop.f32.mrb[19].mxu0 }
 0x150   :  { %v1145_v42 = vmul.f32 0.7978846, %v1017_v29  ;;  %v1019_v45 = vadd.f32 %v891_v32, %v3079_v58  ;;  %v637_v46 = vmul.f32 %v3106_v33, %v3106_v33  ;;  %v3119_v47 = vadd.f32 %v347_v1, %v2958_v57 }
 0x151   :  { %2476 = vtanh.f32 %v1144_v37  ;;  %v1146_v7 = vmul.f32 0.7978846, %v1018_v39  ;;  %v764_v48 = vmul.f32 %v636_v40, %v3101_v23  ;;  %v638_v49 = vmul.f32 %v3113_v41, %v3113_v41  ;;  %610 = vmatmul.mubr.bf16.gmra.mrb[124].mxu0 %v158_v27 }
 0x152   :  { %2478 = vtanh.f32 %v1145_v42  ;;  %v1147_v51 = vmul.f32 0.7978846, %v1019_v45  ;;  %v765_v53 = vmul.f32 %v637_v46, %v3106_v33  ;;  %v639_v54 = vmul.f32 %v3119_v47, %v3119_v47 }
 0x153   :  { %v3130_v59 = vpop.eup %2472  ;;  %2480 = vtanh.f32 %v1146_v7  ;;  %v892_v60 = vmul.f32 0.044715, %v764_v48  ;;  %v766_v63 = vmul.f32 %v638_v49, %v3113_v41  ;;  %v1773_v61 = vpack.c.bf16 %v1647_v35, %v1645_v25 }
 0x154   :  { %2482 = vtanh.f32 %v1147_v51  ;;  %v893_v5 = vmul.f32 0.044715, %v765_v53  ;;  %v767_v6 = vmul.f32 %v639_v54, %v3119_v47  ;;  %v351_v14 = vpop.f32.mrb[20].mxu0  ;;  %v1393_v15 = vadd.f32 1.0, %v2467_v16 }
 0x155   :  { %v3134_v27 = vpop.eup %2474  ;;  %v1020_v10 = vadd.f32 %v892_v60, %v3101_v23  ;;  %v894_v11 = vmul.f32 0.044715, %v766_v63  ;;  %2003 = vmatprep.mubr.bf16.mxu0 %v1773_v61  ;;  %v3138_v12 = vadd.f32 %v351_v14, %v2956_v56  ;;  %v353_v2 = vpop.f32.mrb[21].mxu0  ;;  %v1395_v17 = vadd.f32 1.0, %v2471_v28 }
 0x156   :  { %v1021_v18 = vadd.f32 %v893_v5, %v3106_v33  ;;  %v895_v19 = vmul.f32 0.044715, %v767_v6  ;;  %v3142_v0 = vadd.f32 %v353_v2, %v2958_v57  ;;  %v355_v22 = vpop.f32.mrb[22].mxu0  ;;  %v1521_v24 = vmul.f32 0.5, %v1393_v15 }
 0x157   :  { %v1148_v16 = vmul.f32 0.7978846, %v1020_v10  ;;  %v1022_v25 = vadd.f32 %v894_v11, %v3113_v41  ;;  %v640_v29 = vmul.f32 %v3138_v12, %v3138_v12  ;;  %v3148_v32 = vadd.f32 %v355_v22, %v2956_v56  ;;  %v357_v34 = vpop.f32.mrb[23].mxu0 }
 0x158   :  { %v1149_v35 = vmul.f32 0.7978846, %v1021_v18  ;;  %v1023_v28 = vadd.f32 %v895_v19, %v3119_v47  ;;  %v641_v37 = vmul.f32 %v3142_v0, %v3142_v0  ;;  %v3154_v39 = vadd.f32 %v357_v34, %v2958_v57 }
 0x159   :  { %2484 = vtanh.f32 %v1148_v16  ;;  %v1150_v40 = vmul.f32 0.7978846, %v1022_v25  ;;  %v768_v1 = vmul.f32 %v640_v29, %v3138_v12  ;;  %v642_v42 = vmul.f32 %v3148_v32, %v3148_v32  ;;  %2004 = vmatmul.mubr.bf16.vlgmr.msra.gmra.mrb[128].mxu0 %v1772_v4 }
 0x15a   :  { %2486 = vtanh.f32 %v1149_v35  ;;  %v1151_v45 = vmul.f32 0.7978846, %v1023_v28  ;;  %v769_v46 = vmul.f32 %v641_v37, %v3142_v0  ;;  %v643_v7 = vmul.f32 %v3154_v39, %v3154_v39 }
 0x15b   :  { %v3165_v48 = vpop.eup %2476  ;;  %2488 = vtanh.f32 %v1150_v40  ;;  %v896_v49 = vmul.f32 0.044715, %v768_v1  ;;  %v770_v51 = vmul.f32 %v642_v42, %v3148_v32  ;;  %v1523_v53 = vmul.f32 0.5, %v1395_v17 }
 0x15c   :  { %v3168_v54 = vpop.eup %2478  ;;  %2490 = vtanh.f32 %v1151_v45  ;;  %v897_v60 = vmul.f32 0.044715, %v769_v46  ;;  %v771_v52 = vmul.f32 %v643_v7, %v3154_v39  ;;  %v1649_v3 = vmul.f32 %v1521_v24, %v2992_v26  ;;  %v361_v4 = vpop.f32.mrb[24].mxu0 }
 0x15d   :  { %v3172_v63 = vpop.eup %2480  ;;  %v1024_v61 = vadd.f32 %v896_v49, %v3138_v12  ;;  %v898_v5 = vmul.f32 0.044715, %v770_v51  ;;  %v1651_v6 = vmul.f32 %v1523_v53, %v3004_v36  ;;  %v3177_v14 = vadd.f32 %v361_v4, %v2956_v56  ;;  %v363_v15 = vpop.f32.mrb[25].mxu0 }
 0x15e   :  { %v3179_v10 = vpop.eup %2482  ;;  %v1025_v11 = vadd.f32 %v897_v60, %v3142_v0  ;;  %v899_v2 = vmul.f32 0.044715, %v771_v52  ;;  %v3183_v17 = vadd.f32 %v363_v15, %v2958_v57  ;;  %v365_v26 = vpop.f32.mrb[26].mxu0  ;;  %v1013_v18 = vadd.f32 %v3055_v30, %v3025_v62 }
 0x15f   :  { %v1152_v19 = vmul.f32 0.7978846, %v1024_v61  ;;  %v1026_v22 = vadd.f32 %v898_v5, %v3148_v32  ;;  %v1775_v36 = vpack.c.bf16 %v1651_v6, %v1649_v3  ;;  %v644_v24 = vmul.f32 %v3177_v14, %v3177_v14  ;;  %v367_v16 = vpop.f32.mrb[27].mxu0 }
 0x160   :  { %v1153_v25 = vmul.f32 0.7978846, %v1025_v11  ;;  %v1027_v29 = vadd.f32 %v899_v2, %v3154_v39  ;;  %v645_v34 = vmul.f32 %v3183_v17, %v3183_v17  ;;  %v3194_v35 = vadd.f32 %v365_v26, %v2956_v56 }
 0x161   :  { %2492 = vtanh.f32 %v1152_v19  ;;  %v1154_v28 = vmul.f32 0.7978846, %v1026_v22  ;;  %2011 = vmatprep.mubr.bf16.mxu0 %v1775_v36  ;;  %v772_v30 = vmul.f32 %v644_v24, %v3177_v14  ;;  %v3198_v37 = vadd.f32 %v367_v16, %v2958_v57 }
 0x162   :  { %2494 = vtanh.f32 %v1153_v25  ;;  %v1155_v40 = vmul.f32 0.7978846, %v1027_v29  ;;  %v773_v1 = vmul.f32 %v645_v34, %v3183_v17  ;;  %v646_v42 = vmul.f32 %v3194_v35, %v3194_v35 }
 0x163   :  { %v3203_v45 = vpop.eup %2484  ;;  %2496 = vtanh.f32 %v1154_v28  ;;  %v900_v46 = vmul.f32 0.044715, %v772_v30  ;;  %v647_v7 = vmul.f32 %v3198_v37, %v3198_v37  ;;  %v1015_v49 = vadd.f32 %v3062_v43, %v3039_v13 }
 0x164   :  { %v3209_v51 = vpop.eup %2486  ;;  %2498 = vtanh.f32 %v1155_v40  ;;  %v901_v53 = vmul.f32 0.044715, %v773_v1  ;;  %v774_v60 = vmul.f32 %v646_v42, %v3194_v35  ;;  %v1141_v52 = vmul.f32 0.7978846, %v1013_v18  ;;  %v371_v3 = vpop.f32.mrb[28].mxu0 }
 0x165   :  { %v3212_v4 = vpop.eup %2488  ;;  %v1028_v61 = vadd.f32 %v900_v46, %v3177_v14  ;;  %v775_v5 = vmul.f32 %v647_v7, %v3198_v37  ;;  %v1143_v6 = vmul.f32 0.7978846, %v1015_v49  ;;  %v1396_v15 = vadd.f32 1.0, %v3130_v59  ;;  %v373_v11 = vpop.f32.mrb[29].mxu0 }
 0x166   :  { %v3217_v2 = vpop.eup %2490  ;;  %v1029_v43 = vadd.f32 %v901_v53, %v3183_v17  ;;  %v902_v26 = vmul.f32 0.044715, %v774_v60  ;;  %2500 = vtanh.f32 %v1141_v52  ;;  %v1398_v19 = vadd.f32 1.0, %v3134_v27  ;;  %v375_v18 = vpop.f32.mrb[30].mxu0 }
 0x167   :  { %v1156_v22 = vmul.f32 0.7978846, %v1028_v61  ;;  %v903_v36 = vmul.f32 0.044715, %v775_v5  ;;  %2502 = vtanh.f32 %v1143_v6  ;;  %v1524_v24 = vmul.f32 0.5, %v1396_v15  ;;  %v377_v16 = vpop.f32.mrb[31].mxu0 }
 0x168   :  { %v1157_v25 = vmul.f32 0.7978846, %v1029_v43  ;;  %v1030_v29 = vadd.f32 %v902_v26, %v3194_v35  ;;  %v1526_v34 = vmul.f32 0.5, %v1398_v19  ;;  %v1392_v59 = vadd.f32 1.0, %v3091_v9 }
 0x169   :  { %2504 = vtanh.f32 %v1156_v22  ;;  %v1031_v28 = vadd.f32 %v903_v36, %v3198_v37  ;;  %v3225_v30 = vmul.f32 %v1524_v24, %v3021_v55  ;;  %v1394_v27 = vadd.f32 1.0, %v3097_v20 }
 0x16a   :  { %2506 = vtanh.f32 %v1157_v25  ;;  %v1158_v40 = vmul.f32 0.7978846, %v1030_v29  ;;  %v3229_v1 = vmul.f32 %v1526_v34, %v3033_v8  ;;  %v1520_v42 = vmul.f32 0.5, %v1392_v59 }
 0x16b   :  { %v3231_v46 = vpop.eup %2492  ;;  %v1159_v7 = vmul.f32 0.7978846, %v1031_v28  ;;  %v1522_v49 = vmul.f32 0.5, %v1394_v27  ;;  %v3234_v9 = vadd.f32 %v371_v3, %v2956_v56  ;;  %v3237_v53 = vadd.f32 %v373_v11, %v2958_v57 }
 0x16c   :  { %v3239_v55 = vpop.eup %2494  ;;  %2508 = vtanh.f32 %v1158_v40  ;;  %v1776_v20 = vpack.c.bf16 %v3229_v1, %v3225_v30  ;;  %v1648_v8 = vmul.f32 %v1520_v42, %v2988_v21  ;;  %v3245_v60 = vadd.f32 %v375_v18, %v2956_v56  ;;  %v381_v52 = vpop.f32.mrb[32].mxu0 }
 0x16d   :  { %v3247_v61 = vpop.eup %2496  ;;  %2510 = vtanh.f32 %v1159_v7  ;;  %v1650_v3 = vmul.f32 %v1522_v49, %v2998_v31  ;;  %v648_v5 = vmul.f32 %v3234_v9, %v3234_v9  ;;  %v649_v6 = vmul.f32 %v3237_v53, %v3237_v53  ;;  %v383_v15 = vpop.f32.mrb[33].mxu0 }
 0x16e   :  { %v3254_v11 = vpop.eup %2498  ;;  %v650_v21 = vmul.f32 %v3245_v60, %v3245_v60  ;;  %v3259_v43 = vadd.f32 %v377_v16, %v2958_v57  ;;  %v1401_v26 = vadd.f32 1.0, %v3168_v54  ;;  %v1403_v19 = vadd.f32 1.0, %v3179_v10  ;;  %v385_v31 = vpop.f32.mrb[34].mxu0 }
 0x16f   :  { %v1774_v18 = vpack.c.bf16 %v1650_v3, %v1648_v8  ;;  %v776_v22 = vmul.f32 %v648_v5, %v3234_v9  ;;  %v777_v36 = vmul.f32 %v649_v6, %v3237_v53  ;;  %v1400_v24 = vadd.f32 1.0, %v3165_v48  ;;  %v387_v25 = vpop.f32.mrb[35].mxu0 }
 0x170   :  { %v2501_v29 = vpop.eup %2500  ;;  %v778_v34 = vmul.f32 %v650_v21, %v3245_v60  ;;  %v651_v16 = vmul.f32 %v3259_v43, %v3259_v43  ;;  %v1529_v59 = vmul.f32 0.5, %v1401_v26  ;;  %v1531_v28 = vmul.f32 0.5, %v1403_v19 }
 0x171   :  { %v2503_v54 = vpop.eup %2502  ;;  %v1397_v27 = vadd.f32 1.0, %v2501_v29  ;;  %2012 = vmatmul.mubr.bf16.gmra.mrb[132].mxu0 %v1774_v18  ;;  %v904_v10 = vmul.f32 0.044715, %v776_v22  ;;  %v905_v40 = vmul.f32 0.044715, %v777_v36  ;;  %v1402_v42 = vadd.f32 1.0, %v3172_v63 }
 0x172   :  { %v1399_v7 = vadd.f32 1.0, %v2503_v54  ;;  %v906_v49 = vmul.f32 0.044715, %v778_v34  ;;  %v779_v48 = vmul.f32 %v651_v16, %v3259_v43  ;;  %v1657_v8 = vmul.f32 %v1529_v59, %v3065_v44 }
 0x173   :  { %v3272_v3 = vpop.eup %2504  ;;  %v1525_v5 = vmul.f32 0.5, %v1397_v27  ;;  %v1032_v6 = vadd.f32 %v904_v10, %v3234_v9  ;;  %v1033_v21 = vadd.f32 %v905_v40, %v3237_v53  ;;  %v1659_v26 = vmul.f32 %v1531_v28, %v3079_v58 }
 0x174   :  { %v3277_v19 = vpop.eup %2506  ;;  %v1527_v18 = vmul.f32 0.5, %v1399_v7  ;;  %v1034_v63 = vadd.f32 %v906_v49, %v3245_v60  ;;  %v907_v22 = vmul.f32 0.044715, %v779_v48  ;;  %v1528_v36 = vmul.f32 0.5, %v1400_v24  ;;  %v391_v29 = vpop.f32.mrb[36].mxu0 }
 0x175   :  { %v1653_v34 = vmul.f32 %v1525_v5, %v3025_v62  ;;  %v1160_v44 = vmul.f32 0.7978846, %v1032_v6  ;;  %v1161_v16 = vmul.f32 0.7978846, %v1033_v21  ;;  %v1779_v59 = vpack.c.bf16 %v1659_v26, %v1657_v8  ;;  %v3281_v54 = vpop.f32.mrb[37].mxu0 }
 0x176   :  { %v3283_v27 = vpop.eup %2508  ;;  %v1655_v10 = vmul.f32 %v1527_v18, %v3039_v13  ;;  %v1162_v58 = vmul.f32 0.7978846, %v1034_v63  ;;  %v1035_v28 = vadd.f32 %v907_v22, %v3259_v43  ;;  %v1530_v40 = vmul.f32 0.5, %v1402_v42  ;;  %v3287_v7 = vpop.f32.mrb[38].mxu0 }
 0x177   :  { %v3289_v49 = vpop.eup %2510  ;;  %2512 = vtanh.f32 %v1160_v44  ;;  %v1656_v62 = vmul.f32 %v1528_v36, %v3060_v38  ;;  %v3293_v24 = vadd.f32 %v381_v52, %v2956_v56  ;;  %v3296_v48 = vadd.f32 %v383_v15, %v2958_v57  ;;  %v397_v8 = vpop.f32.mrb[39].mxu0 }
 0x178   :  { %v1777_v5 = vpack.c.bf16 %v1655_v10, %v1653_v34  ;;  %2514 = vtanh.f32 %v1161_v16  ;;  %v1163_v13 = vmul.f32 0.7978846, %v1035_v28  ;;  %v1658_v6 = vmul.f32 %v1530_v40, %v3071_v50 }
 0x179   :  { %2516 = vtanh.f32 %v1162_v58  ;;  %v652_v42 = vmul.f32 %v3293_v24, %v3293_v24  ;;  %v653_v21 = vmul.f32 %v3296_v48, %v3296_v48  ;;  %v3304_v38 = vadd.f32 %v385_v31, %v2956_v56 }
 0x17a   :  { %2019 = vmatprep.mubr.bf16.mxu1 %v1777_v5  ;;  %2518 = vtanh.f32 %v1163_v13  ;;  %v1778_v52 = vpack.c.bf16 %v1658_v6, %v1656_v62  ;;  %v3307_v15 = vadd.f32 %v387_v25, %v2958_v57  ;;  %v1405_v26 = vadd.f32 1.0, %v3209_v51 }
 0x17b   :  { %2020 = vmatmul.mubr.bf16.vlgmr.msra.gmra.mrb[0].mxu1 %v1776_v20  ;;  %v780_v50 = vmul.f32 %v652_v42, %v3293_v24  ;;  %v781_v18 = vmul.f32 %v653_v21, %v3296_v48  ;;  %v654_v31 = vmul.f32 %v3304_v38, %v3304_v38  ;;  %v1407_v63 = vadd.f32 1.0, %v3217_v2 }
 0x17c   :  { %2027 = vmatprep.mubr.bf16.mxu1 %v1779_v59  ;;  %v655_v25 = vmul.f32 %v3307_v15, %v3307_v15  ;;  %v1533_v22 = vmul.f32 0.5, %v1405_v26  ;;  %v1404_v51 = vadd.f32 1.0, %v3203_v45  ;;  %v1406_v36 = vadd.f32 1.0, %v3212_v4  ;;  %v3322_v30 = vpop.f32.mrb[40].mxu0 }
 0x17d   :  { %v908_v1 = vmul.f32 0.044715, %v780_v50  ;;  %v909_v20 = vmul.f32 0.044715, %v781_v18  ;;  %v782_v34 = vmul.f32 %v654_v31, %v3304_v38  ;;  %v1535_v44 = vmul.f32 0.5, %v1407_v63  ;;  %v3325_v16 = vpop.f32.mrb[41].mxu0 }
 0x17e   :  { %v783_v2 = vmul.f32 %v655_v25, %v3307_v15  ;;  %v1661_v59 = vmul.f32 %v1533_v22, %v3106_v33  ;;  %v1532_v10 = vmul.f32 0.5, %v1404_v51  ;;  %v1534_v58 = vmul.f32 0.5, %v1406_v36  ;;  %v3329_v28 = vpop.f32.mrb[42].mxu0 }
 0x17f   :  { %v1036_v45 = vadd.f32 %v908_v1, %v3293_v24  ;;  %v1037_v4 = vadd.f32 %v909_v20, %v3296_v48  ;;  %v910_v40 = vmul.f32 0.044715, %v782_v34  ;;  %v1663_v62 = vmul.f32 %v1535_v44, %v3119_v47  ;;  %v3334_v5 = vpop.f32.mrb[43].mxu0 }
 0x180   :  { %v911_v13 = vmul.f32 0.044715, %v783_v2  ;;  %v1660_v6 = vmul.f32 %v1532_v10, %v3101_v23  ;;  %v1662_v42 = vmul.f32 %v1534_v58, %v3113_v41  ;;  %v3339_v33 = vadd.f32 %v391_v29, %v2956_v56 }
 0x181   :  { %v3341_v21 = vpop.eup %2512  ;;  %v1164_v26 = vmul.f32 0.7978846, %v1036_v45  ;;  %v1165_v50 = vmul.f32 0.7978846, %v1037_v4  ;;  %v1038_v18 = vadd.f32 %v910_v40, %v3304_v38  ;;  %v1781_v31 = vpack.c.bf16 %v1663_v62, %v1661_v59 }
 0x182   :  { %v3344_v63 = vpop.eup %2514  ;;  %v1039_v47 = vadd.f32 %v911_v13, %v3307_v15  ;;  %v1780_v25 = vpack.c.bf16 %v1662_v42, %v1660_v6  ;;  %v656_v23 = vmul.f32 %v3339_v33, %v3339_v33  ;;  %v3351_v41 = vadd.f32 %v3281_v54, %v2958_v57 }
 0x183   :  { %v3353_v29 = vpop.eup %2516  ;;  %2028 = vmatmul.mubr.bf16.gmra.mrb[4].mxu1 %v1778_v52  ;;  %2520 = vtanh.f32 %v1164_v26  ;;  %v1166_v22 = vmul.f32 0.7978846, %v1038_v18  ;;  %v3357_v51 = vadd.f32 %v3287_v7, %v2956_v56  ;;  %v3360_v36 = vadd.f32 %v397_v8, %v2958_v57 }
 0x184   :  { %v3362_v1 = vpop.eup %2518  ;;  %2522 = vtanh.f32 %v1165_v50  ;;  %v1167_v20 = vmul.f32 0.7978846, %v1039_v47  ;;  %2035 = vmatprep.mubr.bf16.mxu1 %v1781_v31  ;;  %v784_v54 = vmul.f32 %v656_v23, %v3339_v33  ;;  %v657_v34 = vmul.f32 %v3351_v41, %v3351_v41  ;;  %v3367_v52 = vpop.f32.mrb[44].mxu0 }
 0x185   :  { %2524 = vtanh.f32 %v1166_v22  ;;  %v658_v7 = vmul.f32 %v3357_v51, %v3357_v51  ;;  %v659_v8 = vmul.f32 %v3360_v36, %v3360_v36  ;;  %v1409_v44 = vadd.f32 1.0, %v3239_v55  ;;  %v3374_v2 = vpop.f32.mrb[45].mxu0 }
 0x186   :  { %2526 = vtanh.f32 %v1167_v20  ;;  %v912_v59 = vmul.f32 0.044715, %v784_v54  ;;  %v785_v10 = vmul.f32 %v657_v34, %v3351_v41  ;;  %v1411_v58 = vadd.f32 1.0, %v3254_v11  ;;  %v3378_v45 = vpop.f32.mrb[46].mxu0 }
 0x187   :  { %v786_v4 = vmul.f32 %v658_v7, %v3357_v51  ;;  %v787_v40 = vmul.f32 %v659_v8, %v3360_v36  ;;  %v1537_v62 = vmul.f32 0.5, %v1409_v44  ;;  %v1408_v13 = vadd.f32 1.0, %v3231_v46  ;;  %v3383_v6 = vpop.f32.mrb[47].mxu0 }
 0x188   :  { %v1040_v55 = vadd.f32 %v912_v59, %v3339_v33  ;;  %v913_v42 = vmul.f32 0.044715, %v785_v10  ;;  %v1539_v26 = vmul.f32 0.5, %v1411_v58  ;;  %v1410_v50 = vadd.f32 1.0, %v3247_v61 }
 0x189   :  { %v914_v18 = vmul.f32 0.044715, %v786_v4  ;;  %v915_v31 = vmul.f32 0.044715, %v787_v40  ;;  %v1665_v11 = vmul.f32 %v1537_v62, %v3142_v0  ;;  %v1536_v47 = vmul.f32 0.5, %v1408_v13 }
 0x18a   :  { %v1168_v23 = vmul.f32 0.7978846, %v1040_v55  ;;  %v1041_v22 = vadd.f32 %v913_v42, %v3351_v41  ;;  %v1667_v20 = vmul.f32 %v1539_v26, %v3154_v39  ;;  %v1538_v54 = vmul.f32 0.5, %v1410_v50 }
 0x18b   :  { %2036 = vmatmul.mubr.bf16.gmra.mrb[8].mxu1 %v1780_v25  ;;  %v1042_v46 = vadd.f32 %v914_v18, %v3357_v51  ;;  %v1043_v34 = vadd.f32 %v915_v31, %v3360_v36  ;;  %v1664_v7 = vmul.f32 %v1536_v47, %v3138_v12  ;;  %v3395_v61 = vadd.f32 %v3322_v30, %v2956_v56 }
 0x18c   :  { %2528 = vtanh.f32 %v1168_v23  ;;  %v1169_v0 = vmul.f32 0.7978846, %v1041_v22  ;;  %v1783_v8 = vpack.c.bf16 %v1667_v20, %v1665_v11  ;;  %v1666_v44 = vmul.f32 %v1538_v54, %v3148_v32  ;;  %v3398_v59 = vpop.f32.mrb[48].mxu0 }
 0x18d   :  { %v3400_v39 = vpop.eup %2520  ;;  %v1170_v25 = vmul.f32 0.7978846, %v1042_v46  ;;  %v1171_v10 = vmul.f32 0.7978846, %v1043_v34  ;;  %v660_v58 = vmul.f32 %v3395_v61, %v3395_v61  ;;  %v3406_v12 = vadd.f32 %v3325_v16, %v2958_v57  ;;  %v3408_v30 = vpop.f32.mrb[49].mxu0 }
 0x18e   :  { %v3410_v4 = vpop.eup %2522  ;;  %2530 = vtanh.f32 %v1169_v0  ;;  %2043 = vmatprep.mubr.bf16.mxu1 %v1783_v8  ;;  %v1782_v32 = vpack.c.bf16 %v1666_v44, %v1664_v7  ;;  %v3414_v40 = vadd.f32 %v3329_v28, %v2956_v56  ;;  %v3418_v62 = vadd.f32 %v3334_v5, %v2958_v57  ;;  %v3420_v13 = vpop.f32.mrb[50].mxu0 }
 0x18f   :  { %v3422_v55 = vpop.eup %2524  ;;  %2532 = vtanh.f32 %v1170_v25  ;;  %v788_v16 = vmul.f32 %v660_v58, %v3395_v61  ;;  %v661_v42 = vmul.f32 %v3406_v12, %v3406_v12  ;;  %v1413_v26 = vadd.f32 1.0, %v3277_v19  ;;  %v3428_v50 = vpop.f32.mrb[51].mxu0 }
 0x190   :  { %v3430_v28 = vpop.eup %2526  ;;  %2534 = vtanh.f32 %v1171_v10  ;;  %v662_v5 = vmul.f32 %v3414_v40, %v3414_v40  ;;  %v663_v18 = vmul.f32 %v3418_v62, %v3418_v62  ;;  %v1415_v31 = vadd.f32 1.0, %v3289_v49 }
 0x191   :  { %v916_v11 = vmul.f32 0.044715, %v788_v16  ;;  %v789_v47 = vmul.f32 %v661_v42, %v3406_v12  ;;  %v1541_v23 = vmul.f32 0.5, %v1413_v26  ;;  %v1412_v22 = vadd.f32 1.0, %v3272_v3 }
 0x192   :  { %v790_v19 = vmul.f32 %v662_v5, %v3414_v40  ;;  %v791_v20 = vmul.f32 %v663_v18, %v3418_v62  ;;  %v1543_v54 = vmul.f32 0.5, %v1415_v31  ;;  %v1414_v46 = vadd.f32 1.0, %v3283_v27 }
 0x193   :  { %2044 = vmatmul.mubr.bf16.gmra.mrb[12].mxu1 %v1782_v32  ;;  %v1044_v34 = vadd.f32 %v916_v11, %v3395_v61  ;;  %v917_v7 = vmul.f32 0.044715, %v789_v47  ;;  %v1669_v0 = vmul.f32 %v1541_v23, %v3183_v17  ;;  %v1540_v49 = vmul.f32 0.5, %v1412_v22 }
 0x194   :  { %v918_v8 = vmul.f32 0.044715, %v790_v19  ;;  %v919_v44 = vmul.f32 0.044715, %v791_v20  ;;  %v1671_v25 = vmul.f32 %v1543_v54, %v3198_v37  ;;  %v1542_v10 = vmul.f32 0.5, %v1414_v46  ;;  %v3445_v3 = vpop.f32.mrb[52].mxu0 }
 0x195   :  { %v1172_v58 = vmul.f32 0.7978846, %v1044_v34  ;;  %v1045_v16 = vadd.f32 %v917_v7, %v3406_v12  ;;  %v1668_v42 = vmul.f32 %v1540_v49, %v3177_v14  ;;  %v3451_v27 = vadd.f32 %v3367_v52, %v2956_v56  ;;  %v3453_v32 = vpop.f32.mrb[53].mxu0 }
 0x196   :  { %v3455_v17 = vpop.eup %2528  ;;  %v1046_v26 = vadd.f32 %v918_v8, %v3414_v40  ;;  %v1047_v37 = vadd.f32 %v919_v44, %v3418_v62  ;;  %v1785_v5 = vpack.c.bf16 %v1671_v25, %v1669_v0  ;;  %v1670_v18 = vmul.f32 %v1542_v10, %v3194_v35  ;;  %v3460_v31 = vpop.f32.mrb[54].mxu0 }
 0x197   :  { %2536 = vtanh.f32 %v1172_v58  ;;  %v1173_v11 = vmul.f32 0.7978846, %v1045_v16  ;;  %v664_v14 = vmul.f32 %v3451_v27, %v3451_v27  ;;  %v3466_v52 = vadd.f32 %v3374_v2, %v2958_v57  ;;  %v3468_v47 = vpop.f32.mrb[55].mxu0 }
 0x198   :  { %v3470_v23 = vpop.eup %2530  ;;  %v1174_v22 = vmul.f32 0.7978846, %v1046_v26  ;;  %v1175_v19 = vmul.f32 0.7978846, %v1047_v37  ;;  %2051 = vmatprep.mubr.bf16.mxu1 %v1785_v5  ;;  %v1784_v20 = vpack.c.bf16 %v1670_v18, %v1668_v42  ;;  %v3474_v35 = vadd.f32 %v3378_v45, %v2956_v56 }
 0x199   :  { %v3476_v54 = vpop.eup %2532  ;;  %2538 = vtanh.f32 %v1173_v11  ;;  %v792_v46 = vmul.f32 %v664_v14, %v3451_v27  ;;  %v665_v2 = vmul.f32 %v3466_v52, %v3466_v52  ;;  %v3483_v34 = vadd.f32 %v3383_v6, %v2958_v57 }
 0x19a   :  { %v3485_v7 = vpop.eup %2534  ;;  %2540 = vtanh.f32 %v1174_v22  ;;  %v666_v0 = vmul.f32 %v3474_v35, %v3474_v35  ;;  %v1417_v45 = vadd.f32 1.0, %v3344_v63  ;;  %v1419_v49 = vadd.f32 1.0, %v3362_v1 }
 0x19b   :  { %2542 = vtanh.f32 %v1175_v19  ;;  %2052 = vmatmul.mubr.bf16.gmra.mrb[16].mxu1 %v1784_v20  ;;  %v920_v8 = vmul.f32 0.044715, %v792_v46  ;;  %v793_v44 = vmul.f32 %v665_v2, %v3466_v52  ;;  %v667_v25 = vmul.f32 %v3483_v34, %v3483_v34 }
 0x19c   :  { %v794_v6 = vmul.f32 %v666_v0, %v3474_v35  ;;  %v1545_v10 = vmul.f32 0.5, %v1417_v45  ;;  %v1547_v58 = vmul.f32 0.5, %v1419_v49  ;;  %v1416_v16 = vadd.f32 1.0, %v3341_v21  ;;  %v3496_v42 = vpop.f32.mrb[56].mxu0 }
 0x19d   :  { %v1048_v63 = vadd.f32 %v920_v8, %v3451_v27  ;;  %v921_v26 = vmul.f32 0.044715, %v793_v44  ;;  %v795_v1 = vmul.f32 %v667_v25, %v3483_v34  ;;  %v1418_v37 = vadd.f32 1.0, %v3353_v29  ;;  %v3501_v5 = vpop.f32.mrb[57].mxu0 }
 0x19e   :  { %v922_v18 = vmul.f32 0.044715, %v794_v6  ;;  %v1673_v11 = vmul.f32 %v1545_v10, %v3237_v53  ;;  %v1675_v14 = vmul.f32 %v1547_v58, %v3259_v43  ;;  %v1544_v22 = vmul.f32 0.5, %v1416_v16  ;;  %v3505_v19 = vpop.f32.mrb[58].mxu0 }
 0x19f   :  { %v1176_v21 = vmul.f32 0.7978846, %v1048_v63  ;;  %v1049_v20 = vadd.f32 %v921_v26, %v3466_v52  ;;  %v923_v46 = vmul.f32 0.044715, %v795_v1  ;;  %v1546_v2 = vmul.f32 0.5, %v1418_v37  ;;  %v3508_v0 = vpop.f32.mrb[59].mxu0 }
 0x1a0   :  { %v1050_v45 = vadd.f32 %v922_v18, %v3474_v35  ;;  %v1787_v29 = vpack.c.bf16 %v1675_v14, %v1673_v11  ;;  %v1672_v49 = vmul.f32 %v1544_v22, %v3234_v9  ;;  %v3514_v53 = vadd.f32 %v3398_v59, %v2956_v56 }
 0x1a1   :  { %v3516_v43 = vpop.eup %2536  ;;  %2544 = vtanh.f32 %v1176_v21  ;;  %v1177_v8 = vmul.f32 0.7978846, %v1049_v20  ;;  %v1051_v44 = vadd.f32 %v923_v46, %v3483_v34  ;;  %v1674_v25 = vmul.f32 %v1546_v2, %v3245_v60 }
 0x1a2   :  { %v1178_v6 = vmul.f32 0.7978846, %v1050_v45  ;;  %2059 = vmatprep.mubr.bf16.mxu1 %v1787_v29  ;;  %v668_v10 = vmul.f32 %v3514_v53, %v3514_v53  ;;  %v3524_v9 = vadd.f32 %v3408_v30, %v2958_v57  ;;  %v3528_v59 = vadd.f32 %v3420_v13, %v2956_v56 }
 0x1a3   :  { %v3530_v58 = vpop.eup %2538  ;;  %2546 = vtanh.f32 %v1177_v8  ;;  %v1179_v16 = vmul.f32 0.7978846, %v1051_v44  ;;  %v1786_v63 = vpack.c.bf16 %v1674_v25, %v1672_v49  ;;  %v3534_v60 = vadd.f32 %v3428_v50, %v2958_v57 }
 0x1a4   :  { %v3536_v26 = vpop.eup %2540  ;;  %2548 = vtanh.f32 %v1178_v6  ;;  %v796_v1 = vmul.f32 %v668_v10, %v3514_v53  ;;  %v669_v30 = vmul.f32 %v3524_v9, %v3524_v9  ;;  %v670_v13 = vmul.f32 %v3528_v59, %v3528_v59  ;;  %v3543_v37 = vpop.f32.mrb[60].mxu0 }
 0x1a5   :  { %v3545_v18 = vpop.eup %2542  ;;  %2550 = vtanh.f32 %v1179_v16  ;;  %2060 = vmatmul.mubr.bf16.gmra.mrb[20].mxu1 %v1786_v63  ;;  %v671_v50 = vmul.f32 %v3534_v60, %v3534_v60  ;;  %v1421_v11 = vadd.f32 1.0, %v3410_v4  ;;  %v1423_v14 = vadd.f32 1.0, %v3430_v28  ;;  %v3551_v22 = vpop.f32.mrb[61].mxu0 }
 0x1a6   :  { %v924_v21 = vmul.f32 0.044715, %v796_v1  ;;  %v797_v20 = vmul.f32 %v669_v30, %v3524_v9  ;;  %v798_v46 = vmul.f32 %v670_v13, %v3528_v59  ;;  %v1420_v2 = vadd.f32 1.0, %v3400_v39  ;;  %v3556_v45 = vpop.f32.mrb[62].mxu0 }
 0x1a7   :  { %v799_v29 = vmul.f32 %v671_v50, %v3534_v60  ;;  %v1549_v49 = vmul.f32 0.5, %v1421_v11  ;;  %v1551_v8 = vmul.f32 0.5, %v1423_v14  ;;  %v1422_v44 = vadd.f32 1.0, %v3422_v55  ;;  %v3560_v4 = vpop.f32.mrb[63].mxu0 }
 0x1a8   :  { %v1052_v28 = vadd.f32 %v924_v21, %v3514_v53  ;;  %v925_v25 = vmul.f32 0.044715, %v797_v20  ;;  %v926_v6 = vmul.f32 0.044715, %v798_v46  ;;  %v1548_v10 = vmul.f32 0.5, %v1420_v2 }
 0x1a9   :  { %v927_v16 = vmul.f32 0.044715, %v799_v29  ;;  %v1677_v63 = vmul.f32 %v1549_v49, %v3296_v48  ;;  %v1679_v39 = vmul.f32 %v1551_v8, %v3307_v15  ;;  %v1550_v1 = vmul.f32 0.5, %v1422_v44 }
 0x1aa   :  { %v1180_v30 = vmul.f32 0.7978846, %v1052_v28  ;;  %v1053_v13 = vadd.f32 %v925_v25, %v3524_v9  ;;  %v1054_v50 = vadd.f32 %v926_v6, %v3528_v59  ;;  %v1676_v55 = vmul.f32 %v1548_v10, %v3293_v24 }
 0x1ab   :  { %v3568_v11 = vpop.eup %2544  ;;  %v1055_v14 = vadd.f32 %v927_v16, %v3534_v60  ;;  %v1789_v21 = vpack.c.bf16 %v1679_v39, %v1677_v63  ;;  %v1678_v20 = vmul.f32 %v1550_v1, %v3304_v38  ;;  %v3574_v48 = vadd.f32 %v3445_v3, %v2956_v56 }
 0x1ac   :  { %2552 = vtanh.f32 %v1180_v30  ;;  %v1181_v15 = vmul.f32 0.7978846, %v1053_v13  ;;  %v1182_v46 = vmul.f32 0.7978846, %v1054_v50  ;;  %v3578_v2 = vadd.f32 %v3453_v32, %v2958_v57  ;;  %v3580_v29 = vpop.f32.mrb[64].mxu0 }
 0x1ad   :  { %v3582_v24 = vpop.eup %2546  ;;  %v1183_v49 = vmul.f32 0.7978846, %v1055_v14  ;;  %2067 = vmatprep.mubr.bf16.mxu1 %v1789_v21  ;;  %v1788_v8 = vpack.c.bf16 %v1678_v20, %v1676_v55  ;;  %v672_v38 = vmul.f32 %v3574_v48, %v3574_v48  ;;  %v3588_v3 = vadd.f32 %v3460_v31, %v2956_v56  ;;  %v3590_v44 = vpop.f32.mrb[65].mxu0 }
 0x1ae   :  { %v3592_v28 = vpop.eup %2548  ;;  %2554 = vtanh.f32 %v1181_v15  ;;  %v673_v32 = vmul.f32 %v3578_v2, %v3578_v2  ;;  %v3598_v25 = vadd.f32 %v3468_v47, %v2958_v57  ;;  %v1425_v6 = vadd.f32 1.0, %v3470_v23  ;;  %v3601_v10 = vpop.f32.mrb[66].mxu0 }
 0x1af   :  { %v3603_v16 = vpop.eup %2550  ;;  %2556 = vtanh.f32 %v1182_v46  ;;  %2068 = vmatmul.mubr.bf16.gmra.mrb[24].mxu1 %v1788_v8  ;;  %v800_v31 = vmul.f32 %v672_v38, %v3574_v48  ;;  %v674_v63 = vmul.f32 %v3588_v3, %v3588_v3  ;;  %v1427_v39 = vadd.f32 1.0, %v3485_v7  ;;  %v3609_v1 = vpop.f32.mrb[67].mxu0 }
 0x1b0   :  { %2558 = vtanh.f32 %v1183_v49  ;;  %v801_v47 = vmul.f32 %v673_v32, %v3578_v2  ;;  %v675_v23 = vmul.f32 %v3598_v25, %v3598_v25  ;;  %v1553_v30 = vmul.f32 0.5, %v1425_v6 }
 0x1b1   :  { %v928_v13 = vmul.f32 0.044715, %v800_v31  ;;  %v802_v50 = vmul.f32 %v674_v63, %v3588_v3  ;;  %v1555_v55 = vmul.f32 0.5, %v1427_v39  ;;  %v1424_v14 = vadd.f32 1.0, %v3455_v17 }
 0x1b2   :  { %v929_v21 = vmul.f32 0.044715, %v801_v47  ;;  %v803_v20 = vmul.f32 %v675_v23, %v3598_v25  ;;  %v1681_v7 = vmul.f32 %v1553_v30, %v3351_v41  ;;  %v1426_v15 = vadd.f32 1.0, %v3476_v54 }
 0x1b3   :  { %v1056_v46 = vadd.f32 %v928_v13, %v3574_v48  ;;  %v930_v49 = vmul.f32 0.044715, %v802_v50  ;;  %v1683_v8 = vmul.f32 %v1555_v55, %v3360_v36  ;;  %v1552_v38 = vmul.f32 0.5, %v1424_v14 }
 0x1b4   :  { %v1057_v32 = vadd.f32 %v929_v21, %v3578_v2  ;;  %v931_v6 = vmul.f32 0.044715, %v803_v20  ;;  %v1554_v31 = vmul.f32 0.5, %v1426_v15  ;;  %v3624_v17 = vadd.f32 %v3496_v42, %v2956_v56  ;;  %v3626_v63 = vpop.f32.mrb[68].mxu0 }
 0x1b5   :  { %v1184_v39 = vmul.f32 0.7978846, %v1056_v46  ;;  %v1058_v41 = vadd.f32 %v930_v49, %v3588_v3  ;;  %v1791_v54 = vpack.c.bf16 %v1683_v8, %v1681_v7  ;;  %v1680_v47 = vmul.f32 %v1552_v38, %v3339_v33  ;;  %v3630_v23 = vpop.f32.mrb[69].mxu0 }
 0x1b6   :  { %v3632_v36 = vpop.eup %2552  ;;  %v1185_v30 = vmul.f32 0.7978846, %v1057_v32  ;;  %v1059_v13 = vadd.f32 %v931_v6, %v3598_v25  ;;  %v1682_v50 = vmul.f32 %v1554_v31, %v3357_v51  ;;  %v676_v42 = vmul.f32 %v3624_v17, %v3624_v17  ;;  %v3638_v55 = vpop.f32.mrb[70].mxu0 }
 0x1b7   :  { %2560 = vtanh.f32 %v1184_v39  ;;  %v1186_v14 = vmul.f32 0.7978846, %v1058_v41  ;;  %2075 = vmatprep.mubr.bf16.mxu1 %v1791_v54  ;;  %v3642_v33 = vadd.f32 %v3501_v5, %v2958_v57  ;;  %v3646_v21 = vadd.f32 %v3505_v19, %v2956_v56  ;;  %v3648_v20 = vpop.f32.mrb[71].mxu0 }
 0x1b8   :  { %v3650_v7 = vpop.eup %2554  ;;  %2562 = vtanh.f32 %v1185_v30  ;;  %v1187_v51 = vmul.f32 0.7978846, %v1059_v13  ;;  %v1790_v15 = vpack.c.bf16 %v1682_v50, %v1680_v47  ;;  %v804_v46 = vmul.f32 %v676_v42, %v3624_v17 }
 0x1b9   :  { %v3653_v49 = vpop.eup %2556  ;;  %2564 = vtanh.f32 %v1186_v14  ;;  %v677_v5 = vmul.f32 %v3642_v33, %v3642_v33  ;;  %v678_v8 = vmul.f32 %v3646_v21, %v3646_v21  ;;  %v3661_v19 = vadd.f32 %v3508_v0, %v2958_v57 }
 0x1ba   :  { %v3663_v38 = vpop.eup %2558  ;;  %2566 = vtanh.f32 %v1187_v51  ;;  %2076 = vmatmul.mubr.bf16.gmra.mrb[28].mxu1 %v1790_v15  ;;  %v932_v32 = vmul.f32 0.044715, %v804_v46  ;;  %v1429_v6 = vadd.f32 1.0, %v3530_v58  ;;  %v1431_v31 = vadd.f32 1.0, %v3545_v18 }
 0x1bb   :  { %v805_v39 = vmul.f32 %v677_v5, %v3642_v33  ;;  %v806_v41 = vmul.f32 %v678_v8, %v3646_v21  ;;  %v679_v54 = vmul.f32 %v3661_v19, %v3661_v19  ;;  %v1428_v47 = vadd.f32 1.0, %v3516_v43 }
 0x1bc   :  { %v1060_v0 = vadd.f32 %v932_v32, %v3624_v17  ;;  %v1557_v30 = vmul.f32 0.5, %v1429_v6  ;;  %v1559_v13 = vmul.f32 0.5, %v1431_v31  ;;  %v1430_v50 = vadd.f32 1.0, %v3536_v26  ;;  %v3674_v42 = vpop.f32.mrb[72].mxu0 }
 0x1bd   :  { %v933_v58 = vmul.f32 0.044715, %v805_v39  ;;  %v934_v14 = vmul.f32 0.044715, %v806_v41  ;;  %v807_v18 = vmul.f32 %v679_v54, %v3661_v19  ;;  %v1556_v51 = vmul.f32 0.5, %v1428_v47  ;;  %v3677_v15 = vpop.f32.mrb[73].mxu0 }
 0x1be   :  { %v1188_v46 = vmul.f32 0.7978846, %v1060_v0  ;;  %v1685_v5 = vmul.f32 %v1557_v30, %v3406_v12  ;;  %v1687_v43 = vmul.f32 %v1559_v13, %v3418_v62  ;;  %v1558_v8 = vmul.f32 0.5, %v1430_v50  ;;  %v3681_v32 = vpop.f32.mrb[74].mxu0 }
 0x1bf   :  { %v1061_v6 = vadd.f32 %v933_v58, %v3642_v33  ;;  %v1062_v26 = vadd.f32 %v934_v14, %v3646_v21  ;;  %v935_v31 = vmul.f32 0.044715, %v807_v18  ;;  %v1684_v39 = vmul.f32 %v1556_v51, %v3395_v61  ;;  %v3686_v41 = vpop.f32.mrb[75].mxu0 }
 0x1c0   :  { %2568 = vtanh.f32 %v1188_v46  ;;  %v1793_v54 = vpack.c.bf16 %v1687_v43, %v1685_v5  ;;  %v1686_v47 = vmul.f32 %v1558_v8, %v3414_v40  ;;  %v3691_v12 = vadd.f32 %v3543_v37, %v2956_v56 }
 0x1c1   :  { %v3693_v62 = vpop.eup %2560  ;;  %v1189_v0 = vmul.f32 0.7978846, %v1061_v6  ;;  %v1190_v30 = vmul.f32 0.7978846, %v1062_v26  ;;  %v1063_v13 = vadd.f32 %v935_v31, %v3661_v19  ;;  %v3698_v50 = vadd.f32 %v3551_v22, %v2958_v57 }
 0x1c2   :  { %v3700_v61 = vpop.eup %2562  ;;  %2083 = vmatprep.mubr.bf16.mxu1 %v1793_v54  ;;  %v1792_v58 = vpack.c.bf16 %v1686_v47, %v1684_v39  ;;  %v680_v40 = vmul.f32 %v3691_v12, %v3691_v12  ;;  %v3706_v37 = vadd.f32 %v3556_v45, %v2956_v56  ;;  %v3710_v14 = vadd.f32 %v3560_v4, %v2958_v57 }
 0x1c3   :  { %v3712_v18 = vpop.eup %2564  ;;  %2570 = vtanh.f32 %v1189_v0  ;;  %v1191_v22 = vmul.f32 0.7978846, %v1063_v13  ;;  %v681_v51 = vmul.f32 %v3698_v50, %v3698_v50  ;;  %v1433_v46 = vadd.f32 1.0, %v3582_v24 }
 0x1c4   :  { %v3717_v5 = vpop.eup %2566  ;;  %2572 = vtanh.f32 %v1190_v30  ;;  %2084 = vmatmul.mubr.bf16.gmra.mrb[32].mxu1 %v1792_v58  ;;  %v808_v45 = vmul.f32 %v680_v40, %v3691_v12  ;;  %v682_v43 = vmul.f32 %v3706_v37, %v3706_v37  ;;  %v683_v4 = vmul.f32 %v3710_v14, %v3710_v14  ;;  %v3724_v8 = vpop.f32.mrb[76].mxu0 }
 0x1c5   :  { %2574 = vtanh.f32 %v1191_v22  ;;  %v809_v6 = vmul.f32 %v681_v51, %v3698_v50  ;;  %v1435_v26 = vadd.f32 1.0, %v3603_v16  ;;  %v1561_v24 = vmul.f32 0.5, %v1433_v46  ;;  %v3728_v31 = vpop.f32.mrb[77].mxu0 }
 0x1c6   :  { %4775 = vst [vmem:[#allocation12_spill] sm:$0xff] %v3728_v31  ;;  %v936_v39 = vmul.f32 0.044715, %v808_v45  ;;  %v810_v54 = vmul.f32 %v682_v43, %v3706_v37  ;;  %v811_v47 = vmul.f32 %v683_v4, %v3710_v14  ;;  %v1432_v0 = vadd.f32 1.0, %v3568_v11  ;;  %v3733_v30 = vpop.f32.mrb[78].mxu0 }
 0x1c7   :  { %v937_v13 = vmul.f32 0.044715, %v809_v6  ;;  %v1563_v58 = vmul.f32 0.5, %v1435_v26  ;;  %v1689_v40 = vmul.f32 %v1561_v24, %v3466_v52  ;;  %v1434_v22 = vadd.f32 1.0, %v3592_v28  ;;  %v3737_v51 = vpop.f32.mrb[79].mxu0 }
 0x1c8   :  { %v1064_v16 = vadd.f32 %v936_v39, %v3691_v12  ;;  %v938_v46 = vmul.f32 0.044715, %v810_v54  ;;  %v939_v45 = vmul.f32 0.044715, %v811_v47  ;;  %v1560_v31 = vmul.f32 0.5, %v1432_v0 }
 0x1c9   :  { %v1065_v43 = vadd.f32 %v937_v13, %v3698_v50  ;;  %v1691_v4 = vmul.f32 %v1563_v58, %v3483_v34  ;;  %v1562_v11 = vmul.f32 0.5, %v1434_v22  ;;  %v3744_v6 = vadd.f32 %v3580_v29, %v2956_v56 }
 0x1ca   :  { %v3746_v26 = vpop.eup %2568  ;;  %v1192_v52 = vmul.f32 0.7978846, %v1064_v16  ;;  %v1066_v28 = vadd.f32 %v938_v46, %v3706_v37  ;;  %v1067_v24 = vadd.f32 %v939_v45, %v3710_v14  ;;  %v1688_v39 = vmul.f32 %v1560_v31, %v3451_v27 }
 0x1cb   :  { %v1193_v54 = vmul.f32 0.7978846, %v1065_v43  ;;  %v1795_v47 = vpack.c.bf16 %v1691_v4, %v1689_v40  ;;  %v1690_v0 = vmul.f32 %v1562_v11, %v3474_v35  ;;  %v684_v34 = vmul.f32 %v3744_v6, %v3744_v6 }
 0x1cc   :  { %2576 = vtanh.f32 %v1192_v52  ;;  %v1194_v13 = vmul.f32 0.7978846, %v1066_v28  ;;  %v1195_v29 = vmul.f32 0.7978846, %v1067_v24  ;;  %v3756_v58 = vadd.f32 %v3590_v44, %v2958_v57  ;;  %v3758_v22 = vpop.f32.mrb[80].mxu0 }
 0x1cd   :  { %v3760_v16 = vpop.eup %2570  ;;  %2578 = vtanh.f32 %v1193_v54  ;;  %2091 = vmatprep.mubr.bf16.mxu1 %v1795_v47  ;;  %v1794_v27 = vpack.c.bf16 %v1690_v0, %v1688_v39  ;;  %v812_v31 = vmul.f32 %v684_v34, %v3744_v6  ;;  %v3765_v35 = vadd.f32 %v3601_v10, %v2956_v56  ;;  %v3767_v40 = vpop.f32.mrb[81].mxu0 }
 0x1ce   :  { %4776 = vst [vmem:[#allocation13_spill] sm:$0xff] %v3767_v40  ;;  %v3769_v46 = vpop.eup %2572  ;;  %2580 = vtanh.f32 %v1194_v13  ;;  %v685_v44 = vmul.f32 %v3756_v58, %v3756_v58  ;;  %v3775_v45 = vadd.f32 %v3609_v1, %v2958_v57  ;;  %v1437_v43 = vadd.f32 1.0, %v3650_v7  ;;  %v3778_v4 = vpop.f32.mrb[82].mxu0 }
 0x1cf   :  { %4777 = vst [vmem:[#allocation14_spill] sm:$0xff] %v3778_v4  ;;  %v3780_v11 = vpop.eup %2574  ;;  %2582 = vtanh.f32 %v1195_v29  ;;  %2092 = vmatmul.mubr.bf16.gmra.mrb[36].mxu1 %v1794_v27  ;;  %v940_v10 = vmul.f32 0.044715, %v812_v31  ;;  %v686_v52 = vmul.f32 %v3765_v35, %v3765_v35  ;;  %v1439_v28 = vadd.f32 1.0, %v3663_v38  ;;  %v3785_v24 = vpop.f32.mrb[83].mxu0 }
 0x1d0   :  { %4778 = vst [vmem:[#allocation15_spill] sm:$0xff] %v3785_v24  ;;  %v813_v39 = vmul.f32 %v685_v44, %v3756_v58  ;;  %v687_v1 = vmul.f32 %v3775_v45, %v3775_v45  ;;  %v1565_v7 = vmul.f32 0.5, %v1437_v43  ;;  %v1436_v54 = vadd.f32 1.0, %v3632_v36 }
 0x1d1   :  { %v1068_v47 = vadd.f32 %v940_v10, %v3744_v6  ;;  %v814_v0 = vmul.f32 %v686_v52, %v3765_v35  ;;  %v1567_v34 = vmul.f32 0.5, %v1439_v28  ;;  %v1438_v13 = vadd.f32 1.0, %v3653_v49 }
 0x1d2   :  { %v941_v29 = vmul.f32 0.044715, %v813_v39  ;;  %v815_v38 = vmul.f32 %v687_v1, %v3775_v45  ;;  %v1693_v27 = vmul.f32 %v1565_v7, %v3524_v9  ;;  %v1564_v31 = vmul.f32 0.5, %v1436_v54 }
 0x1d3   :  { %v1196_v44 = vmul.f32 0.7978846, %v1068_v47  ;;  %v942_v24 = vmul.f32 0.044715, %v814_v0  ;;  %v1695_v4 = vmul.f32 %v1567_v34, %v3534_v60  ;;  %v1566_v43 = vmul.f32 0.5, %v1438_v13 }
 0x1d4   :  { %v1069_v36 = vadd.f32 %v941_v29, %v3756_v58  ;;  %v943_v40 = vmul.f32 0.044715, %v815_v38  ;;  %v1692_v10 = vmul.f32 %v1564_v31, %v3514_v53  ;;  %v3801_v52 = vadd.f32 %v3626_v63, %v2956_v56  ;;  %v3803_v49 = vpop.f32.mrb[84].mxu0 }
 0x1d5   :  { %2584 = vtanh.f32 %v1196_v44  ;;  %v1070_v9 = vadd.f32 %v942_v24, %v3765_v35  ;;  %v1797_v28 = vpack.c.bf16 %v1695_v4, %v1693_v27  ;;  %v1694_v39 = vmul.f32 %v1566_v43, %v3528_v59  ;;  %v3807_v1 = vpop.f32.mrb[85].mxu0 }
 0x1d6   :  { %v3809_v60 = vpop.eup %2576  ;;  %v1197_v7 = vmul.f32 0.7978846, %v1069_v36  ;;  %v1071_v54 = vadd.f32 %v943_v40, %v3775_v45  ;;  %v688_v53 = vmul.f32 %v3801_v52, %v3801_v52  ;;  %v3816_v63 = vadd.f32 %v3630_v23, %v2958_v57  ;;  %v3818_v47 = vpop.f32.mrb[86].mxu0 }
 0x1d7   :  { %v3820_v24 = vpop.eup %2578  ;;  %v1198_v4 = vmul.f32 0.7978846, %v1070_v9  ;;  %2099 = vmatprep.mubr.bf16.mxu1 %v1797_v28  ;;  %v1796_v59 = vpack.c.bf16 %v1694_v39, %v1692_v10  ;;  %v3824_v0 = vadd.f32 %v3638_v55, %v2956_v56  ;;  %v3828_v40 = vadd.f32 %v3648_v20, %v2958_v57  ;;  %v3830_v34 = vpop.f32.mrb[87].mxu0 }
 0x1d8   :  { %v3832_v13 = vpop.eup %2580  ;;  %2586 = vtanh.f32 %v1197_v7  ;;  %v1199_v23 = vmul.f32 0.7978846, %v1071_v54  ;;  %v816_v29 = vmul.f32 %v688_v53, %v3801_v52  ;;  %v689_v38 = vmul.f32 %v3816_v63, %v3816_v63 }
 0x1d9   :  { %v3837_v27 = vpop.eup %2582  ;;  %2588 = vtanh.f32 %v1198_v4  ;;  %2100 = vmatmul.mubr.bf16.gmra.mrb[40].mxu1 %v1796_v59  ;;  %v690_v55 = vmul.f32 %v3824_v0, %v3824_v0  ;;  %v691_v20 = vmul.f32 %v3828_v40, %v3828_v40  ;;  %v1441_v31 = vadd.f32 1.0, %v3700_v61 }
 0x1da   :  { %2590 = vtanh.f32 %v1199_v23  ;;  %v944_v44 = vmul.f32 0.044715, %v816_v29  ;;  %v817_v43 = vmul.f32 %v689_v38, %v3816_v63  ;;  %v1443_v36 = vadd.f32 1.0, %v3717_v5 }
 0x1db   :  { %v818_v10 = vmul.f32 %v690_v55, %v3824_v0  ;;  %v819_v9 = vmul.f32 %v691_v20, %v3828_v40  ;;  %v1569_v28 = vmul.f32 0.5, %v1441_v31  ;;  %v1440_v39 = vadd.f32 1.0, %v3693_v62 }
 0x1dc   :  { %v1072_v7 = vadd.f32 %v944_v44, %v3801_v52  ;;  %v945_v54 = vmul.f32 0.044715, %v817_v43  ;;  %v1571_v53 = vmul.f32 0.5, %v1443_v36  ;;  %v1442_v4 = vadd.f32 1.0, %v3712_v18  ;;  %v3851_v61 = vpop.f32.mrb[88].mxu0 }
 0x1dd   :  { %v946_v59 = vmul.f32 0.044715, %v818_v10  ;;  %v947_v23 = vmul.f32 0.044715, %v819_v9  ;;  %v1697_v29 = vmul.f32 %v1569_v28, %v3578_v2  ;;  %v1568_v5 = vmul.f32 0.5, %v1440_v39  ;;  %v3854_v38 = vpop.f32.mrb[89].mxu0 }
 0x1de   :  { %v1200_v55 = vmul.f32 0.7978846, %v1072_v7  ;;  %v1073_v20 = vadd.f32 %v945_v54, %v3816_v63  ;;  %v1699_v62 = vmul.f32 %v1571_v53, %v3598_v25  ;;  %v1570_v31 = vmul.f32 0.5, %v1442_v4  ;;  %v3858_v44 = vpop.f32.mrb[90].mxu0 }
 0x1df   :  { %v3860_v43 = vpop.eup %2584  ;;  %v1074_v18 = vadd.f32 %v946_v59, %v3824_v0  ;;  %v1075_v36 = vadd.f32 %v947_v23, %v3828_v40  ;;  %v1696_v10 = vmul.f32 %v1568_v5, %v3574_v48  ;;  %v3867_v2 = vadd.f32 %v3674_v42, %v2956_v56  ;;  %v3869_v9 = vpop.f32.mrb[91].mxu0 }
 0x1e0   :  { %2592 = vtanh.f32 %v1200_v55  ;;  %v1201_v28 = vmul.f32 0.7978846, %v1073_v20  ;;  %v1799_v25 = vpack.c.bf16 %v1699_v62, %v1697_v29  ;;  %v1698_v39 = vmul.f32 %v1570_v31, %v3588_v3 }
 0x1e1   :  { %v1202_v7 = vmul.f32 0.7978846, %v1074_v18  ;;  %v1203_v54 = vmul.f32 0.7978846, %v1075_v36  ;;  %v692_v53 = vmul.f32 %v3867_v2, %v3867_v2  ;;  %v3876_v4 = vadd.f32 %v3677_v15, %v2958_v57 }
 0x1e2   :  { %v3878_v48 = vpop.eup %2586  ;;  %2594 = vtanh.f32 %v1201_v28  ;;  %2107 = vmatprep.mubr.bf16.mxu1 %v1799_v25  ;;  %v1798_v42 = vpack.c.bf16 %v1698_v39, %v1696_v10  ;;  %v3882_v59 = vadd.f32 %v3681_v32, %v2956_v56  ;;  %v3886_v3 = vadd.f32 %v3686_v41, %v2958_v57 }
 0x1e3   :  { %v3888_v23 = vpop.eup %2588  ;;  %2596 = vtanh.f32 %v1202_v7  ;;  %v820_v29 = vmul.f32 %v692_v53, %v3867_v2  ;;  %v693_v15 = vmul.f32 %v3876_v4, %v3876_v4  ;;  %v1445_v5 = vadd.f32 1.0, %v3760_v16 }
 0x1e4   :  { %v3894_v55 = vpop.eup %2590  ;;  %2598 = vtanh.f32 %v1203_v54  ;;  %2108 = vmatmul.mubr.bf16.gmra.mrb[44].mxu1 %v1798_v42  ;;  %v694_v32 = vmul.f32 %v3882_v59, %v3882_v59  ;;  %v695_v41 = vmul.f32 %v3886_v3, %v3886_v3  ;;  %v1447_v20 = vadd.f32 1.0, %v3780_v11  ;;  %v3901_v62 = vpop.f32.mrb[92].mxu0 }
 0x1e5   :  { %4779 = vst [vmem:[#allocation16_spill] sm:$0xff] %v3901_v62  ;;  %v948_v31 = vmul.f32 0.044715, %v820_v29  ;;  %v821_v18 = vmul.f32 %v693_v15, %v3876_v4  ;;  %v1573_v36 = vmul.f32 0.5, %v1445_v5  ;;  %v1444_v16 = vadd.f32 1.0, %v3746_v26  ;;  %v3905_v10 = vpop.f32.mrb[93].mxu0 }
 0x1e6   :  { %4780 = vst [vmem:[#allocation17_spill] sm:$0xff] %v3905_v10  ;;  %v822_v28 = vmul.f32 %v694_v32, %v3882_v59  ;;  %v823_v25 = vmul.f32 %v695_v41, %v3886_v3  ;;  %v1575_v39 = vmul.f32 0.5, %v1447_v20  ;;  %v1446_v7 = vadd.f32 1.0, %v3769_v46  ;;  %v3910_v54 = vpop.f32.mrb[94].mxu0 }
 0x1e7   :  { %v1076_v11 = vadd.f32 %v948_v31, %v3867_v2  ;;  %v949_v53 = vmul.f32 0.044715, %v821_v18  ;;  %v1701_v42 = vmul.f32 %v1573_v36, %v3642_v33  ;;  %v1572_v29 = vmul.f32 0.5, %v1444_v16  ;;  %v3914_v15 = vpop.f32.mrb[95].mxu0 }
 0x1e8   :  { %v950_v26 = vmul.f32 0.044715, %v822_v28  ;;  %v951_v5 = vmul.f32 0.044715, %v823_v25  ;;  %v1703_v10 = vmul.f32 %v1575_v39, %v3661_v19  ;;  %v1574_v32 = vmul.f32 0.5, %v1446_v7 }
 0x1e9   :  { %v1204_v62 = vmul.f32 0.7978846, %v1076_v11  ;;  %v1077_v41 = vadd.f32 %v949_v53, %v3876_v4  ;;  %v1700_v46 = vmul.f32 %v1572_v29, %v3624_v17  ;;  %v3921_v20 = vadd.f32 %v3724_v8, %v2956_v56  ;;  %v4781_v17 = vld [vmem:[#allocation12_spill] sm:$0xff] }
 0x1ea   :  { %v3923_v31 = vpop.eup %2592  ;;  %v1078_v33 = vadd.f32 %v950_v26, %v3882_v59  ;;  %v1079_v18 = vadd.f32 %v951_v5, %v3886_v3  ;;  %v1801_v36 = vpack.c.bf16 %v1703_v10, %v1701_v42  ;;  %v1702_v16 = vmul.f32 %v1574_v32, %v3646_v21 }
 0x1eb   :  { %2600 = vtanh.f32 %v1204_v62  ;;  %v1205_v19 = vmul.f32 0.7978846, %v1077_v41  ;;  %v696_v28 = vmul.f32 %v3921_v20, %v3921_v20  ;;  %v3932_v25 = vadd.f32 %v4781_v17, %v2958_v57 }
 0x1ec   :  { %v3934_v8 = vpop.eup %2594  ;;  %v1206_v39 = vmul.f32 0.7978846, %v1078_v33  ;;  %v1207_v7 = vmul.f32 0.7978846, %v1079_v18  ;;  %2115 = vmatprep.mubr.bf16.mxu1 %v1801_v36  ;;  %v1800_v11 = vpack.c.bf16 %v1702_v16, %v1700_v46  ;;  %v3938_v10 = vadd.f32 %v3733_v30, %v2956_v56  ;;  %v3940_v21 = vpop.f32.mrb[96].mxu0 }
 0x1ed   :  { %v3942_v62 = vpop.eup %2596  ;;  %2602 = vtanh.f32 %v1205_v19  ;;  %v824_v53 = vmul.f32 %v696_v28, %v3921_v20  ;;  %v697_v42 = vmul.f32 %v3932_v25, %v3932_v25  ;;  %v3949_v29 = vadd.f32 %v3737_v51, %v2958_v57  ;;  %v3951_v26 = vpop.f32.mrb[97].mxu0 }
 0x1ee   :  { %4782 = vst [vmem:[#allocation12_spill] sm:$0xff] %v3951_v26  ;;  %v3953_v5 = vpop.eup %2598  ;;  %2604 = vtanh.f32 %v1206_v39  ;;  %2116 = vmatmul.mubr.bf16.gmra.mrb[48].mxu1 %v1800_v11  ;;  %v698_v30 = vmul.f32 %v3938_v10, %v3938_v10  ;;  %v1449_v32 = vadd.f32 1.0, %v3820_v24  ;;  %v1451_v41 = vadd.f32 1.0, %v3837_v27  ;;  %v3959_v46 = vpop.f32.mrb[98].mxu0 }
 0x1ef   :  { %4783 = vst [vmem:[#allocation18_spill] sm:$0xff] %v3959_v46  ;;  %2606 = vtanh.f32 %v1207_v7  ;;  %v952_v33 = vmul.f32 0.044715, %v824_v53  ;;  %v825_v51 = vmul.f32 %v697_v42, %v3932_v25  ;;  %v699_v18 = vmul.f32 %v3949_v29, %v3949_v29  ;;  %v3964_v36 = vpop.f32.mrb[99].mxu0 }
 0x1f0   :  { %4784 = vst [vmem:[#allocation19_spill] sm:$0xff] %v3964_v36  ;;  %v826_v16 = vmul.f32 %v698_v30, %v3938_v10  ;;  %v1577_v19 = vmul.f32 0.5, %v1449_v32  ;;  %v1579_v28 = vmul.f32 0.5, %v1451_v41  ;;  %v1448_v17 = vadd.f32 1.0, %v3809_v60 }
 0x1f1   :  { %v1080_v24 = vadd.f32 %v952_v33, %v3921_v20  ;;  %v953_v27 = vmul.f32 0.044715, %v825_v51  ;;  %v827_v39 = vmul.f32 %v699_v18, %v3949_v29  ;;  %v1450_v7 = vadd.f32 1.0, %v3832_v13 }
 0x1f2   :  { %v954_v11 = vmul.f32 0.044715, %v826_v16  ;;  %v1705_v53 = vmul.f32 %v1577_v19, %v3698_v50  ;;  %v1707_v42 = vmul.f32 %v1579_v28, %v3710_v14  ;;  %v1576_v46 = vmul.f32 0.5, %v1448_v17  ;;  %v4787_v17 = vld [vmem:[#allocation14_spill] sm:$0xff] }
 0x1f3   :  { %v1208_v36 = vmul.f32 0.7978846, %v1080_v24  ;;  %v1081_v30 = vadd.f32 %v953_v27, %v3932_v25  ;;  %v955_v32 = vmul.f32 0.044715, %v827_v39  ;;  %v1578_v41 = vmul.f32 0.5, %v1450_v7 }
 0x1f4   :  { %v1082_v60 = vadd.f32 %v954_v11, %v3938_v10  ;;  %v1803_v26 = vpack.c.bf16 %v1707_v42, %v1705_v53  ;;  %v1704_v33 = vmul.f32 %v1576_v46, %v3691_v12  ;;  %v3978_v51 = vadd.f32 %v3758_v22, %v2956_v56  ;;  %v3980_v13 = vpop.f32.mrb[100].mxu0  ;;  %v4786_v22 = vld [vmem:[#allocation13_spill] sm:$0xff] }
 0x1f5   :  { %v3982_v50 = vpop.eup %2600  ;;  %2608 = vtanh.f32 %v1208_v36  ;;  %v1209_v14 = vmul.f32 0.7978846, %v1081_v30  ;;  %v1083_v18 = vadd.f32 %v955_v32, %v3949_v29  ;;  %v1706_v16 = vmul.f32 %v1578_v41, %v3706_v37  ;;  %v3986_v19 = vpop.f32.mrb[101].mxu0 }
 0x1f6   :  { %4785 = vst [vmem:[#allocation20_spill] sm:$0xff] %v3986_v19  ;;  %v1210_v28 = vmul.f32 0.7978846, %v1082_v60  ;;  %2123 = vmatprep.mubr.bf16.mxu1 %v1803_v26  ;;  %v700_v12 = vmul.f32 %v3978_v51, %v3978_v51  ;;  %v3992_v46 = vadd.f32 %v4786_v22, %v2958_v57  ;;  %v3996_v24 = vadd.f32 %v4787_v17, %v2956_v56  ;;  %v3998_v36 = vpop.f32.mrb[102].mxu0  ;;  %v4789_v26 = vld [vmem:[#allocation15_spill] sm:$0xff] }
 0x1f7   :  { %4788 = vst [vmem:[#allocation13_spill] sm:$0xff] %v3998_v36  ;;  %v4000_v27 = vpop.eup %2602  ;;  %2610 = vtanh.f32 %v1209_v14  ;;  %v1211_v37 = vmul.f32 0.7978846, %v1083_v18  ;;  %v1802_v39 = vpack.c.bf16 %v1706_v16, %v1704_v33  ;;  %v4004_v7 = vadd.f32 %v4789_v26, %v2958_v57  ;;  %v4006_v11 = vpop.f32.mrb[103].mxu0 }
 0x1f8   :  { %4790 = vst [vmem:[#allocation14_spill] sm:$0xff] %v4006_v11  ;;  %v4008_v53 = vpop.eup %2604  ;;  %2612 = vtanh.f32 %v1210_v28  ;;  %v828_v42 = vmul.f32 %v700_v12, %v3978_v51  ;;  %v701_v30 = vmul.f32 %v3992_v46, %v3992_v46  ;;  %v702_v32 = vmul.f32 %v3996_v24, %v3996_v24 }
 0x1f9   :  { %v4015_v41 = vpop.eup %2606  ;;  %2614 = vtanh.f32 %v1211_v37  ;;  %2124 = vmatmul.mubr.bf16.gmra.mrb[52].mxu1 %v1802_v39  ;;  %v703_v60 = vmul.f32 %v4004_v7, %v4004_v7  ;;  %v1453_v33 = vadd.f32 1.0, %v3878_v48  ;;  %v1455_v14 = vadd.f32 1.0, %v3894_v55 }
 0x1fa   :  { %v956_v18 = vmul.f32 0.044715, %v828_v42  ;;  %v829_v16 = vmul.f32 %v701_v30, %v3992_v46  ;;  %v830_v28 = vmul.f32 %v702_v32, %v3996_v24  ;;  %v1452_v12 = vadd.f32 1.0, %v3860_v43 }
 0x1fb   :  { %v831_v22 = vmul.f32 %v703_v60, %v4004_v7  ;;  %v1581_v17 = vmul.f32 0.5, %v1453_v33  ;;  %v1583_v26 = vmul.f32 0.5, %v1455_v14  ;;  %v1454_v37 = vadd.f32 1.0, %v3888_v23 }
 0x1fc   :  { %v1084_v39 = vadd.f32 %v956_v18, %v3978_v51  ;;  %v957_v11 = vmul.f32 0.044715, %v829_v16  ;;  %v958_v36 = vmul.f32 0.044715, %v830_v28  ;;  %v1580_v48 = vmul.f32 0.5, %v1452_v12  ;;  %v4027_v19 = vpop.f32.mrb[104].mxu0 }
 0x1fd   :  { %v959_v55 = vmul.f32 0.044715, %v831_v22  ;;  %v1709_v42 = vmul.f32 %v1581_v17, %v3756_v58  ;;  %v1711_v30 = vmul.f32 %v1583_v26, %v3775_v45  ;;  %v1582_v32 = vmul.f32 0.5, %v1454_v37  ;;  %v4031_v43 = vpop.f32.mrb[105].mxu0 }
 0x1fe   :  { %v1212_v60 = vmul.f32 0.7978846, %v1084_v39  ;;  %v1085_v33 = vadd.f32 %v957_v11, %v3992_v46  ;;  %v1086_v23 = vadd.f32 %v958_v36, %v3996_v24  ;;  %v1708_v14 = vmul.f32 %v1580_v48, %v3744_v6  ;;  %v4036_v18 = vpop.f32.mrb[106].mxu0 }
 0x1ff   :  { %v4038_v16 = vpop.eup %2608  ;;  %v1087_v28 = vadd.f32 %v959_v55, %v4004_v7  ;;  %v1805_v12 = vpack.c.bf16 %v1711_v30, %v1709_v42  ;;  %v1710_v58 = vmul.f32 %v1582_v32, %v3765_v35  ;;  %v4044_v45 = vadd.f32 %v3803_v49, %v2956_v56  ;;  %v4046_v22 = vpop.f32.mrb[107].mxu0 }
 0x200   :  { %2616 = vtanh.f32 %v1212_v60  ;;  %v1213_v11 = vmul.f32 0.7978846, %v1085_v33  ;;  %v1214_v36 = vmul.f32 0.7978846, %v1086_v23  ;;  %v4050_v6 = vadd.f32 %v3807_v1, %v2958_v57 }
 0x201   :  { %v4052_v17 = vpop.eup %2610  ;;  %v1215_v26 = vmul.f32 0.7978846, %v1087_v28  ;;  %2131 = vmatprep.mubr.bf16.mxu1 %v1805_v12  ;;  %v1804_v37 = vpack.c.bf16 %v1710_v58, %v1708_v14  ;;  %v704_v35 = vmul.f32 %v4044_v45, %v4044_v45  ;;  %v4058_v49 = vadd.f32 %v3818_v47, %v2956_v56 }
 0x202   :  { %v4060_v39 = vpop.eup %2612  ;;  %2618 = vtanh.f32 %v1213_v11  ;;  %v705_v48 = vmul.f32 %v4050_v6, %v4050_v6  ;;  %v4066_v1 = vadd.f32 %v3830_v34, %v2958_v57  ;;  %v1457_v55 = vadd.f32 1.0, %v3934_v8 }
 0x203   :  { %v4069_v42 = vpop.eup %2614  ;;  %2620 = vtanh.f32 %v1214_v36  ;;  %2132 = vmatmul.mubr.bf16.gmra.mrb[56].mxu1 %v1804_v37  ;;  %v832_v30 = vmul.f32 %v704_v35, %v4044_v45  ;;  %v706_v47 = vmul.f32 %v4058_v49, %v4058_v49  ;;  %v1459_v32 = vadd.f32 1.0, %v3953_v5 }
 0x204   :  { %2622 = vtanh.f32 %v1215_v26  ;;  %v833_v60 = vmul.f32 %v705_v48, %v4050_v6  ;;  %v707_v34 = vmul.f32 %v4066_v1, %v4066_v1  ;;  %v1585_v33 = vmul.f32 0.5, %v1457_v55  ;;  %v4078_v23 = vpop.f32.mrb[108].mxu0 }
 0x205   :  { %v960_v8 = vmul.f32 0.044715, %v832_v30  ;;  %v834_v14 = vmul.f32 %v706_v47, %v4058_v49  ;;  %v1587_v28 = vmul.f32 0.5, %v1459_v32  ;;  %v1456_v12 = vadd.f32 1.0, %v3923_v31  ;;  %v4082_v58 = vpop.f32.mrb[109].mxu0 }
 0x206   :  { %v961_v11 = vmul.f32 0.044715, %v833_v60  ;;  %v835_v5 = vmul.f32 %v707_v34, %v4066_v1  ;;  %v1713_v36 = vmul.f32 %v1585_v33, %v3816_v63  ;;  %v1458_v26 = vadd.f32 1.0, %v3942_v62  ;;  %v4087_v37 = vpop.f32.mrb[110].mxu0 }
 0x207   :  { %v1088_v35 = vadd.f32 %v960_v8, %v4044_v45  ;;  %v962_v48 = vmul.f32 0.044715, %v834_v14  ;;  %v1715_v55 = vmul.f32 %v1587_v28, %v3828_v40  ;;  %v1584_v30 = vmul.f32 0.5, %v1456_v12  ;;  %v4091_v47 = vpop.f32.mrb[111].mxu0 }
 0x208   :  { %v1089_v31 = vadd.f32 %v961_v11, %v4050_v6  ;;  %v963_v32 = vmul.f32 0.044715, %v835_v5  ;;  %v1586_v60 = vmul.f32 0.5, %v1458_v26  ;;  %v4096_v34 = vadd.f32 %v3851_v61, %v2956_v56 }
 0x209   :  { %v1216_v63 = vmul.f32 0.7978846, %v1088_v35  ;;  %v1090_v62 = vadd.f32 %v962_v48, %v4058_v49  ;;  %v1807_v33 = vpack.c.bf16 %v1715_v55, %v1713_v36  ;;  %v1712_v8 = vmul.f32 %v1584_v30, %v3801_v52 }
 0x20a   :  { %v4100_v14 = vpop.eup %2616  ;;  %v1217_v40 = vmul.f32 0.7978846, %v1089_v31  ;;  %v1091_v28 = vadd.f32 %v963_v32, %v4066_v1  ;;  %v1714_v12 = vmul.f32 %v1586_v60, %v3824_v0  ;;  %v708_v11 = vmul.f32 %v4096_v34, %v4096_v34 }
 0x20b   :  { %2624 = vtanh.f32 %v1216_v63  ;;  %v1218_v5 = vmul.f32 0.7978846, %v1090_v62  ;;  %2139 = vmatprep.mubr.bf16.mxu1 %v1807_v33  ;;  %v4108_v61 = vadd.f32 %v3854_v38, %v2958_v57  ;;  %v4112_v52 = vadd.f32 %v3858_v44, %v2956_v56 }
 0x20c   :  { %v4114_v36 = vpop.eup %2618  ;;  %2626 = vtanh.f32 %v1217_v40  ;;  %v1219_v26 = vmul.f32 0.7978846, %v1091_v28  ;;  %v1806_v35 = vpack.c.bf16 %v1714_v12, %v1712_v8  ;;  %v836_v0 = vmul.f32 %v708_v11, %v4096_v34  ;;  %v4117_v48 = vpop.f32.mrb[112].mxu0 }
 0x20d   :  { %4791 = vst [vmem:[#allocation15_spill] sm:$0xff] %v4117_v48  ;;  %v4119_v55 = vpop.eup %2620  ;;  %2628 = vtanh.f32 %v1218_v5  ;;  %v709_v38 = vmul.f32 %v4108_v61, %v4108_v61  ;;  %v710_v30 = vmul.f32 %v4112_v52, %v4112_v52  ;;  %v4127_v44 = vadd.f32 %v3869_v9, %v2958_v57  ;;  %v4129_v31 = vpop.f32.mrb[113].mxu0 }
 0x20e   :  { %4792 = vst [vmem:[#allocation21_spill] sm:$0xff] %v4129_v31  ;;  %v4131_v32 = vpop.eup %2622  ;;  %2630 = vtanh.f32 %v1219_v26  ;;  %2140 = vmatmul.mubr.bf16.gmra.mrb[60].mxu1 %v1806_v35  ;;  %v964_v60 = vmul.f32 0.044715, %v836_v0  ;;  %v1461_v63 = vadd.f32 1.0, %v4000_v27  ;;  %v1463_v62 = vadd.f32 1.0, %v4015_v41  ;;  %v4135_v33 = vpop.f32.mrb[114].mxu0 }
 0x20f   :  { %4793 = vst [vmem:[#allocation22_spill] sm:$0xff] %v4135_v33  ;;  %v837_v8 = vmul.f32 %v709_v38, %v4108_v61  ;;  %v838_v40 = vmul.f32 %v710_v30, %v4112_v52  ;;  %v711_v9 = vmul.f32 %v4127_v44, %v4127_v44  ;;  %v1460_v28 = vadd.f32 1.0, %v3982_v50  ;;  %v4142_v12 = vpop.f32.mrb[115].mxu0 }
 0x210   :  { %4794 = vst [vmem:[#allocation23_spill] sm:$0xff] %v4142_v12  ;;  %v1092_v11 = vadd.f32 %v964_v60, %v4096_v34  ;;  %v1589_v5 = vmul.f32 0.5, %v1461_v63  ;;  %v1591_v26 = vmul.f32 0.5, %v1463_v62  ;;  %v1462_v27 = vadd.f32 1.0, %v4008_v53 }
 0x211   :  { %v965_v41 = vmul.f32 0.044715, %v837_v8  ;;  %v966_v35 = vmul.f32 0.044715, %v838_v40  ;;  %v839_v0 = vmul.f32 %v711_v9, %v4127_v44  ;;  %v1588_v38 = vmul.f32 0.5, %v1460_v28  ;;  %v4795_v8 = vld [vmem:[#allocation16_spill] sm:$0xff] }
 0x212   :  { %v1220_v33 = vmul.f32 0.7978846, %v1092_v11  ;;  %v1717_v30 = vmul.f32 %v1589_v5, %v3876_v4  ;;  %v1719_v31 = vmul.f32 %v1591_v26, %v3886_v3  ;;  %v1590_v48 = vmul.f32 0.5, %v1462_v27  ;;  %v4796_v5 = vld [vmem:[#allocation17_spill] sm:$0xff] }
 0x213   :  { %v1093_v50 = vadd.f32 %v965_v41, %v4108_v61  ;;  %v1094_v12 = vadd.f32 %v966_v35, %v4112_v52  ;;  %v967_v60 = vmul.f32 0.044715, %v839_v0  ;;  %v1716_v63 = vmul.f32 %v1588_v38, %v3867_v2 }
 0x214   :  { %2632 = vtanh.f32 %v1220_v33  ;;  %v1809_v53 = vpack.c.bf16 %v1719_v31, %v1717_v30  ;;  %v1718_v62 = vmul.f32 %v1590_v48, %v3882_v59  ;;  %v4155_v40 = vadd.f32 %v4795_v8, %v2956_v56  ;;  %v4157_v9 = vpop.f32.mrb[116].mxu0 }
 0x215   :  { %v4159_v4 = vpop.eup %2624  ;;  %v1221_v3 = vmul.f32 0.7978846, %v1093_v50  ;;  %v1222_v28 = vmul.f32 0.7978846, %v1094_v12  ;;  %v1095_v11 = vadd.f32 %v967_v60, %v4127_v44  ;;  %v4164_v26 = vadd.f32 %v4796_v5, %v2958_v57  ;;  %v4166_v2 = vpop.f32.mrb[117].mxu0 }
 0x216   :  { %v4168_v31 = vpop.eup %2626  ;;  %2147 = vmatprep.mubr.bf16.mxu1 %v1809_v53  ;;  %v1808_v59 = vpack.c.bf16 %v1718_v62, %v1716_v63  ;;  %v712_v48 = vmul.f32 %v4155_v40, %v4155_v40  ;;  %v4174_v33 = vadd.f32 %v3910_v54, %v2956_v56  ;;  %v4178_v12 = vadd.f32 %v3914_v15, %v2958_v57  ;;  %v4180_v27 = vpop.f32.mrb[118].mxu0 }
 0x217   :  { %4797 = vst [vmem:[#allocation16_spill] sm:$0xff] %v4180_v27  ;;  %v4182_v41 = vpop.eup %2628  ;;  %2634 = vtanh.f32 %v1221_v3  ;;  %v1223_v35 = vmul.f32 0.7978846, %v1095_v11  ;;  %v713_v0 = vmul.f32 %v4164_v26, %v4164_v26  ;;  %v1465_v38 = vadd.f32 1.0, %v4052_v17  ;;  %v4187_v30 = vpop.f32.mrb[119].mxu0 }
 0x218   :  { %4798 = vst [vmem:[#allocation17_spill] sm:$0xff] %v4187_v30  ;;  %v4189_v50 = vpop.eup %2630  ;;  %2636 = vtanh.f32 %v1222_v28  ;;  %2148 = vmatmul.mubr.bf16.gmra.mrb[64].mxu1 %v1808_v59  ;;  %v840_v54 = vmul.f32 %v712_v48, %v4155_v40  ;;  %v714_v15 = vmul.f32 %v4174_v33, %v4174_v33  ;;  %v715_v60 = vmul.f32 %v4178_v12, %v4178_v12 }
 0x219   :  { %2638 = vtanh.f32 %v1223_v35  ;;  %v841_v63 = vmul.f32 %v713_v0, %v4164_v26  ;;  %v1467_v53 = vadd.f32 1.0, %v4069_v42  ;;  %v1593_v17 = vmul.f32 0.5, %v1465_v38 }
 0x21a   :  { %v968_v62 = vmul.f32 0.044715, %v840_v54  ;;  %v842_v8 = vmul.f32 %v714_v15, %v4174_v33  ;;  %v843_v3 = vmul.f32 %v715_v60, %v4178_v12  ;;  %v1464_v28 = vadd.f32 1.0, %v4038_v16 }
 0x21b   :  { %v969_v11 = vmul.f32 0.044715, %v841_v63  ;;  %v1595_v5 = vmul.f32 0.5, %v1467_v53  ;;  %v1721_v59 = vmul.f32 %v1593_v17, %v3932_v25  ;;  %v1466_v48 = vadd.f32 1.0, %v4060_v39 }
 0x21c   :  { %v1096_v35 = vadd.f32 %v968_v62, %v4155_v40  ;;  %v970_v30 = vmul.f32 0.044715, %v842_v8  ;;  %v971_v0 = vmul.f32 0.044715, %v843_v3  ;;  %v1592_v27 = vmul.f32 0.5, %v1464_v28  ;;  %v4204_v42 = vpop.f32.mrb[120].mxu0 }
 0x21d   :  { %v1097_v38 = vadd.f32 %v969_v11, %v4164_v26  ;;  %v1723_v54 = vmul.f32 %v1595_v5, %v3949_v29  ;;  %v1594_v15 = vmul.f32 0.5, %v1466_v48  ;;  %v4210_v16 = vadd.f32 %v3940_v21, %v2956_v56  ;;  %v4212_v60 = vpop.f32.mrb[121].mxu0 }
 0x21e   :  { %4799 = vst [vmem:[#allocation24_spill] sm:$0xff] %v4212_v60  ;;  %v4214_v25 = vpop.eup %2632  ;;  %v1224_v39 = vmul.f32 0.7978846, %v1096_v35  ;;  %v1098_v63 = vadd.f32 %v970_v30, %v4174_v33  ;;  %v1099_v53 = vadd.f32 %v971_v0, %v4178_v12  ;;  %v1720_v17 = vmul.f32 %v1592_v27, %v3921_v20  ;;  %v4219_v62 = vpop.f32.mrb[122].mxu0  ;;  %v4802_v30 = vld [vmem:[#allocation12_spill] sm:$0xff] }
 0x21f   :  { %4800 = vst [vmem:[#allocation25_spill] sm:$0xff] %v4219_v62  ;;  %v1225_v8 = vmul.f32 0.7978846, %v1097_v38  ;;  %v1811_v29 = vpack.c.bf16 %v1723_v54, %v1721_v59  ;;  %v1722_v3 = vmul.f32 %v1594_v15, %v3938_v10  ;;  %v716_v21 = vmul.f32 %v4210_v16, %v4210_v16  ;;  %v4224_v28 = vpop.f32.mrb[123].mxu0  ;;  %v4803_v10 = vld [vmem:[#allocation18_spill] sm:$0xff]  ;;  %v4804_v54 = vld [vmem:[#allocation19_spill] sm:$0xff] }
 0x220   :  { %4801 = vst [vmem:[#allocation26_spill] sm:$0xff] %v4224_v28  ;;  %2640 = vtanh.f32 %v1224_v39  ;;  %v1226_v11 = vmul.f32 0.7978846, %v1098_v63  ;;  %v1227_v5 = vmul.f32 0.7978846, %v1099_v53  ;;  %v4228_v48 = vadd.f32 %v4802_v30, %v2958_v57 }
 0x221   :  { %v4230_v35 = vpop.eup %2634  ;;  %2642 = vtanh.f32 %v1225_v8  ;;  %2155 = vmatprep.mubr.bf16.mxu1 %v1811_v29  ;;  %v1810_v20 = vpack.c.bf16 %v1722_v3, %v1720_v17  ;;  %v844_v27 = vmul.f32 %v716_v21, %v4210_v16  ;;  %v4235_v59 = vadd.f32 %v4803_v10, %v2956_v56 }
 0x222   :  { %v4237_v0 = vpop.eup %2636  ;;  %2644 = vtanh.f32 %v1226_v11  ;;  %v717_v38 = vmul.f32 %v4228_v48, %v4228_v48  ;;  %v4243_v15 = vadd.f32 %v4804_v54, %v2958_v57  ;;  %v1469_v39 = vadd.f32 1.0, %v4114_v36 }
 0x223   :  { %v4246_v63 = vpop.eup %2638  ;;  %2646 = vtanh.f32 %v1227_v5  ;;  %2156 = vmatmul.mubr.bf16.gmra.mrb[68].mxu1 %v1810_v20  ;;  %v972_v53 = vmul.f32 0.044715, %v844_v27  ;;  %v718_v17 = vmul.f32 %v4235_v59, %v4235_v59  ;;  %v1471_v8 = vadd.f32 1.0, %v4131_v32 }
 0x224   :  { %v845_v29 = vmul.f32 %v717_v38, %v4228_v48  ;;  %v719_v3 = vmul.f32 %v4243_v15, %v4243_v15  ;;  %v1597_v21 = vmul.f32 0.5, %v1469_v39  ;;  %v1468_v11 = vadd.f32 1.0, %v4100_v14  ;;  %v4255_v30 = vpop.f32.mrb[124].mxu0 }
 0x225   :  { %4805 = vst [vmem:[#allocation12_spill] sm:$0xff] %v4255_v30  ;;  %v1100_v36 = vadd.f32 %v972_v53, %v4210_v16  ;;  %v846_v5 = vmul.f32 %v718_v17, %v4235_v59  ;;  %v1599_v20 = vmul.f32 0.5, %v1471_v8  ;;  %v1470_v27 = vadd.f32 1.0, %v4119_v55  ;;  %v4260_v10 = vpop.f32.mrb[125].mxu0 }
 0x226   :  { %4806 = vst [vmem:[#allocation18_spill] sm:$0xff] %v4260_v10  ;;  %v973_v32 = vmul.f32 0.044715, %v845_v29  ;;  %v847_v38 = vmul.f32 %v719_v3, %v4243_v15  ;;  %v1725_v54 = vmul.f32 %v1597_v21, %v3992_v46  ;;  %v1596_v28 = vmul.f32 0.5, %v1468_v11  ;;  %v4264_v39 = vpop.f32.mrb[126].mxu0 }
 0x227   :  { %4807 = vst [vmem:[#allocation19_spill] sm:$0xff] %v4264_v39  ;;  %v1228_v14 = vmul.f32 0.7978846, %v1100_v36  ;;  %v974_v62 = vmul.f32 0.044715, %v846_v5  ;;  %v1727_v30 = vmul.f32 %v1599_v20, %v4004_v7  ;;  %v1598_v53 = vmul.f32 0.5, %v1470_v27 }
 0x228   :  { %v4267_v60 = vpop.f32.mrb[127].mxu0  ;;  %v1101_v17 = vadd.f32 %v973_v32, %v4228_v48  ;;  %v975_v55 = vmul.f32 0.044715, %v847_v38  ;;  %v1724_v8 = vmul.f32 %v1596_v28, %v3978_v51  ;;  %v4273_v29 = vadd.f32 %v3980_v13, %v2956_v56  ;;  %v4809_v51 = vld [vmem:[#allocation20_spill] sm:$0xff]  ;;  %v4811_v27 = vld [vmem:[#allocation14_spill] sm:$0xff] }
 0x229   :  { %4808 = vst [vmem:[#allocation27_spill] sm:$0xff] %v4267_v60  ;;  %2648 = vtanh.f32 %v1228_v14  ;;  %v1102_v46 = vadd.f32 %v974_v62, %v4235_v59  ;;  %v1813_v3 = vpack.c.bf16 %v1727_v30, %v1725_v54  ;;  %v1726_v21 = vmul.f32 %v1598_v53, %v3996_v24  ;;  %v4810_v30 = vld [vmem:[#allocation13_spill] sm:$0xff] }
 0x22a   :  { %v4277_v11 = vpop.eup %2640  ;;  %v1229_v7 = vmul.f32 0.7978846, %v1101_v17  ;;  %v1103_v36 = vadd.f32 %v975_v55, %v4243_v15  ;;  %v720_v5 = vmul.f32 %v4273_v29, %v4273_v29  ;;  %v4284_v28 = vadd.f32 %v4809_v51, %v2958_v57 }
 0x22b   :  { %v4286_v13 = vpop.eup %2642  ;;  %v1230_v20 = vmul.f32 0.7978846, %v1102_v46  ;;  %2163 = vmatprep.mubr.bf16.mxu1 %v1813_v3  ;;  %v1812_v62 = vpack.c.bf16 %v1726_v21, %v1724_v8  ;;  %v4290_v24 = vadd.f32 %v4810_v30, %v2956_v56  ;;  %v4294_v32 = vadd.f32 %v4811_v27, %v2958_v57 }
 0x22c   :  { %v4296_v38 = vpop.eup %2644  ;;  %2650 = vtanh.f32 %v1229_v7  ;;  %v1231_v54 = vmul.f32 0.7978846, %v1103_v36  ;;  %v848_v14 = vmul.f32 %v720_v5, %v4273_v29  ;;  %v721_v53 = vmul.f32 %v4284_v28, %v4284_v28  ;;  %v4301_v17 = vpop.f32.mrb[128].mxu0 }
 0x22d   :  { %4812 = vst [vmem:[#allocation20_spill] sm:$0xff] %v4301_v17  ;;  %v4303_v55 = vpop.eup %2646  ;;  %2652 = vtanh.f32 %v1230_v20  ;;  %2164 = vmatmul.mubr.bf16.gmra.mrb[72].mxu1 %v1812_v62  ;;  %v722_v8 = vmul.f32 %v4290_v24, %v4290_v24  ;;  %v723_v46 = vmul.f32 %v4294_v32, %v4294_v32  ;;  %v1473_v3 = vadd.f32 1.0, %v4168_v31  ;;  %v2007_v21 = vpop.f32.mrb[129].mxu0 }
 0x22e   :  { %2654 = vtanh.f32 %v1231_v54  ;;  %v976_v7 = vmul.f32 0.044715, %v848_v14  ;;  %v849_v36 = vmul.f32 %v721_v53, %v4284_v28  ;;  %v1475_v5 = vadd.f32 1.0, %v4189_v50  ;;  %v4312_v51 = vpop.f32.mrb[130].mxu0 }
 0x22f   :  { %4813 = vst [vmem:[#allocation13_spill] sm:$0xff] %v4312_v51  ;;  %v850_v20 = vmul.f32 %v722_v8, %v4290_v24  ;;  %v851_v62 = vmul.f32 %v723_v46, %v4294_v32  ;;  %v1601_v30 = vmul.f32 0.5, %v1473_v3  ;;  %v1472_v27 = vadd.f32 1.0, %v4159_v4  ;;  %v2010_v17 = vpop.f32.mrb[131].mxu0 }
 0x230   :  { %v1104_v60 = vadd.f32 %v976_v7, %v4273_v29  ;;  %v977_v31 = vmul.f32 0.044715, %v849_v36  ;;  %v1603_v21 = vmul.f32 0.5, %v1475_v5  ;;  %v1474_v54 = vadd.f32 1.0, %v4182_v41 }
 0x231   :  { %v978_v14 = vmul.f32 0.044715, %v850_v20  ;;  %v979_v53 = vmul.f32 0.044715, %v851_v62  ;;  %v1729_v50 = vmul.f32 %v1601_v30, %v4050_v6  ;;  %v1600_v39 = vmul.f32 0.5, %v1472_v27 }
 0x232   :  { %v1232_v51 = vmul.f32 0.7978846, %v1104_v60  ;;  %v1105_v8 = vadd.f32 %v977_v31, %v4284_v28  ;;  %v1731_v46 = vmul.f32 %v1603_v21, %v4066_v1  ;;  %v1602_v3 = vmul.f32 0.5, %v1474_v54 }
 0x233   :  { %v4322_v10 = vpop.eup %2648  ;;  %v1106_v4 = vadd.f32 %v978_v14, %v4290_v24  ;;  %v1107_v17 = vadd.f32 %v979_v53, %v4294_v32  ;;  %v1728_v7 = vmul.f32 %v1600_v39, %v4044_v45  ;;  %v4329_v41 = vadd.f32 %v4027_v19, %v2956_v56 }
 0x234   :  { %2656 = vtanh.f32 %v1232_v51  ;;  %v1233_v6 = vmul.f32 0.7978846, %v1105_v8  ;;  %v1815_v60 = vpack.c.bf16 %v1731_v46, %v1729_v50  ;;  %v1730_v36 = vmul.f32 %v1602_v3, %v4058_v49 }
 0x235   :  { %v1234_v5 = vmul.f32 0.7978846, %v1106_v4  ;;  %v1235_v1 = vmul.f32 0.7978846, %v1107_v17  ;;  %v724_v20 = vmul.f32 %v4329_v41, %v4329_v41  ;;  %v4336_v62 = vadd.f32 %v4031_v43, %v2958_v57 }
 0x236   :  { %v4338_v30 = vpop.eup %2650  ;;  %2658 = vtanh.f32 %v1233_v6  ;;  %2171 = vmatprep.mubr.bf16.mxu1 %v1815_v60  ;;  %v1814_v19 = vpack.c.bf16 %v1730_v36, %v1728_v7  ;;  %v4342_v45 = vadd.f32 %v4036_v18, %v2956_v56  ;;  %v4346_v49 = vadd.f32 %v4046_v22, %v2958_v57 }
 0x237   :  { %v4348_v39 = vpop.eup %2652  ;;  %2660 = vtanh.f32 %v1234_v5  ;;  %v852_v51 = vmul.f32 %v724_v20, %v4329_v41  ;;  %v725_v43 = vmul.f32 %v4336_v62, %v4336_v62  ;;  %v1477_v27 = vadd.f32 1.0, %v4230_v35 }
 0x238   :  { %v4354_v31 = vpop.eup %2654  ;;  %2662 = vtanh.f32 %v1235_v1  ;;  %2172 = vmatmul.mubr.bf16.gmra.mrb[76].mxu1 %v1814_v19  ;;  %v726_v18 = vmul.f32 %v4342_v45, %v4342_v45  ;;  %v727_v22 = vmul.f32 %v4346_v49, %v4346_v49  ;;  %v1479_v21 = vadd.f32 1.0, %v4246_v63 }
 0x239   :  { %v980_v54 = vmul.f32 0.044715, %v852_v51  ;;  %v853_v14 = vmul.f32 %v725_v43, %v4336_v62  ;;  %v1605_v53 = vmul.f32 0.5, %v1477_v27  ;;  %v1476_v50 = vadd.f32 1.0, %v4214_v25 }
 0x23a   :  { %v854_v35 = vmul.f32 %v726_v18, %v4342_v45  ;;  %v855_v8 = vmul.f32 %v727_v22, %v4346_v49  ;;  %v1607_v46 = vmul.f32 0.5, %v1479_v21  ;;  %v1478_v3 = vadd.f32 1.0, %v4237_v0 }
 0x23b   :  { %v1108_v4 = vadd.f32 %v980_v54, %v4329_v41  ;;  %v981_v17 = vmul.f32 0.044715, %v853_v14  ;;  %v1733_v7 = vmul.f32 %v1605_v53, %v4108_v61  ;;  %v1604_v6 = vmul.f32 0.5, %v1476_v50 }
 0x23c   :  { %v982_v63 = vmul.f32 0.044715, %v854_v35  ;;  %v983_v60 = vmul.f32 0.044715, %v855_v8  ;;  %v1735_v36 = vmul.f32 %v1607_v46, %v4127_v44  ;;  %v1606_v5 = vmul.f32 0.5, %v1478_v3 }
 0x23d   :  { %v1236_v1 = vmul.f32 0.7978846, %v1108_v4  ;;  %v1109_v25 = vadd.f32 %v981_v17, %v4336_v62  ;;  %v1732_v20 = vmul.f32 %v1604_v6, %v4096_v34  ;;  %v4373_v19 = vadd.f32 %v4078_v23, %v2956_v56 }
 0x23e   :  { %v4375_v0 = vpop.eup %2656  ;;  %v1110_v51 = vadd.f32 %v982_v63, %v4342_v45  ;;  %v1111_v61 = vadd.f32 %v983_v60, %v4346_v49  ;;  %v1817_v43 = vpack.c.bf16 %v1735_v36, %v1733_v7  ;;  %v1734_v27 = vmul.f32 %v1606_v5, %v4112_v52 }
 0x23f   :  { %2664 = vtanh.f32 %v1236_v1  ;;  %v1237_v44 = vmul.f32 0.7978846, %v1109_v25  ;;  %v728_v18 = vmul.f32 %v4373_v19, %v4373_v19  ;;  %v4384_v34 = vadd.f32 %v4082_v58, %v2958_v57 }
 0x240   :  { %v4386_v23 = vpop.eup %2658  ;;  %v1238_v22 = vmul.f32 0.7978846, %v1110_v51  ;;  %v1239_v21 = vmul.f32 0.7978846, %v1111_v61  ;;  %2179 = vmatprep.mubr.bf16.mxu1 %v1817_v43  ;;  %v1816_v54 = vpack.c.bf16 %v1734_v27, %v1732_v20  ;;  %v4390_v14 = vadd.f32 %v4087_v37, %v2956_v56 }
 0x241   :  { %v4392_v52 = vpop.eup %2660  ;;  %2666 = vtanh.f32 %v1237_v44  ;;  %v856_v53 = vmul.f32 %v728_v18, %v4373_v19  ;;  %v729_v50 = vmul.f32 %v4384_v34, %v4384_v34  ;;  %v4399_v58 = vadd.f32 %v4091_v47, %v2958_v57 }
 0x242   :  { %v4401_v35 = vpop.eup %2662  ;;  %2668 = vtanh.f32 %v1238_v22  ;;  %2180 = vmatmul.mubr.bf16.gmra.mrb[80].mxu1 %v1816_v54  ;;  %v730_v37 = vmul.f32 %v4390_v14, %v4390_v14  ;;  %v1481_v8 = vadd.f32 1.0, %v4286_v13  ;;  %v1483_v46 = vadd.f32 1.0, %v4303_v55 }
 0x243   :  { %2670 = vtanh.f32 %v1239_v21  ;;  %v984_v3 = vmul.f32 0.044715, %v856_v53  ;;  %v857_v4 = vmul.f32 %v729_v50, %v4384_v34  ;;  %v731_v17 = vmul.f32 %v4399_v58, %v4399_v58  ;;  %v4814_v53 = vld [vmem:[#allocation15_spill] sm:$0xff] }
 0x244   :  { %v858_v47 = vmul.f32 %v730_v37, %v4390_v14  ;;  %v1609_v7 = vmul.f32 0.5, %v1481_v8  ;;  %v1611_v6 = vmul.f32 0.5, %v1483_v46  ;;  %v1480_v63 = vadd.f32 1.0, %v4277_v11  ;;  %v4412_v60 = vpop.f32.mrb[132].mxu0 }
 0x245   :  { %v1112_v36 = vadd.f32 %v984_v3, %v4373_v19  ;;  %v985_v13 = vmul.f32 0.044715, %v857_v4  ;;  %v859_v55 = vmul.f32 %v731_v17, %v4399_v58  ;;  %v1482_v5 = vadd.f32 1.0, %v4296_v38  ;;  %v2015_v1 = vpop.f32.mrb[133].mxu0  ;;  %v4815_v4 = vld [vmem:[#allocation21_spill] sm:$0xff]  ;;  %v4816_v17 = vld [vmem:[#allocation22_spill] sm:$0xff] }
 0x246   :  { %v986_v25 = vmul.f32 0.044715, %v858_v47  ;;  %v1737_v20 = vmul.f32 %v1609_v7, %v4164_v26  ;;  %v1739_v51 = vmul.f32 %v1611_v6, %v4178_v12  ;;  %v1608_v61 = vmul.f32 0.5, %v1480_v63  ;;  %v4419_v43 = vpop.f32.mrb[134].mxu0 }
 0x247   :  { %v1240_v27 = vmul.f32 0.7978846, %v1112_v36  ;;  %v1113_v11 = vadd.f32 %v985_v13, %v4384_v34  ;;  %v987_v44 = vmul.f32 0.044715, %v859_v55  ;;  %v1610_v18 = vmul.f32 0.5, %v1482_v5  ;;  %v2018_v22 = vpop.f32.mrb[135].mxu0 }
 0x248   :  { %v1114_v21 = vadd.f32 %v986_v25, %v4390_v14  ;;  %v1819_v54 = vpack.c.bf16 %v1739_v51, %v1737_v20  ;;  %v1736_v38 = vmul.f32 %v1608_v61, %v4155_v40  ;;  %v4426_v50 = vadd.f32 %v4814_v53, %v2956_v56 }
 0x249   :  { %v4428_v26 = vpop.eup %2664  ;;  %2672 = vtanh.f32 %v1240_v27  ;;  %v1241_v12 = vmul.f32 0.7978846, %v1113_v11  ;;  %v1115_v37 = vadd.f32 %v987_v44, %v4399_v58  ;;  %v1738_v8 = vmul.f32 %v1610_v18, %v4174_v33  ;;  %v4817_v33 = vld [vmem:[#allocation23_spill] sm:$0xff] }
 0x24a   :  { %v1242_v46 = vmul.f32 0.7978846, %v1114_v21  ;;  %2187 = vmatprep.mubr.bf16.mxu1 %v1819_v54  ;;  %v732_v3 = vmul.f32 %v4426_v50, %v4426_v50  ;;  %v4436_v40 = vadd.f32 %v4815_v4, %v2958_v57  ;;  %v4440_v47 = vadd.f32 %v4816_v17, %v2956_v56 }
 0x24b   :  { %v4442_v7 = vpop.eup %2666  ;;  %2674 = vtanh.f32 %v1241_v12  ;;  %v1243_v6 = vmul.f32 0.7978846, %v1115_v37  ;;  %v1818_v63 = vpack.c.bf16 %v1738_v8, %v1736_v38  ;;  %v4446_v36 = vadd.f32 %v4817_v33, %v2958_v57 }
 0x24c   :  { %v4448_v13 = vpop.eup %2668  ;;  %2676 = vtanh.f32 %v1242_v46  ;;  %v860_v55 = vmul.f32 %v732_v3, %v4426_v50  ;;  %v733_v5 = vmul.f32 %v4436_v40, %v4436_v40  ;;  %v734_v1 = vmul.f32 %v4440_v47, %v4440_v47 }
 0x24d   :  { %v4455_v25 = vpop.eup %2670  ;;  %2678 = vtanh.f32 %v1243_v6  ;;  %2188 = vmatmul.mubr.bf16.gmra.mrb[84].mxu1 %v1818_v63  ;;  %v735_v20 = vmul.f32 %v4446_v36, %v4446_v36  ;;  %v1485_v51 = vadd.f32 1.0, %v4338_v30  ;;  %v1487_v61 = vadd.f32 1.0, %v4354_v31 }
 0x24e   :  { %v988_v27 = vmul.f32 0.044715, %v860_v55  ;;  %v861_v11 = vmul.f32 %v733_v5, %v4436_v40  ;;  %v862_v44 = vmul.f32 %v734_v1, %v4440_v47  ;;  %v1484_v18 = vadd.f32 1.0, %v4322_v10  ;;  %v4464_v22 = vpop.f32.mrb[0].mxu1 }
 0x24f   :  { %v863_v21 = vmul.f32 %v735_v20, %v4446_v36  ;;  %v1613_v54 = vmul.f32 0.5, %v1485_v51  ;;  %v1615_v38 = vmul.f32 0.5, %v1487_v61  ;;  %v1486_v53 = vadd.f32 1.0, %v4348_v39  ;;  %v2023_v12 = vpop.f32.mrb[1].mxu1 }
 0x250   :  { %v1116_v30 = vadd.f32 %v988_v27, %v4426_v50  ;;  %v989_v37 = vmul.f32 0.044715, %v861_v11  ;;  %v990_v31 = vmul.f32 0.044715, %v862_v44  ;;  %v1612_v8 = vmul.f32 0.5, %v1484_v18  ;;  %v4469_v46 = vpop.f32.mrb[2].mxu1 }
 0x251   :  { %v991_v3 = vmul.f32 0.044715, %v863_v21  ;;  %v1741_v4 = vmul.f32 %v1613_v54, %v4228_v48  ;;  %v1743_v10 = vmul.f32 %v1615_v38, %v4243_v15  ;;  %v1614_v17 = vmul.f32 0.5, %v1486_v53  ;;  %v2026_v6 = vpop.f32.mrb[3].mxu1 }
 0x252   :  { %v1244_v63 = vmul.f32 0.7978846, %v1116_v30  ;;  %v1117_v33 = vadd.f32 %v989_v37, %v4436_v40  ;;  %v1118_v39 = vadd.f32 %v990_v31, %v4440_v47  ;;  %v1740_v55 = vmul.f32 %v1612_v8, %v4210_v16 }
 0x253   :  { %v4476_v5 = vpop.eup %2672  ;;  %v1119_v1 = vadd.f32 %v991_v3, %v4446_v36  ;;  %v1821_v20 = vpack.c.bf16 %v1743_v10, %v1741_v4  ;;  %v1742_v51 = vmul.f32 %v1614_v17, %v4235_v59  ;;  %v4482_v48 = vadd.f32 %v4157_v9, %v2956_v56  ;;  %v4818_v59 = vld [vmem:[#allocation16_spill] sm:$0xff] }
 0x254   :  { %2680 = vtanh.f32 %v1244_v63  ;;  %v1245_v15 = vmul.f32 0.7978846, %v1117_v33  ;;  %v1246_v61 = vmul.f32 0.7978846, %v1118_v39  ;;  %v4486_v27 = vadd.f32 %v4166_v2, %v2958_v57  ;;  %v4819_v2 = vld [vmem:[#allocation17_spill] sm:$0xff] }
 0x255   :  { %v4488_v11 = vpop.eup %2674  ;;  %v1247_v16 = vmul.f32 0.7978846, %v1119_v1  ;;  %2195 = vmatprep.mubr.bf16.mxu1 %v1821_v20  ;;  %v1820_v44 = vpack.c.bf16 %v1742_v51, %v1740_v55  ;;  %v736_v18 = vmul.f32 %v4482_v48, %v4482_v48  ;;  %v4494_v21 = vadd.f32 %v4818_v59, %v2956_v56 }
 0x256   :  { %v4496_v9 = vpop.eup %2676  ;;  %2682 = vtanh.f32 %v1245_v15  ;;  %v737_v54 = vmul.f32 %v4486_v27, %v4486_v27  ;;  %v4502_v38 = vadd.f32 %v4819_v2, %v2958_v57  ;;  %v1489_v53 = vadd.f32 1.0, %v4386_v23  ;;  %v4505_v12 = vpop.f32.mrb[4].mxu1 }
 0x257   :  { %v4507_v30 = vpop.eup %2678  ;;  %2684 = vtanh.f32 %v1246_v61  ;;  %2196 = vmatmul.mubr.bf16.gmra.mrb[88].mxu1 %v1820_v44  ;;  %v864_v37 = vmul.f32 %v736_v18, %v4482_v48  ;;  %v738_v31 = vmul.f32 %v4494_v21, %v4494_v21  ;;  %v1491_v8 = vadd.f32 1.0, %v4401_v35  ;;  %v2031_v3 = vpop.f32.mrb[5].mxu1 }
 0x258   :  { %2686 = vtanh.f32 %v1247_v16  ;;  %v865_v4 = vmul.f32 %v737_v54, %v4486_v27  ;;  %v739_v23 = vmul.f32 %v4502_v38, %v4502_v38  ;;  %v1617_v10 = vmul.f32 0.5, %v1489_v53  ;;  %v4516_v17 = vpop.f32.mrb[6].mxu1 }
 0x259   :  { %v992_v6 = vmul.f32 0.044715, %v864_v37  ;;  %v866_v63 = vmul.f32 %v738_v31, %v4494_v21  ;;  %v1619_v33 = vmul.f32 0.5, %v1491_v8  ;;  %v1488_v39 = vadd.f32 1.0, %v4375_v0  ;;  %v2034_v55 = vpop.f32.mrb[7].mxu1 }
 0x25a   :  { %v993_v1 = vmul.f32 0.044715, %v865_v4  ;;  %v867_v35 = vmul.f32 %v739_v23, %v4502_v38  ;;  %v1745_v20 = vmul.f32 %v1617_v10, %v4284_v28  ;;  %v1490_v51 = vadd.f32 1.0, %v4392_v52  ;;  %v4820_v23 = vld [vmem:[#allocation24_spill] sm:$0xff] }
 0x25b   :  { %v1120_v15 = vadd.f32 %v992_v6, %v4482_v48  ;;  %v994_v61 = vmul.f32 0.044715, %v866_v63  ;;  %v1747_v16 = vmul.f32 %v1619_v33, %v4294_v32  ;;  %v1616_v44 = vmul.f32 0.5, %v1488_v39 }
 0x25c   :  { %v1121_v18 = vadd.f32 %v993_v1, %v4486_v27  ;;  %v995_v59 = vmul.f32 0.044715, %v867_v35  ;;  %v1618_v54 = vmul.f32 0.5, %v1490_v51  ;;  %v4528_v0 = vadd.f32 %v4204_v42, %v2956_v56 }
 0x25d   :  { %v1248_v2 = vmul.f32 0.7978846, %v1120_v15  ;;  %v1122_v53 = vadd.f32 %v994_v61, %v4494_v21  ;;  %v1823_v28 = vpack.c.bf16 %v1747_v16, %v1745_v20  ;;  %v1744_v52 = vmul.f32 %v1616_v44, %v4273_v29  ;;  %v4821_v29 = vld [vmem:[#allocation25_spill] sm:$0xff]  ;;  %v4822_v15 = vld [vmem:[#allocation26_spill] sm:$0xff] }
 0x25e   :  { %v4532_v37 = vpop.eup %2680  ;;  %v1249_v31 = vmul.f32 0.7978846, %v1121_v18  ;;  %v1123_v32 = vadd.f32 %v995_v59, %v4502_v38  ;;  %v1746_v8 = vmul.f32 %v1618_v54, %v4290_v24  ;;  %v740_v3 = vmul.f32 %v4528_v0, %v4528_v0  ;;  %v4538_v4 = vpop.f32.mrb[8].mxu1 }
 0x25f   :  { %2688 = vtanh.f32 %v1248_v2  ;;  %v1250_v42 = vmul.f32 0.7978846, %v1122_v53  ;;  %2203 = vmatprep.mubr.bf16.mxu1 %v1823_v28  ;;  %v4542_v10 = vadd.f32 %v4820_v23, %v2958_v57  ;;  %v4546_v6 = vadd.f32 %v4821_v29, %v2956_v56  ;;  %v2039_v63 = vpop.f32.mrb[9].mxu1 }
 0x260   :  { %v4548_v33 = vpop.eup %2682  ;;  %2690 = vtanh.f32 %v1249_v31  ;;  %v1251_v24 = vmul.f32 0.7978846, %v1123_v32  ;;  %v1822_v39 = vpack.c.bf16 %v1746_v8, %v1744_v52  ;;  %v868_v55 = vmul.f32 %v740_v3, %v4528_v0  ;;  %v4551_v1 = vpop.f32.mrb[10].mxu1 }
 0x261   :  { %v4553_v35 = vpop.eup %2684  ;;  %2692 = vtanh.f32 %v1250_v42  ;;  %v741_v20 = vmul.f32 %v4542_v10, %v4542_v10  ;;  %v742_v51 = vmul.f32 %v4546_v6, %v4546_v6  ;;  %v4561_v61 = vadd.f32 %v4822_v15, %v2958_v57  ;;  %v2042_v16 = vpop.f32.mrb[11].mxu1 }
 0x262   :  { %v4563_v44 = vpop.eup %2686  ;;  %2694 = vtanh.f32 %v1251_v24  ;;  %2204 = vmatmul.mubr.bf16.gmra.mrb[92].mxu1 %v1822_v39  ;;  %v996_v18 = vmul.f32 0.044715, %v868_v55  ;;  %v1493_v59 = vadd.f32 1.0, %v4442_v7  ;;  %v1495_v54 = vadd.f32 1.0, %v4455_v25 }
 0x263   :  { %v869_v2 = vmul.f32 %v741_v20, %v4542_v10  ;;  %v870_v53 = vmul.f32 %v742_v51, %v4546_v6  ;;  %v743_v28 = vmul.f32 %v4561_v61, %v4561_v61  ;;  %v1492_v52 = vadd.f32 1.0, %v4428_v26 }
 0x264   :  { %v1124_v31 = vadd.f32 %v996_v18, %v4528_v0  ;;  %v1621_v32 = vmul.f32 0.5, %v1493_v59  ;;  %v1623_v8 = vmul.f32 0.5, %v1495_v54  ;;  %v1494_v3 = vadd.f32 1.0, %v4448_v13  ;;  %v4823_v59 = vld [vmem:[#allocation12_spill] sm:$0xff] }
 0x265   :  { %v997_v42 = vmul.f32 0.044715, %v869_v2  ;;  %v998_v23 = vmul.f32 0.044715, %v870_v53  ;;  %v871_v7 = vmul.f32 %v743_v28, %v4561_v61  ;;  %v1620_v25 = vmul.f32 0.5, %v1492_v52  ;;  %v4824_v52 = vld [vmem:[#allocation18_spill] sm:$0xff] }
 0x266   :  { %v1252_v29 = vmul.f32 0.7978846, %v1124_v31  ;;  %v1749_v63 = vmul.f32 %v1621_v32, %v4336_v62  ;;  %v1751_v24 = vmul.f32 %v1623_v8, %v4346_v49  ;;  %v1622_v39 = vmul.f32 0.5, %v1494_v3  ;;  %v4577_v55 = vpop.f32.mrb[12].mxu1  ;;  %v4825_v3 = vld [vmem:[#allocation19_spill] sm:$0xff] }
 0x267   :  { %v1125_v26 = vadd.f32 %v997_v42, %v4542_v10  ;;  %v1126_v20 = vadd.f32 %v998_v23, %v4546_v6  ;;  %v999_v51 = vmul.f32 0.044715, %v871_v7  ;;  %v1748_v13 = vmul.f32 %v1620_v25, %v4329_v41  ;;  %v2047_v15 = vpop.f32.mrb[13].mxu1  ;;  %v4826_v23 = vld [vmem:[#allocation27_spill] sm:$0xff] }
 0x268   :  { %2696 = vtanh.f32 %v1252_v29  ;;  %v1825_v16 = vpack.c.bf16 %v1751_v24, %v1749_v63  ;;  %v1750_v18 = vmul.f32 %v1622_v39, %v4342_v45  ;;  %v4585_v62 = vadd.f32 %v4823_v59, %v2956_v56  ;;  %v4587_v49 = vpop.f32.mrb[14].mxu1  ;;  %v4628_v59 = vld [vmem:[%s4773_s4] ss:$0 sm:$0xff]  ;;  %s2814_s4 = smov [#allocation8]  }
 0x269   :  { %v4589_v54 = vpop.eup %2688  ;;  %v1253_v2 = vmul.f32 0.7978846, %v1125_v26  ;;  %v1254_v53 = vmul.f32 0.7978846, %v1126_v20  ;;  %v1127_v28 = vadd.f32 %v999_v51, %v4561_v61  ;;  %v4594_v41 = vadd.f32 %v4824_v52, %v2958_v57  ;;  %v2050_v31 = vpop.f32.mrb[15].mxu1  ;;  %s2329_s10 = sshll.u32 %s2814_s4, 4  ;;  %s2330_s10 = int_to_ptr.vmem [resolvable:$true] %s2329_s10 }
 0x26a   :  { %v4596_v32 = vpop.eup %2690  ;;  %2211 = vmatprep.mubr.bf16.mxu1 %v1825_v16  ;;  %v1824_v45 = vpack.c.bf16 %v1750_v18, %v1748_v13  ;;  %v744_v8 = vmul.f32 %v4585_v62, %v4585_v62  ;;  %v4602_v42 = vadd.f32 %v4825_v3, %v2956_v56  ;;  %v4606_v7 = vadd.f32 %v4826_v23, %v2958_v57  ;;  %s2778_s11 = scalar_lea.vmem %s2330_s10, 8192  ;;  %p2783_p11 = scmp.lt.s32.totalorder %s2330_s10, %s2330_s10 }
 0x26b   :  { %v4608_v25 = vpop.eup %2692  ;;  %2698 = vtanh.f32 %v1253_v2  ;;  %v1255_v29 = vmul.f32 0.7978846, %v1127_v28  ;;  %v745_v63 = vmul.f32 %v4594_v41, %v4594_v41  ;;  %v1497_v24 = vadd.f32 1.0, %v4488_v11  ;;  %p2779_p10 = scmp.ne.s32.totalorder %s2330_s10, %s2778_s11  ;;  %p2784_p12 = scmp.lt.s32.totalorder %s2778_s11, %s2778_s11 }
 0x26c   :  { %v4613_v39 = vpop.eup %2694  ;;  %2700 = vtanh.f32 %v1254_v53  ;;  %2212 = vmatmul.mubr.bf16.gmra.mrb[96].mxu1 %v1824_v45  ;;  %v872_v56 = vmul.f32 %v744_v8, %v4585_v62  ;;  %v746_v26 = vmul.f32 %v4602_v42, %v4602_v42  ;;  %v747_v57 = vmul.f32 %v4606_v7, %v4606_v7 }
 0x26d   :  { %2702 = vtanh.f32 %v1255_v29  ;;  %v873_v20 = vmul.f32 %v745_v63, %v4594_v41  ;;  %v1499_v51 = vadd.f32 1.0, %v4507_v30  ;;  %v1625_v13 = vmul.f32 0.5, %v1497_v24  ;;  %p2785_p13 = por %p2784_p12, %p2783_p11 }
 0x26e   :  { %v1000_v15 = vmul.f32 0.044715, %v872_v56  ;;  %v874_v11 = vmul.f32 %v746_v26, %v4602_v42  ;;  %v875_v16 = vmul.f32 %v747_v57, %v4606_v7  ;;  %v1496_v18 = vadd.f32 1.0, %v4476_v5  ;;  %v4630_v2 = vpop.f32.mrb[16].mxu1  ;;  %v4827_v56 = vld [vmem:[#allocation20_spill] sm:$0xff] }
 0x26f   :  { %v1001_v53 = vmul.f32 0.044715, %v873_v20  ;;  %v1627_v28 = vmul.f32 0.5, %v1499_v51  ;;  %v1753_v52 = vmul.f32 %v1625_v13, %v4384_v34  ;;  %v1498_v30 = vadd.f32 1.0, %v4496_v9  ;;  %v2055_v31 = vpop.f32.mrb[17].mxu1  ;;  %p2786_p0 = pnand %p2785_p13, %p2779_p10 }
 0x270   :  { %v1128_v45 = vadd.f32 %v1000_v15, %v4585_v62  ;;  %v1002_v8 = vmul.f32 0.044715, %v874_v11  ;;  %v1003_v3 = vmul.f32 0.044715, %v875_v16  ;;  %v1624_v23 = vmul.f32 0.5, %v1496_v18  ;;  %v4635_v5 = vpop.f32.mrb[18].mxu1 }
 0x271   :  { %v1129_v29 = vadd.f32 %v1001_v53, %v4594_v41  ;;  %v1755_v63 = vmul.f32 %v1627_v28, %v4399_v58  ;;  %v1626_v24 = vmul.f32 0.5, %v1498_v30  ;;  %v2006_v26 = vadd.f32 %v4628_v59, %v4827_v56  ;;  %v2058_v57 = vpop.f32.mrb[19].mxu1  ;;  %v4828_v58 = vld [vmem:[#allocation13_spill] sm:$0xff] }
 0x272   :  { %v4641_v34 = vpop.eup %2696  ;;  %v1256_v9 = vmul.f32 0.7978846, %v1128_v45  ;;  %v1130_v20 = vadd.f32 %v1002_v8, %v4602_v42  ;;  %v1131_v51 = vadd.f32 %v1003_v3, %v4606_v7  ;;  %v1752_v13 = vmul.f32 %v1624_v23, %v4373_v19 }
 0x273   :  { %v1257_v15 = vmul.f32 0.7978846, %v1129_v29  ;;  %v1827_v11 = vpack.c.bf16 %v1755_v63, %v1753_v52  ;;  %v1754_v16 = vmul.f32 %v1626_v24, %v4390_v14  ;;  %2260 = vst [vmem:[#allocation8] sm:$0xff] %v2006_v26  ;;  %v2009_v18 = vadd.f32 %v4628_v59, %v4828_v58 }
 0x274   :  { %2704 = vtanh.f32 %v1256_v9  ;;  %v1258_v53 = vmul.f32 0.7978846, %v1130_v20  ;;  %v1259_v28 = vmul.f32 0.7978846, %v1131_v51  ;;  %v1501_v30 = vadd.f32 1.0, %v4548_v33 }
 0x275   :  { %v2699_v31 = vpop.eup %2698  ;;  %2706 = vtanh.f32 %v1257_v15  ;;  %2219 = vmatprep.mubr.bf16.mxu1 %v1827_v11  ;;  %v1826_v45 = vpack.c.bf16 %v1754_v16, %v1752_v13  ;;  %2261 = vst [vmem:[#allocation8 + $0x8] sm:$0xff] %v2009_v18  ;;  %v1503_v19 = vadd.f32 1.0, %v4563_v44  ;;  %v1500_v52 = vadd.f32 1.0, %v4532_v37 }
 0x276   :  { %v2701_v8 = vpop.eup %2700  ;;  %2708 = vtanh.f32 %v1258_v53  ;;  %v1629_v14 = vmul.f32 0.5, %v1501_v30  ;;  %v1502_v3 = vadd.f32 1.0, %v4553_v35  ;;  %v2022_v23 = vadd.f32 %v4628_v59, %v4464_v22 }
 0x277   :  { %v2703_v29 = vpop.eup %2702  ;;  %2710 = vtanh.f32 %v1259_v28  ;;  %2220 = vmatmul.mubr.bf16.gmra.mrb[100].mxu1 %v1826_v45  ;;  %v1631_v33 = vmul.f32 0.5, %v1503_v19  ;;  %v1628_v63 = vmul.f32 0.5, %v1500_v52  ;;  %v2014_v24 = vadd.f32 %v4628_v59, %v4412_v60 }
 0x278   :  { %v1757_v44 = vmul.f32 %v1629_v14, %v4436_v40  ;;  %v1630_v56 = vmul.f32 0.5, %v1502_v3  ;;  %2264 = vst [vmem:[#allocation8 + $0x20] sm:$0xff] %v2022_v23  ;;  %v2025_v37 = vadd.f32 %v4628_v59, %v4469_v46  ;;  %v2017_v35 = vadd.f32 %v4628_v59, %v4419_v43  ;;  %v4662_v26 = vpop.f32.mrb[20].mxu1 }
 0x279   :  { %v1759_v22 = vmul.f32 %v1631_v33, %v4446_v36  ;;  %v1756_v57 = vmul.f32 %v1628_v63, %v4426_v50  ;;  %2262 = vst [vmem:[#allocation8 + $0x10] sm:$0xff] %v2014_v24  ;;  %v1505_v9 = vadd.f32 1.0, %v4596_v32  ;;  %v1507_v60 = vadd.f32 1.0, %v4613_v39  ;;  %v2063_v40 = vpop.f32.mrb[21].mxu1 }
 0x27a   :  { %v1758_v20 = vmul.f32 %v1630_v56, %v4440_v47  ;;  %2265 = vst [vmem:[#allocation8 + $0x28] sm:$0xff] %v2025_v37  ;;  %2263 = vst [vmem:[#allocation8 + $0x18] sm:$0xff] %v2017_v35  ;;  %v1504_v46 = vadd.f32 1.0, %v4589_v54  ;;  %v1506_v43 = vadd.f32 1.0, %v4608_v25  ;;  %v2030_v51 = vadd.f32 %v4628_v59, %v4505_v12  ;;  %v4673_v36 = vpop.f32.mrb[22].mxu1 }
 0x27b   :  { %v1829_v50 = vpack.c.bf16 %v1759_v22, %v1757_v44  ;;  %v1633_v13 = vmul.f32 0.5, %v1505_v9  ;;  %v1635_v15 = vmul.f32 0.5, %v1507_v60  ;;  %v2033_v32 = vadd.f32 %v4628_v59, %v4516_v17  ;;  %v2066_v39 = vpop.f32.mrb[23].mxu1 }
 0x27c   :  { %v1828_v11 = vpack.c.bf16 %v1758_v20, %v1756_v57  ;;  %v1632_v47 = vmul.f32 0.5, %v1504_v46  ;;  %v1634_v16 = vmul.f32 0.5, %v1506_v43  ;;  %2266 = vst [vmem:[#allocation8 + $0x30] sm:$0xff] %v2030_v51  ;;  %v1509_v58 = vadd.f32 1.0, %v2699_v31 }
 0x27d   :  { %2227 = vmatprep.mubr.bf16.mxu1 %v1829_v50  ;;  %v1761_v54 = vmul.f32 %v1633_v13, %v4486_v27  ;;  %v1763_v25 = vmul.f32 %v1635_v15, %v4502_v38  ;;  %2267 = vst [vmem:[#allocation8 + $0x38] sm:$0xff] %v2033_v32  ;;  %v1511_v12 = vadd.f32 1.0, %v2703_v29  ;;  %v1508_v18 = vadd.f32 1.0, %v4641_v34 }
 0x27e   :  { %v2705_v53 = vpop.eup %2704  ;;  %v1760_v28 = vmul.f32 %v1632_v47, %v4482_v48  ;;  %v1762_v17 = vmul.f32 %v1634_v16, %v4494_v21  ;;  %v1637_v30 = vmul.f32 0.5, %v1509_v58  ;;  %v1510_v45 = vadd.f32 1.0, %v2701_v8 }
 0x27f   :  { %v2707_v19 = vpop.eup %2706  ;;  %2228 = vmatmul.mubr.bf16.gmra.mrb[104].mxu1 %v1828_v11  ;;  %v1831_v52 = vpack.c.bf16 %v1763_v25, %v1761_v54  ;;  %v1639_v31 = vmul.f32 0.5, %v1511_v12  ;;  %v1636_v14 = vmul.f32 0.5, %v1508_v18  ;;  %v2038_v27 = vadd.f32 %v4628_v59, %v4538_v4 }
 0x280   :  { %v2709_v38 = vpop.eup %2708  ;;  %v1830_v3 = vpack.c.bf16 %v1762_v17, %v1760_v28  ;;  %v1765_v23 = vmul.f32 %v1637_v30, %v4542_v10  ;;  %v1638_v34 = vmul.f32 0.5, %v1510_v45  ;;  %v2041_v48 = vadd.f32 %v4628_v59, %v4551_v1 }
 0x281   :  { %v2711_v29 = vpop.eup %2710  ;;  %2235 = vmatprep.mubr.bf16.mxu1 %v1831_v52  ;;  %v1767_v21 = vmul.f32 %v1639_v31, %v4561_v61  ;;  %v1764_v8 = vmul.f32 %v1636_v14, %v4528_v0  ;;  %2268 = vst [vmem:[#allocation8 + $0x40] sm:$0xff] %v2038_v27  ;;  %v1513_v33 = vadd.f32 1.0, %v2707_v19  ;;  %v1512_v63 = vadd.f32 1.0, %v2705_v53 }
 0x282   :  { %v1766_v24 = vmul.f32 %v1638_v34, %v4546_v6  ;;  %2269 = vst [vmem:[#allocation8 + $0x48] sm:$0xff] %v2041_v48  ;;  %v1515_v4 = vadd.f32 1.0, %v2711_v29  ;;  %v1514_v44 = vadd.f32 1.0, %v2709_v38  ;;  %v2046_v10 = vadd.f32 %v4628_v59, %v4577_v55  ;;  %v2069_v56 = vpop.f32.mrb[24].mxu1 }
 0x283   :  { %v1833_v37 = vpack.c.bf16 %v1767_v21, %v1765_v23  ;;  %v1641_v1 = vmul.f32 0.5, %v1513_v33  ;;  %v1640_v35 = vmul.f32 0.5, %v1512_v63  ;;  %v2049_v61 = vadd.f32 %v4628_v59, %v4587_v49  ;;  %v2071_v22 = vpop.f32.mrb[25].mxu1 }
 0x284   :  { %v1832_v0 = vpack.c.bf16 %v1766_v24, %v1764_v8  ;;  %v1643_v57 = vmul.f32 0.5, %v1515_v4  ;;  %v1642_v9 = vmul.f32 0.5, %v1514_v44  ;;  %2270 = vst [vmem:[#allocation8 + $0x50] sm:$0xff] %v2046_v10  ;;  %v2054_v6 = vadd.f32 %v4628_v59, %v4630_v2  ;;  %v2072_v60 = vpop.f32.mrb[26].mxu1 }
 0x285   :  { %v1769_v40 = vmul.f32 %v1641_v1, %v4594_v41  ;;  %v1768_v55 = vmul.f32 %v1640_v35, %v4585_v62  ;;  %2271 = vst [vmem:[#allocation8 + $0x58] sm:$0xff] %v2049_v61  ;;  %v2057_v20 = vadd.f32 %v4628_v59, %v4635_v5  ;;  %v2062_v49 = vadd.f32 %v4628_v59, %v4662_v26  ;;  %v2074_v46 = vpop.f32.mrb[27].mxu1 }
 0x286   :  { %v1771_v43 = vmul.f32 %v1643_v57, %v4606_v7  ;;  %v1770_v51 = vmul.f32 %v1642_v9, %v4602_v42  ;;  %2272 = vst [vmem:[#allocation8 + $0x60] sm:$0xff] %v2054_v6  ;;  %v2065_v2 = vadd.f32 %v4628_v59, %v4673_v36  ;;  %v2070_v41 = vadd.f32 %v4628_v59, %v2069_v56 }
 0x287   :  { %2236 = vmatmul.mubr.bf16.gmra.mrb[108].mxu1 %v1830_v3  ;;  %2273 = vst [vmem:[#allocation8 + $0x68] sm:$0xff] %v2057_v20  ;;  %2274 = vst [vmem:[#allocation8 + $0x70] sm:$0xff] %v2062_v49  ;;  %v2073_v62 = vadd.f32 %v4628_v59, %v2072_v60 }
 0x288   :  { %2243 = vmatprep.mubr.bf16.mxu1 %v1833_v37  ;;  %v1835_v5 = vpack.c.bf16 %v1771_v43, %v1769_v40  ;;  %v1834_v50 = vpack.c.bf16 %v1770_v51, %v1768_v55  ;;  %2275 = vst [vmem:[#allocation8 + $0x78] sm:$0xff] %v2065_v2  ;;  %2276 = vst [vmem:[#allocation8 + $0x80] sm:$0xff] %v2070_v41 }
 0x289   :  { %2277 = vst [vmem:[#allocation8 + $0x88] sm:$0xff] %v2073_v62 }
 0x28d   :  { %v2077_v7 = vpop.f32.mrb[28].mxu1 }
 0x28e   :  { %v2078_v42 = vadd.f32 %v4628_v59, %v2077_v7  ;;  %v2079_v26 = vpop.f32.mrb[29].mxu1 }
 0x28f   :  { %2244 = vmatmul.mubr.bf16.gmra.mrb[112].mxu1 %v1832_v0  ;;  %v2080_v13 = vpop.f32.mrb[30].mxu1 }
 0x290   :  { %2251 = vmatprep.mubr.bf16.mxu1 %v1835_v5  ;;  %2278 = vst [vmem:[#allocation8 + $0x90] sm:$0xff] %v2078_v42  ;;  %v2081_v36 = vadd.f32 %v4628_v59, %v2080_v13  ;;  %v2082_v15 = vpop.f32.mrb[31].mxu1 }
 0x292   :  { %2279 = vst [vmem:[#allocation8 + $0x98] sm:$0xff] %v2081_v36 }
 0x297   :  { %2252 = vmatmul.mubr.bf16.gmra.mrb[116].mxu1 %v1834_v50  ;;  %v2085_v32 = vpop.f32.mrb[32].mxu1 }
 0x298   :  { %v2086_v39 = vadd.f32 %v4628_v59, %v2085_v32  ;;  %v2087_v11 = vpop.f32.mrb[33].mxu1 }
 0x299   :  { %v2088_v47 = vpop.f32.mrb[34].mxu1 }
 0x29a   :  { %2280 = vst [vmem:[#allocation8 + $0xa0] sm:$0xff] %v2086_v39  ;;  %v2089_v16 = vadd.f32 %v4628_v59, %v2088_v47  ;;  %v2090_v58 = vpop.f32.mrb[35].mxu1 }
 0x29c   :  { %2281 = vst [vmem:[#allocation8 + $0xa8] sm:$0xff] %v2089_v16 }
 0x2a2   :  { %v2093_v54 = vpop.f32.mrb[36].mxu1 }
 0x2a3   :  { %v2094_v25 = vadd.f32 %v4628_v59, %v2093_v54  ;;  %v2095_v12 = vpop.f32.mrb[37].mxu1 }
 0x2a4   :  { %v2096_v18 = vpop.f32.mrb[38].mxu1 }
 0x2a5   :  { %2282 = vst [vmem:[#allocation8 + $0xb0] sm:$0xff] %v2094_v25  ;;  %v2097_v53 = vadd.f32 %v4628_v59, %v2096_v18  ;;  %v2098_v28 = vpop.f32.mrb[39].mxu1 }
 0x2a7   :  { %2283 = vst [vmem:[#allocation8 + $0xb8] sm:$0xff] %v2097_v53 }
 0x2ac   :  { %v2101_v17 = vpop.f32.mrb[40].mxu1 }
 0x2ad   :  { %v2102_v30 = vadd.f32 %v4628_v59, %v2101_v17  ;;  %v2103_v45 = vpop.f32.mrb[41].mxu1 }
 0x2ae   :  { %v2104_v19 = vpop.f32.mrb[42].mxu1 }
 0x2af   :  { %2284 = vst [vmem:[#allocation8 + $0xc0] sm:$0xff] %v2102_v30  ;;  %v2105_v52 = vadd.f32 %v4628_v59, %v2104_v19  ;;  %v2106_v31 = vpop.f32.mrb[43].mxu1 }
 0x2b1   :  { %2285 = vst [vmem:[#allocation8 + $0xc8] sm:$0xff] %v2105_v52 }
 0x2b7   :  { %v2109_v14 = vpop.f32.mrb[44].mxu1 }
 0x2b8   :  { %v2110_v27 = vadd.f32 %v4628_v59, %v2109_v14  ;;  %v2111_v38 = vpop.f32.mrb[45].mxu1 }
 0x2b9   :  { %v2112_v3 = vpop.f32.mrb[46].mxu1 }
 0x2ba   :  { %2286 = vst [vmem:[#allocation8 + $0xd0] sm:$0xff] %v2110_v27  ;;  %v2113_v23 = vadd.f32 %v4628_v59, %v2112_v3  ;;  %v2114_v34 = vpop.f32.mrb[47].mxu1 }
 0x2bc   :  { %2287 = vst [vmem:[#allocation8 + $0xd8] sm:$0xff] %v2113_v23 }
 0x2c1   :  { %v2117_v48 = vpop.f32.mrb[48].mxu1 }
 0x2c2   :  { %v2118_v29 = vadd.f32 %v4628_v59, %v2117_v48  ;;  %v2119_v21 = vpop.f32.mrb[49].mxu1 }
 0x2c3   :  { %v2120_v8 = vpop.f32.mrb[50].mxu1 }
 0x2c4   :  { %2288 = vst [vmem:[#allocation8 + $0xe0] sm:$0xff] %v2118_v29  ;;  %v2121_v33 = vadd.f32 %v4628_v59, %v2120_v8  ;;  %v2122_v63 = vpop.f32.mrb[51].mxu1 }
 0x2c6   :  { %2289 = vst [vmem:[#allocation8 + $0xe8] sm:$0xff] %v2121_v33 }
 0x2cc   :  { %v2125_v24 = vpop.f32.mrb[52].mxu1 }
 0x2cd   :  { %v2126_v4 = vadd.f32 %v4628_v59, %v2125_v24  ;;  %v2127_v44 = vpop.f32.mrb[53].mxu1 }
 0x2ce   :  { %v2128_v10 = vpop.f32.mrb[54].mxu1 }
 0x2cf   :  { %2290 = vst [vmem:[#allocation8 + $0xf0] sm:$0xff] %v2126_v4  ;;  %v2129_v56 = vadd.f32 %v4628_v59, %v2128_v10  ;;  %v2130_v37 = vpop.f32.mrb[55].mxu1 }
 0x2d1   :  { %2291 = vst [vmem:[#allocation8 + $0xf8] sm:$0xff] %v2129_v56 }
 0x2d6   :  { %v2133_v1 = vpop.f32.mrb[56].mxu1 }
 0x2d7   :  { %v2134_v35 = vadd.f32 %v4628_v59, %v2133_v1  ;;  %v2135_v61 = vpop.f32.mrb[57].mxu1 }
 0x2d8   :  { %v2136_v22 = vpop.f32.mrb[58].mxu1 }
 0x2d9   :  { %2292 = vst [vmem:[#allocation8 + $0x100] sm:$0xff] %v2134_v35  ;;  %v2137_v0 = vadd.f32 %v4628_v59, %v2136_v22  ;;  %v2138_v57 = vpop.f32.mrb[59].mxu1 }
 0x2db   :  { %2293 = vst [vmem:[#allocation8 + $0x108] sm:$0xff] %v2137_v0 }
 0x2e1   :  { %v2141_v9 = vpop.f32.mrb[60].mxu1 }
 0x2e2   :  { %v2142_v6 = vadd.f32 %v4628_v59, %v2141_v9  ;;  %v2143_v60 = vpop.f32.mrb[61].mxu1 }
 0x2e3   :  { %v2144_v40 = vpop.f32.mrb[62].mxu1 }
 0x2e4   :  { %2294 = vst [vmem:[#allocation8 + $0x110] sm:$0xff] %v2142_v6  ;;  %v2145_v55 = vadd.f32 %v4628_v59, %v2144_v40  ;;  %v2146_v20 = vpop.f32.mrb[63].mxu1 }
 0x2e6   :  { %2295 = vst [vmem:[#allocation8 + $0x118] sm:$0xff] %v2145_v55 }
 0x2eb   :  { %v2149_v49 = vpop.f32.mrb[64].mxu1 }
 0x2ec   :  { %v2150_v46 = vadd.f32 %v4628_v59, %v2149_v49  ;;  %v2151_v43 = vpop.f32.mrb[65].mxu1 }
 0x2ed   :  { %v2152_v51 = vpop.f32.mrb[66].mxu1 }
 0x2ee   :  { %2296 = vst [vmem:[#allocation8 + $0x120] sm:$0xff] %v2150_v46  ;;  %v2153_v2 = vadd.f32 %v4628_v59, %v2152_v51  ;;  %v2154_v41 = vpop.f32.mrb[67].mxu1 }
 0x2f0   :  { %2297 = vst [vmem:[#allocation8 + $0x128] sm:$0xff] %v2153_v2 }
 0x2f6   :  { %v2157_v62 = vpop.f32.mrb[68].mxu1 }
 0x2f7   :  { %v2158_v5 = vadd.f32 %v4628_v59, %v2157_v62  ;;  %v2159_v50 = vpop.f32.mrb[69].mxu1 }
 0x2f8   :  { %v2160_v7 = vpop.f32.mrb[70].mxu1 }
 0x2f9   :  { %2298 = vst [vmem:[#allocation8 + $0x130] sm:$0xff] %v2158_v5  ;;  %v2161_v42 = vadd.f32 %v4628_v59, %v2160_v7  ;;  %v2162_v26 = vpop.f32.mrb[71].mxu1 }
 0x2fb   :  { %2299 = vst [vmem:[#allocation8 + $0x138] sm:$0xff] %v2161_v42 }
 0x300   :  { %v2165_v13 = vpop.f32.mrb[72].mxu1 }
 0x301   :  { %v2166_v36 = vadd.f32 %v4628_v59, %v2165_v13  ;;  %v2167_v15 = vpop.f32.mrb[73].mxu1 }
 0x302   :  { %v2168_v32 = vpop.f32.mrb[74].mxu1 }
 0x303   :  { %2300 = vst [vmem:[#allocation8 + $0x140] sm:$0xff] %v2166_v36  ;;  %v2169_v39 = vadd.f32 %v4628_v59, %v2168_v32  ;;  %v2170_v11 = vpop.f32.mrb[75].mxu1 }
 0x305   :  { %2301 = vst [vmem:[#allocation8 + $0x148] sm:$0xff] %v2169_v39 }
 0x30b   :  { %v2173_v47 = vpop.f32.mrb[76].mxu1 }
 0x30c   :  { %v2174_v16 = vadd.f32 %v4628_v59, %v2173_v47  ;;  %v2175_v58 = vpop.f32.mrb[77].mxu1 }
 0x30d   :  { %v2176_v54 = vpop.f32.mrb[78].mxu1 }
 0x30e   :  { %2302 = vst [vmem:[#allocation8 + $0x150] sm:$0xff] %v2174_v16  ;;  %v2177_v25 = vadd.f32 %v4628_v59, %v2176_v54  ;;  %v2178_v12 = vpop.f32.mrb[79].mxu1 }
 0x310   :  { %2303 = vst [vmem:[#allocation8 + $0x158] sm:$0xff] %v2177_v25 }
 0x315   :  { %v2181_v18 = vpop.f32.mrb[80].mxu1 }
 0x316   :  { %v2182_v53 = vadd.f32 %v4628_v59, %v2181_v18  ;;  %v2183_v28 = vpop.f32.mrb[81].mxu1 }
 0x317   :  { %v2184_v17 = vpop.f32.mrb[82].mxu1 }
 0x318   :  { %2304 = vst [vmem:[#allocation8 + $0x160] sm:$0xff] %v2182_v53  ;;  %v2185_v30 = vadd.f32 %v4628_v59, %v2184_v17  ;;  %v2186_v45 = vpop.f32.mrb[83].mxu1 }
 0x31a   :  { %2305 = vst [vmem:[#allocation8 + $0x168] sm:$0xff] %v2185_v30 }
 0x320   :  { %v2189_v19 = vpop.f32.mrb[84].mxu1 }
 0x321   :  { %v2190_v52 = vadd.f32 %v4628_v59, %v2189_v19  ;;  %v2191_v31 = vpop.f32.mrb[85].mxu1 }
 0x322   :  { %v2192_v14 = vpop.f32.mrb[86].mxu1 }
 0x323   :  { %2306 = vst [vmem:[#allocation8 + $0x170] sm:$0xff] %v2190_v52  ;;  %v2193_v27 = vadd.f32 %v4628_v59, %v2192_v14  ;;  %v2194_v38 = vpop.f32.mrb[87].mxu1 }
 0x325   :  { %2307 = vst [vmem:[#allocation8 + $0x178] sm:$0xff] %v2193_v27 }
 0x32a   :  { %v2197_v3 = vpop.f32.mrb[88].mxu1 }
 0x32b   :  { %v2198_v23 = vadd.f32 %v4628_v59, %v2197_v3  ;;  %v2199_v34 = vpop.f32.mrb[89].mxu1 }
 0x32c   :  { %v2200_v48 = vpop.f32.mrb[90].mxu1 }
 0x32d   :  { %2308 = vst [vmem:[#allocation8 + $0x180] sm:$0xff] %v2198_v23  ;;  %v2201_v29 = vadd.f32 %v4628_v59, %v2200_v48  ;;  %v2202_v21 = vpop.f32.mrb[91].mxu1 }
 0x32f   :  { %2309 = vst [vmem:[#allocation8 + $0x188] sm:$0xff] %v2201_v29 }
 0x335   :  { %v2205_v8 = vpop.f32.mrb[92].mxu1 }
 0x336   :  { %v2206_v33 = vadd.f32 %v4628_v59, %v2205_v8  ;;  %v2207_v63 = vpop.f32.mrb[93].mxu1 }
 0x337   :  { %v2208_v24 = vpop.f32.mrb[94].mxu1 }
 0x338   :  { %2310 = vst [vmem:[#allocation8 + $0x190] sm:$0xff] %v2206_v33  ;;  %v2209_v4 = vadd.f32 %v4628_v59, %v2208_v24  ;;  %v2210_v44 = vpop.f32.mrb[95].mxu1 }
 0x33a   :  { %2311 = vst [vmem:[#allocation8 + $0x198] sm:$0xff] %v2209_v4 }
 0x33f   :  { %v2213_v10 = vpop.f32.mrb[96].mxu1 }
 0x340   :  { %v2214_v56 = vadd.f32 %v4628_v59, %v2213_v10  ;;  %v2215_v37 = vpop.f32.mrb[97].mxu1 }
 0x341   :  { %v2216_v1 = vpop.f32.mrb[98].mxu1 }
 0x342   :  { %2312 = vst [vmem:[#allocation8 + $0x1a0] sm:$0xff] %v2214_v56  ;;  %v2217_v35 = vadd.f32 %v4628_v59, %v2216_v1  ;;  %v2218_v61 = vpop.f32.mrb[99].mxu1 }
 0x344   :  { %2313 = vst [vmem:[#allocation8 + $0x1a8] sm:$0xff] %v2217_v35 }
 0x34a   :  { %v2221_v22 = vpop.f32.mrb[100].mxu1 }
 0x34b   :  { %v2222_v0 = vadd.f32 %v4628_v59, %v2221_v22  ;;  %v2223_v57 = vpop.f32.mrb[101].mxu1 }
 0x34c   :  { %v2224_v9 = vpop.f32.mrb[102].mxu1 }
 0x34d   :  { %2314 = vst [vmem:[#allocation8 + $0x1b0] sm:$0xff] %v2222_v0  ;;  %v2225_v6 = vadd.f32 %v4628_v59, %v2224_v9  ;;  %v2226_v60 = vpop.f32.mrb[103].mxu1 }
 0x34f   :  { %2315 = vst [vmem:[#allocation8 + $0x1b8] sm:$0xff] %v2225_v6 }
 0x352   :  { %v2229_v40 = vpop.f32.mrb[104].mxu1 }
 0x353   :  { %v2230_v55 = vadd.f32 %v4628_v59, %v2229_v40  ;;  %v2231_v20 = vpop.f32.mrb[105].mxu1 }
 0x354   :  { %v2232_v49 = vpop.f32.mrb[106].mxu1 }
 0x355   :  { %2316 = vst [vmem:[#allocation8 + $0x1c0] sm:$0xff] %v2230_v55  ;;  %v2233_v46 = vadd.f32 %v4628_v59, %v2232_v49  ;;  %v2234_v43 = vpop.f32.mrb[107].mxu1 }
 0x357   :  { %2317 = vst [vmem:[#allocation8 + $0x1c8] sm:$0xff] %v2233_v46 }
 0x35a   :  { %v2237_v51 = vpop.f32.mrb[108].mxu1 }
 0x35b   :  { %v2238_v2 = vadd.f32 %v4628_v59, %v2237_v51  ;;  %v2239_v41 = vpop.f32.mrb[109].mxu1 }
 0x35c   :  { %v2240_v62 = vpop.f32.mrb[110].mxu1 }
 0x35d   :  { %2318 = vst [vmem:[#allocation8 + $0x1d0] sm:$0xff] %v2238_v2  ;;  %v2241_v5 = vadd.f32 %v4628_v59, %v2240_v62  ;;  %v2242_v50 = vpop.f32.mrb[111].mxu1 }
 0x35f   :  { %2319 = vst [vmem:[#allocation8 + $0x1d8] sm:$0xff] %v2241_v5 }
 0x362   :  { %v2245_v7 = vpop.f32.mrb[112].mxu1 }
 0x363   :  { %v2246_v42 = vadd.f32 %v4628_v59, %v2245_v7  ;;  %v2247_v26 = vpop.f32.mrb[113].mxu1 }
 0x364   :  { %v2248_v13 = vpop.f32.mrb[114].mxu1 }
 0x365   :  { %2320 = vst [vmem:[#allocation8 + $0x1e0] sm:$0xff] %v2246_v42  ;;  %v2249_v36 = vadd.f32 %v4628_v59, %v2248_v13  ;;  %v2250_v15 = vpop.f32.mrb[115].mxu1 }
 0x367   :  { %2321 = vst [vmem:[#allocation8 + $0x1e8] sm:$0xff] %v2249_v36 }
 0x36a   :  { %v2253_v32 = vpop.f32.mrb[116].mxu1 }
 0x36b   :  { %v2254_v39 = vadd.f32 %v4628_v59, %v2253_v32  ;;  %v2255_v11 = vpop.f32.mrb[117].mxu1 }
 0x36c   :  { %v2256_v47 = vpop.f32.mrb[118].mxu1 }
 0x36d   :  { %2322 = vst [vmem:[#allocation8 + $0x1f0] sm:$0xff] %v2254_v39  ;;  %v2257_v16 = vadd.f32 %v4628_v59, %v2256_v47  ;;  %v2258_v58 = vpop.f32.mrb[119].mxu1 }
 0x36f   :  { %2323 = vst [vmem:[#allocation8 + $0x1f8] sm:$0xff] %v2257_v16 }
 0x370   :  { %2789 = shalt.err (!%p2786_p0)
}
 0x371   :  { %s2790_s14 = scalar_lea.hbm %s4774_s5, 8192 }
 0x372   :  { %p2791_p1 = scmp.ne.s32.totalorder %s4774_s5, %s2790_s14  ;;  %p2794_p2 = scmp.lt.u32.totalorder %s2790_s14, %s4774_s5 }
 0x374   :  { %p2796_p3 = pnand %p2794_p2, %p2791_p1 }
 0x376   :  { %2799 = shalt.err (!%p2796_p3)
}
 0x377   :  { %2335 = dma.vmem_to_hbm [thread:$0]  %s2330_s10, 8192, %s4774_s5, [#allocation4], %s2808_s30, %s2808_s30, %s2809_s6  }
 0x378   :  { %2804 = dma.done.wait [#allocation4], 8192  }
 0x379   :  { %2805 = vsyncadd [#allocation4], 4294959104 }
 0x37a   :  { %2339 = vsyncpa [#allocation3], 1 }
 0x37b   :  { %2340 = vsyncpa [#allocation6], 1 }
 0x37c   :  { %2341 = vsyncpa [#allocation4], 1 }

</bundles_post_ra>
